<compile_context>
chip_gen: v6e
topology: v6e:2x2x1
jax: 0.10.0
libtpu: 0.0.40
codegen_flags: <defaults>
</compile_context>

<pallas_src>
import jax
import jax.numpy as jnp
from jax.experimental import pallas as pl
from jax.experimental.pallas import tpu as pltpu


def _lstm_activations(gates, c, H):
    """LSTMCell gate math on (B, 4H) pre-activations with gate order [i,f,o,g].

    Sigmoid over the contiguous leading 3H lanes, tanh over the trailing H
    (plus the H-wide tanh(c')) -- the EUP is the saturating unit on the serial
    path, so avoid transcendentals on lanes that are never used.
    """
    sig = jax.nn.sigmoid(gates[:, :3 * H])        # [i | f | o]
    g = jnp.tanh(gates[:, 3 * H:])                # [g]
    i = sig[:, 0 * H:1 * H]
    f = sig[:, 1 * H:2 * H]
    o = sig[:, 2 * H:3 * H]
    c_new = f * c + i * g
    h_new = o * jnp.tanh(c_new)
    return h_new, c_new


def ptrnet_kernel(xw_ref,            # (B, S, 4H) x @ Wih + bias, per encoder step
                  ew_ref,            # (S, H, 4H) encoder Whh
                  dw_ref,            # (S, H, 4H) decoder Whh
                  db_ref,            # (S, 1, 4H) decoder bias (const -1 input folded)
                  w1_ref, w1b_ref,   # (H, H), (1, H)
                  w2_ref, w2b_ref,   # (H, H), (1, H)
                  vw_ref, vb_ref,    # (1, H), (1, 1)
                  out_ref,           # (B, S, S)
                  ench_ref):         # VMEM scratch (B, S, H)
    B, S, _ = xw_ref.shape
    H = w1_ref.shape[0]
    wdt = ew_ref.dtype                # weight dtype (f32, or bf16 on v6e/v7x)

    h = jnp.zeros((B, H), jnp.float32)
    c = jnp.zeros((B, H), jnp.float32)

    # ---------- encoder: only h @ Whh stays on the serial path ---------------
    # (x-projection and bias were precomputed into xw_ref off the recurrence)
    # NOTE: S is small; a static loop here is equivalent to
    # lax.fori_loop(..., unroll=True) and per-step stores bound liveness.
    for i in range(S):
        gates = (jnp.dot(h.astype(wdt), ew_ref[i],
                         preferred_element_type=jnp.float32)
                 + xw_ref[:, i, :])                                  # (B, 4H)
        h, c = _lstm_activations(gates, c, H)
        ench_ref[:, i, :] = h                                        # stage in VMEM

    enc_h_all = ench_ref[...]                                        # (B, S, H)

    # ---------- W1 projection of all encoder states: ONE matmul --------------
    w1e_all = (jnp.dot(enc_h_all.reshape(B * S, H).astype(w1_ref.dtype),
                       w1_ref[...], preferred_element_type=jnp.float32)
               + w1b_ref[...]).reshape(B, S, H)

    # ---------- loop-invariant loads hoisted out of the decoder loop ---------
    w2 = w2_ref[...]
    w2b = w2b_ref[...]
    vrow = vw_ref[...].reshape(1, 1, H)                              # (1, 1, H)
    vb = vb_ref[...]                                                 # (1, 1)

    # ---------- decoder + pointer attention ----------------------------------
    # decoder input is the constant -1 vector every step; its matmul is folded
    # into db_ref, so only h @ Whh remains on the serial path.
    for i in range(S):
        gates = (jnp.dot(h.astype(wdt), dw_ref[i],
                         preferred_element_type=jnp.float32)
                 + db_ref[i])                                        # (B, 4H)
        h, c = _lstm_activations(gates, c, H)

        w2h = (jnp.dot(h.astype(w2.dtype), w2,
                       preferred_element_type=jnp.float32) + w2b)    # (B, H)
        t = jnp.tanh(w1e_all + w2h[:, None, :])                      # (B, S, H)
        u = jnp.sum(t * vrow, axis=2) + vb                           # (B, S)

        # exact softmax over the sequence axis
        u_max = jnp.max(u, axis=1, keepdims=True)
        e = jnp.exp(u - u_max)
        a = e / jnp.sum(e, axis=1, keepdims=True)                    # (B, S)

        out_ref[:, i, :] = a          # per-step row store (no list + stack)

        # attention readout on the MXU (flash-style batched matvec) feeds the
        # next decoder step's hidden state.
        h = jnp.einsum('bqs,bsh->bqh', a[:, None, :], enc_h_all,
                       preferred_element_type=jnp.float32)[:, 0, :]  # (B, H)


def ptrnet_forward(x, params, block_b=None, weight_dtype=jnp.float32):
    """Fused PtrNet forward.

    weight_dtype=jnp.bfloat16 halves weight VMEM and roughly doubles MXU rate
    on v6e/v7x (activations stay f32, f32 accumulation); keep float32 on v5e.
    """
    B, S, D = x.shape
    H = params["w1"].shape[0]

    # batch tile: as large as possible (better MXU-row / VPU-sublane
    # utilization), capped at 128 so huge batches still stream through the grid.
    if block_b is None:
        block_b = B if B <= 128 else 128
    assert B % block_b == 0, "batch must be divisible by the batch block"

    def perm(w):
        # PyTorch gate order [i, f, g, o] -> [i, f, o, g] so the kernel can run
        # sigmoid on a contiguous 3H block and tanh on the trailing H only.
        return jnp.concatenate([w[..., 0 * H:2 * H],
                                w[..., 3 * H:4 * H],
                                w[..., 2 * H:3 * H]], axis=-1)

    enc_wih = perm(params["enc_wih"])            # (S, D, 4H)
    enc_whh = perm(params["enc_whh"])            # (S, H, 4H)
    enc_b = perm(params["enc_b"])                # (S, 1, 4H)
    dec_wih = perm(params["dec_wih"])            # (S, H, 4H)
    dec_whh = perm(params["dec_whh"])            # (S, H, 4H)
    dec_b = perm(params["dec_b"])                # (S, 1, 4H)

    # (1) x-projection OFF the serial recurrence: one batched matmul here
    #     (pipelines freely), encoder bias folded in.
    xw = jnp.einsum('bsd,sdf->bsf', x, enc_wih) + enc_b[:, 0, :][None]

    # (2) decoder input is the constant -1 vector every step: fold its matmul
    #     into the bias and drop dec_Wih from the kernel/VMEM entirely.
    dec_b_eff = dec_b - jnp.sum(dec_wih, axis=1, keepdims=True)

    ew = enc_whh.astype(weight_dtype)
    dw = dec_whh.astype(weight_dtype)
    w1 = params["w1"].astype(weight_dtype)
    w2 = params["w2"].astype(weight_dtype)

    args = (xw, ew, dw, dec_b_eff,
            w1, params["w1b"], w2, params["w2b"],
            params["vw"], params["vb"])

    def _bcast(ndim):
        return lambda b: (0,) * ndim             # weights broadcast over batch grid

    in_specs = [
        pl.BlockSpec((block_b, S, 4 * H), lambda b: (b, 0, 0)),      # xw
        pl.BlockSpec(ew.shape, _bcast(3)),
        pl.BlockSpec(dw.shape, _bcast(3)),
        pl.BlockSpec(dec_b_eff.shape, _bcast(3)),
        pl.BlockSpec((H, H), _bcast(2)),
        pl.BlockSpec((1, H), _bcast(2)),
        pl.BlockSpec((H, H), _bcast(2)),
        pl.BlockSpec((1, H), _bcast(2)),
        pl.BlockSpec((1, H), _bcast(2)),
        pl.BlockSpec((1, 1), _bcast(2)),
    ]
    out_specs = pl.BlockSpec((block_b, S, S), lambda b: (b, 0, 0))

    # advisory cost estimate so XLA schedules around the custom call correctly
    flops = int(2 * B * S * (H * 4 * H       # encoder h @ Whh
                             + H * H         # W1 projection
                             + H * 4 * H     # decoder h @ Whh
                             + H * H         # W2 projection
                             + 2 * S * H))   # pointer scores + MXU readout
    transcendentals = int(B * S * (10 * H + S * H + S))
    bytes_accessed = int(sum(int(a.size) * a.dtype.itemsize for a in args)
                         + B * S * S * 4)

    # TODO(synk): when scaling S/H, stream per-step enc/dec weights over an S
    # grid axis (pipeline_mode=pl.Buffered(1) for the constant-index weights)
    # and set vmem_limit_bytes so the working set fits v7x's 64 MiB VMEM; the
    # full weight set is < 0.5 MiB here so everything stays resident.
    return pl.pallas_call(
        ptrnet_kernel,
        out_shape=jax.ShapeDtypeStruct((B, S, S), jnp.float32),
        grid_spec=pltpu.PrefetchScalarGridSpec(
            num_scalar_prefetch=0,
            grid=(B // block_b,),
            in_specs=in_specs,
            out_specs=out_specs,
            scratch_shapes=[pltpu.VMEM((block_b, S, H), jnp.float32)],
        ),
        compiler_params=pltpu.CompilerParams(
            # batch axis is fully independent; with B // block_b >= 2 both
            # v7x TensorCores split it.
            dimension_semantics=("parallel",),
        ),
        cost_estimate=pl.CostEstimate(
            flops=flops,
            transcendentals=transcendentals,
            bytes_accessed=bytes_accessed),
    )(*args)


def ptrnet_reference(x, params):
    """Pure-JAX reference matching the PyTorch module step-by-step."""
    B, S, D = x.shape
    H = params["w1"].shape[0]

    def cell(xi, h, c, wih, whh, b):
        gates = xi @ wih + h @ whh + b
        i = jax.nn.sigmoid(gates[:, 0 * H:1 * H])
        f = jax.nn.sigmoid(gates[:, 1 * H:2 * H])
        g = jnp.tanh(gates[:, 2 * H:3 * H])
        o = jax.nn.sigmoid(gates[:, 3 * H:4 * H])
        c = f * c + i * g
        h = o * jnp.tanh(c)
        return h, c

    h = jnp.zeros((B, H), jnp.float32)
    c = jnp.zeros((B, H), jnp.float32)
    enc_h, w1e = [], []
    for i in range(S):
        h, c = cell(x[:, i, :], h, c,
                    params["enc_wih"][i], params["enc_whh"][i], params["enc_b"][i])
        enc_h.append(h)
        w1e.append(h @ params["w1"] + params["w1b"])
    enc_h = jnp.stack(enc_h, axis=1)
    w1e = jnp.stack(w1e, axis=1)

    dec_in = jnp.full((B, H), -1.0, jnp.float32)
    outs = []
    for i in range(S):
        h, c = cell(dec_in, h, c,
                    params["dec_wih"][i], params["dec_whh"][i], params["dec_b"][i])
        w2h = h @ params["w2"] + params["w2b"]
        u = jnp.sum(jnp.tanh(w1e + w2h[:, None, :]) * params["vw"][None, :, :],
                    axis=2) + params["vb"]
        a = jax.nn.softmax(u, axis=1)
        outs.append(a)
        h = jnp.sum(a[:, :, None] * enc_h, axis=1)
    return jnp.stack(outs, axis=1)


def init_params(key, seq_len, input_dim, hidden_dim):
    """Deterministic synthetic parameters (PyTorch-style uniform init)."""
    H = hidden_dim
    bound = 1.0 / float(H) ** 0.5
    ks = iter(jax.random.split(key, 16))

    def u(shape):
        return jax.random.uniform(next(ks), shape, jnp.float32, -bound, bound)

    return dict(
        enc_wih=u((seq_len, input_dim, 4 * H)),
        enc_whh=u((seq_len, H, 4 * H)),
        enc_b=u((seq_len, 1, 4 * H)) + u((seq_len, 1, 4 * H)),  # bias_ih + bias_hh
        dec_wih=u((seq_len, H, 4 * H)),
        dec_whh=u((seq_len, H, 4 * H)),
        dec_b=u((seq_len, 1, 4 * H)) + u((seq_len, 1, 4 * H)),
        w1=u((H, H)), w1b=u((1, H)),
        w2=u((H, H)), w2b=u((1, H)),
        vw=u((1, H)), vb=u((1, 1)),
    )


if __name__ == "__main__":
    batch_size, seq_len, input_dim, hidden_dim = 2, 8, 4, 32

    key = jax.random.PRNGKey(0)
    kx, kp = jax.random.split(key)
    x = jax.random.normal(kx, (batch_size, seq_len, input_dim), jnp.float32)
    params = init_params(kp, seq_len, input_dim, hidden_dim)

    out = jax.block_until_ready(ptrnet_forward(x, params))

    assert out.shape == (batch_size, seq_len, seq_len)
    # each decoder step emits a softmax over the sequence -> rows sum to 1
    assert bool(jnp.allclose(jnp.sum(out, axis=-1), 1.0, atol=1e-3))
    # validate against the pure-JAX reference of the PyTorch module
    ref = jax.block_until_ready(ptrnet_reference(x, params))
    assert bool(jnp.allclose(out, ref, atol=2e-3, rtol=2e-3))
    print("KERNEL_OK")
</pallas_src>

<mosaic_0001>
module attributes {stable_mosaic.version = 11 : i64} {
  func.func @ptrnet_kernel(%arg0: i32, %arg1: memref<2x8x128xf32, #tpu.memory_space<vmem>>, %arg2: memref<8x32x128xf32, #tpu.memory_space<vmem>>, %arg3: memref<8x32x128xf32, #tpu.memory_space<vmem>>, %arg4: memref<8x1x128xf32, #tpu.memory_space<vmem>>, %arg5: memref<32x32xf32, #tpu.memory_space<vmem>>, %arg6: memref<1x32xf32, #tpu.memory_space<vmem>>, %arg7: memref<32x32xf32, #tpu.memory_space<vmem>>, %arg8: memref<1x32xf32, #tpu.memory_space<vmem>>, %arg9: memref<1x32xf32, #tpu.memory_space<vmem>>, %arg10: memref<1x1xf32, #tpu.memory_space<vmem>>, %arg11: memref<2x8x8xf32, #tpu.memory_space<vmem>>, %arg12: memref<2x8x32xf32, #tpu.memory_space<vmem>>) attributes {dimension_semantics = [#tpu.dimension_semantics<parallel>], iteration_bounds = array<i64: 1>, scalar_prefetch = 0 : i64, scratch_operands = 1 : i64, tpu.core_type = #tpu.core_type<tc>, window_params = [{transform_indices = @transform_0, window_bounds = array<i64: 2, 8, 128>}, {pipeline_mode = #tpu.pipeline_mode<synchronous>, transform_indices = @transform_1, window_bounds = array<i64: 8, 32, 128>}, {pipeline_mode = #tpu.pipeline_mode<synchronous>, transform_indices = @transform_2, window_bounds = array<i64: 8, 32, 128>}, {pipeline_mode = #tpu.pipeline_mode<synchronous>, transform_indices = @transform_3, window_bounds = array<i64: 8, 1, 128>}, {pipeline_mode = #tpu.pipeline_mode<synchronous>, transform_indices = @transform_4, window_bounds = array<i64: 32, 32>}, {pipeline_mode = #tpu.pipeline_mode<synchronous>, transform_indices = @transform_5, window_bounds = array<i64: 1, 32>}, {pipeline_mode = #tpu.pipeline_mode<synchronous>, transform_indices = @transform_6, window_bounds = array<i64: 32, 32>}, {pipeline_mode = #tpu.pipeline_mode<synchronous>, transform_indices = @transform_7, window_bounds = array<i64: 1, 32>}, {pipeline_mode = #tpu.pipeline_mode<synchronous>, transform_indices = @transform_8, window_bounds = array<i64: 1, 32>}, {pipeline_mode = #tpu.pipeline_mode<synchronous>, transform_indices = @transform_9, window_bounds = array<i64: 1, 1>}, {transform_indices = @transform_10, window_bounds = array<i64: 2, 8, 8>}]} {
    %cst = arith.constant 0.000000e+00 : f32
    %0 = vector.broadcast %cst : f32 to vector<2x32xf32>
    %cst_0 = arith.constant 0.000000e+00 : f32
    %1 = vector.broadcast %cst_0 : f32 to vector<2x32xf32>
    %c0 = arith.constant 0 : index
    %c0_1 = arith.constant 0 : index
    %c0_2 = arith.constant 0 : index
    %2 = vector.load %arg2[%c0, %c0_1, %c0_2] : memref<8x32x128xf32, #tpu.memory_space<vmem>>, vector<1x32x128xf32>
    %3 = vector.shape_cast %2 : vector<1x32x128xf32> to vector<32x128xf32>
    %cst_3 = arith.constant dense<0.000000e+00> : vector<2x128xf32>
    %4 = tpu.matmul %0, %3, %cst_3 {dimension_numbers = #tpu.dot_dimension_numbers<[1], [0], [0], [1], [0, 0, 1, 1], [], []>} : vector<2x32xf32>, vector<32x128xf32>, vector<2x128xf32> -> vector<2x128xf32>
    %c0_4 = arith.constant 0 : index
    %c0_5 = arith.constant 0 : index
    %c0_6 = arith.constant 0 : index
    %5 = vector.load %arg1[%c0_4, %c0_5, %c0_6] : memref<2x8x128xf32, #tpu.memory_space<vmem>>, vector<2x1x128xf32>
    %6 = vector.shape_cast %5 : vector<2x1x128xf32> to vector<2x128xf32>
    %7 = arith.addf %4, %6 : vector<2x128xf32>
    %8 = vector.extract_strided_slice %7 {offsets = [0, 0], sizes = [2, 96], strides = [1, 1]} : vector<2x128xf32> to vector<2x96xf32>
    %9 = arith.negf %8 : vector<2x96xf32>
    %10 = math.exp %9 : vector<2x96xf32>
    %cst_7 = arith.constant 1.000000e+00 : f32
    %11 = vector.broadcast %cst_7 : f32 to vector<2x96xf32>
    %12 = arith.addf %11, %10 : vector<2x96xf32>
    %13 = arith.divf %11, %12 : vector<2x96xf32>
    %14 = vector.extract_strided_slice %7 {offsets = [0, 96], sizes = [2, 32], strides = [1, 1]} : vector<2x128xf32> to vector<2x32xf32>
    %15 = math.tanh %14 : vector<2x32xf32>
    %16 = vector.extract_strided_slice %13 {offsets = [0, 0], sizes = [2, 32], strides = [1, 1]} : vector<2x96xf32> to vector<2x32xf32>
    %17 = vector.extract_strided_slice %13 {offsets = [0, 32], sizes = [2, 32], strides = [1, 1]} : vector<2x96xf32> to vector<2x32xf32>
    %18 = vector.extract_strided_slice %13 {offsets = [0, 64], sizes = [2, 32], strides = [1, 1]} : vector<2x96xf32> to vector<2x32xf32>
    %19 = arith.mulf %17, %1 : vector<2x32xf32>
    %20 = arith.mulf %16, %15 : vector<2x32xf32>
    %21 = arith.addf %19, %20 : vector<2x32xf32>
    %22 = math.tanh %21 : vector<2x32xf32>
    %23 = arith.mulf %18, %22 : vector<2x32xf32>
    %c0_8 = arith.constant 0 : index
    %c0_9 = arith.constant 0 : index
    %c0_10 = arith.constant 0 : index
    %24 = vector.load %arg12[%c0_8, %c0_9, %c0_10] : memref<2x8x32xf32, #tpu.memory_space<vmem>>, vector<2x1x32xf32>
    %25 = vector.shape_cast %24 : vector<2x1x32xf32> to vector<2x32xf32>
    %26 = vector.shape_cast %23 : vector<2x32xf32> to vector<2x1x32xf32>
    tpu.vector_store %arg12[%c0_8, %c0_9, %c0_10], %26 {strides = array<i32>} : memref<2x8x32xf32, #tpu.memory_space<vmem>>, vector<2x1x32xf32>,
    %c1 = arith.constant 1 : index
    %c0_11 = arith.constant 0 : index
    %c0_12 = arith.constant 0 : index
    %27 = vector.load %arg2[%c1, %c0_11, %c0_12] : memref<8x32x128xf32, #tpu.memory_space<vmem>>, vector<1x32x128xf32>
    %28 = vector.shape_cast %27 : vector<1x32x128xf32> to vector<32x128xf32>
    %cst_13 = arith.constant dense<0.000000e+00> : vector<2x128xf32>
    %29 = tpu.matmul %23, %28, %cst_13 {dimension_numbers = #tpu.dot_dimension_numbers<[1], [0], [0], [1], [0, 0, 1, 1], [], []>} : vector<2x32xf32>, vector<32x128xf32>, vector<2x128xf32> -> vector<2x128xf32>
    %c0_14 = arith.constant 0 : index
    %c1_15 = arith.constant 1 : index
    %c0_16 = arith.constant 0 : index
    %30 = vector.load %arg1[%c0_14, %c1_15, %c0_16] : memref<2x8x128xf32, #tpu.memory_space<vmem>>, vector<2x1x128xf32>
    %31 = vector.shape_cast %30 : vector<2x1x128xf32> to vector<2x128xf32>
    %32 = arith.addf %29, %31 : vector<2x128xf32>
    %33 = vector.extract_strided_slice %32 {offsets = [0, 0], sizes = [2, 96], strides = [1, 1]} : vector<2x128xf32> to vector<2x96xf32>
    %34 = arith.negf %33 : vector<2x96xf32>
    %35 = math.exp %34 : vector<2x96xf32>
    %cst_17 = arith.constant 1.000000e+00 : f32
    %36 = vector.broadcast %cst_17 : f32 to vector<2x96xf32>
    %37 = arith.addf %36, %35 : vector<2x96xf32>
    %38 = arith.divf %36, %37 : vector<2x96xf32>
    %39 = vector.extract_strided_slice %32 {offsets = [0, 96], sizes = [2, 32], strides = [1, 1]} : vector<2x128xf32> to vector<2x32xf32>
    %40 = math.tanh %39 : vector<2x32xf32>
    %41 = vector.extract_strided_slice %38 {offsets = [0, 0], sizes = [2, 32], strides = [1, 1]} : vector<2x96xf32> to vector<2x32xf32>
    %42 = vector.extract_strided_slice %38 {offsets = [0, 32], sizes = [2, 32], strides = [1, 1]} : vector<2x96xf32> to vector<2x32xf32>
    %43 = vector.extract_strided_slice %38 {offsets = [0, 64], sizes = [2, 32], strides = [1, 1]} : vector<2x96xf32> to vector<2x32xf32>
    %44 = arith.mulf %42, %21 : vector<2x32xf32>
    %45 = arith.mulf %41, %40 : vector<2x32xf32>
    %46 = arith.addf %44, %45 : vector<2x32xf32>
    %47 = math.tanh %46 : vector<2x32xf32>
    %48 = arith.mulf %43, %47 : vector<2x32xf32>
    %c0_18 = arith.constant 0 : index
    %c1_19 = arith.constant 1 : index
    %c0_20 = arith.constant 0 : index
    %49 = vector.load %arg12[%c0_18, %c1_19, %c0_20] : memref<2x8x32xf32, #tpu.memory_space<vmem>>, vector<2x1x32xf32>
    %50 = vector.shape_cast %49 : vector<2x1x32xf32> to vector<2x32xf32>
    %51 = vector.shape_cast %48 : vector<2x32xf32> to vector<2x1x32xf32>
    tpu.vector_store %arg12[%c0_18, %c1_19, %c0_20], %51 {strides = array<i32>} : memref<2x8x32xf32, #tpu.memory_space<vmem>>, vector<2x1x32xf32>,
    %c2 = arith.constant 2 : index
    %c0_21 = arith.constant 0 : index
    %c0_22 = arith.constant 0 : index
    %52 = vector.load %arg2[%c2, %c0_21, %c0_22] : memref<8x32x128xf32, #tpu.memory_space<vmem>>, vector<1x32x128xf32>
    %53 = vector.shape_cast %52 : vector<1x32x128xf32> to vector<32x128xf32>
    %cst_23 = arith.constant dense<0.000000e+00> : vector<2x128xf32>
    %54 = tpu.matmul %48, %53, %cst_23 {dimension_numbers = #tpu.dot_dimension_numbers<[1], [0], [0], [1], [0, 0, 1, 1], [], []>} : vector<2x32xf32>, vector<32x128xf32>, vector<2x128xf32> -> vector<2x128xf32>
    %c0_24 = arith.constant 0 : index
    %c2_25 = arith.constant 2 : index
    %c0_26 = arith.constant 0 : index
    %55 = vector.load %arg1[%c0_24, %c2_25, %c0_26] : memref<2x8x128xf32, #tpu.memory_space<vmem>>, vector<2x1x128xf32>
    %56 = vector.shape_cast %55 : vector<2x1x128xf32> to vector<2x128xf32>
    %57 = arith.addf %54, %56 : vector<2x128xf32>
    %58 = vector.extract_strided_slice %57 {offsets = [0, 0], sizes = [2, 96], strides = [1, 1]} : vector<2x128xf32> to vector<2x96xf32>
    %59 = arith.negf %58 : vector<2x96xf32>
    %60 = math.exp %59 : vector<2x96xf32>
    %cst_27 = arith.constant 1.000000e+00 : f32
    %61 = vector.broadcast %cst_27 : f32 to vector<2x96xf32>
    %62 = arith.addf %61, %60 : vector<2x96xf32>
    %63 = arith.divf %61, %62 : vector<2x96xf32>
    %64 = vector.extract_strided_slice %57 {offsets = [0, 96], sizes = [2, 32], strides = [1, 1]} : vector<2x128xf32> to vector<2x32xf32>
    %65 = math.tanh %64 : vector<2x32xf32>
    %66 = vector.extract_strided_slice %63 {offsets = [0, 0], sizes = [2, 32], strides = [1, 1]} : vector<2x96xf32> to vector<2x32xf32>
    %67 = vector.extract_strided_slice %63 {offsets = [0, 32], sizes = [2, 32], strides = [1, 1]} : vector<2x96xf32> to vector<2x32xf32>
    %68 = vector.extract_strided_slice %63 {offsets = [0, 64], sizes = [2, 32], strides = [1, 1]} : vector<2x96xf32> to vector<2x32xf32>
    %69 = arith.mulf %67, %46 : vector<2x32xf32>
    %70 = arith.mulf %66, %65 : vector<2x32xf32>
    %71 = arith.addf %69, %70 : vector<2x32xf32>
    %72 = math.tanh %71 : vector<2x32xf32>
    %73 = arith.mulf %68, %72 : vector<2x32xf32>
    %c0_28 = arith.constant 0 : index
    %c2_29 = arith.constant 2 : index
    %c0_30 = arith.constant 0 : index
    %74 = vector.load %arg12[%c0_28, %c2_29, %c0_30] : memref<2x8x32xf32, #tpu.memory_space<vmem>>, vector<2x1x32xf32>
    %75 = vector.shape_cast %74 : vector<2x1x32xf32> to vector<2x32xf32>
    %76 = vector.shape_cast %73 : vector<2x32xf32> to vector<2x1x32xf32>
    tpu.vector_store %arg12[%c0_28, %c2_29, %c0_30], %76 {strides = array<i32>} : memref<2x8x32xf32, #tpu.memory_space<vmem>>, vector<2x1x32xf32>,
    %c3 = arith.constant 3 : index
    %c0_31 = arith.constant 0 : index
    %c0_32 = arith.constant 0 : index
    %77 = vector.load %arg2[%c3, %c0_31, %c0_32] : memref<8x32x128xf32, #tpu.memory_space<vmem>>, vector<1x32x128xf32>
    %78 = vector.shape_cast %77 : vector<1x32x128xf32> to vector<32x128xf32>
    %cst_33 = arith.constant dense<0.000000e+00> : vector<2x128xf32>
    %79 = tpu.matmul %73, %78, %cst_33 {dimension_numbers = #tpu.dot_dimension_numbers<[1], [0], [0], [1], [0, 0, 1, 1], [], []>} : vector<2x32xf32>, vector<32x128xf32>, vector<2x128xf32> -> vector<2x128xf32>
    %c0_34 = arith.constant 0 : index
    %c3_35 = arith.constant 3 : index
    %c0_36 = arith.constant 0 : index
    %80 = vector.load %arg1[%c0_34, %c3_35, %c0_36] : memref<2x8x128xf32, #tpu.memory_space<vmem>>, vector<2x1x128xf32>
    %81 = vector.shape_cast %80 : vector<2x1x128xf32> to vector<2x128xf32>
    %82 = arith.addf %79, %81 : vector<2x128xf32>
    %83 = vector.extract_strided_slice %82 {offsets = [0, 0], sizes = [2, 96], strides = [1, 1]} : vector<2x128xf32> to vector<2x96xf32>
    %84 = arith.negf %83 : vector<2x96xf32>
    %85 = math.exp %84 : vector<2x96xf32>
    %cst_37 = arith.constant 1.000000e+00 : f32
    %86 = vector.broadcast %cst_37 : f32 to vector<2x96xf32>
    %87 = arith.addf %86, %85 : vector<2x96xf32>
    %88 = arith.divf %86, %87 : vector<2x96xf32>
    %89 = vector.extract_strided_slice %82 {offsets = [0, 96], sizes = [2, 32], strides = [1, 1]} : vector<2x128xf32> to vector<2x32xf32>
    %90 = math.tanh %89 : vector<2x32xf32>
    %91 = vector.extract_strided_slice %88 {offsets = [0, 0], sizes = [2, 32], strides = [1, 1]} : vector<2x96xf32> to vector<2x32xf32>
    %92 = vector.extract_strided_slice %88 {offsets = [0, 32], sizes = [2, 32], strides = [1, 1]} : vector<2x96xf32> to vector<2x32xf32>
    %93 = vector.extract_strided_slice %88 {offsets = [0, 64], sizes = [2, 32], strides = [1, 1]} : vector<2x96xf32> to vector<2x32xf32>
    %94 = arith.mulf %92, %71 : vector<2x32xf32>
    %95 = arith.mulf %91, %90 : vector<2x32xf32>
    %96 = arith.addf %94, %95 : vector<2x32xf32>
    %97 = math.tanh %96 : vector<2x32xf32>
    %98 = arith.mulf %93, %97 : vector<2x32xf32>
    %c0_38 = arith.constant 0 : index
    %c3_39 = arith.constant 3 : index
    %c0_40 = arith.constant 0 : index
    %99 = vector.load %arg12[%c0_38, %c3_39, %c0_40] : memref<2x8x32xf32, #tpu.memory_space<vmem>>, vector<2x1x32xf32>
    %100 = vector.shape_cast %99 : vector<2x1x32xf32> to vector<2x32xf32>
    %101 = vector.shape_cast %98 : vector<2x32xf32> to vector<2x1x32xf32>
    tpu.vector_store %arg12[%c0_38, %c3_39, %c0_40], %101 {strides = array<i32>} : memref<2x8x32xf32, #tpu.memory_space<vmem>>, vector<2x1x32xf32>,
    %c4 = arith.constant 4 : index
    %c0_41 = arith.constant 0 : index
    %c0_42 = arith.constant 0 : index
    %102 = vector.load %arg2[%c4, %c0_41, %c0_42] : memref<8x32x128xf32, #tpu.memory_space<vmem>>, vector<1x32x128xf32>
    %103 = vector.shape_cast %102 : vector<1x32x128xf32> to vector<32x128xf32>
    %cst_43 = arith.constant dense<0.000000e+00> : vector<2x128xf32>
    %104 = tpu.matmul %98, %103, %cst_43 {dimension_numbers = #tpu.dot_dimension_numbers<[1], [0], [0], [1], [0, 0, 1, 1], [], []>} : vector<2x32xf32>, vector<32x128xf32>, vector<2x128xf32> -> vector<2x128xf32>
    %c0_44 = arith.constant 0 : index
    %c4_45 = arith.constant 4 : index
    %c0_46 = arith.constant 0 : index
    %105 = vector.load %arg1[%c0_44, %c4_45, %c0_46] : memref<2x8x128xf32, #tpu.memory_space<vmem>>, vector<2x1x128xf32>
    %106 = vector.shape_cast %105 : vector<2x1x128xf32> to vector<2x128xf32>
    %107 = arith.addf %104, %106 : vector<2x128xf32>
    %108 = vector.extract_strided_slice %107 {offsets = [0, 0], sizes = [2, 96], strides = [1, 1]} : vector<2x128xf32> to vector<2x96xf32>
    %109 = arith.negf %108 : vector<2x96xf32>
    %110 = math.exp %109 : vector<2x96xf32>
    %cst_47 = arith.constant 1.000000e+00 : f32
    %111 = vector.broadcast %cst_47 : f32 to vector<2x96xf32>
    %112 = arith.addf %111, %110 : vector<2x96xf32>
    %113 = arith.divf %111, %112 : vector<2x96xf32>
    %114 = vector.extract_strided_slice %107 {offsets = [0, 96], sizes = [2, 32], strides = [1, 1]} : vector<2x128xf32> to vector<2x32xf32>
    %115 = math.tanh %114 : vector<2x32xf32>
    %116 = vector.extract_strided_slice %113 {offsets = [0, 0], sizes = [2, 32], strides = [1, 1]} : vector<2x96xf32> to vector<2x32xf32>
    %117 = vector.extract_strided_slice %113 {offsets = [0, 32], sizes = [2, 32], strides = [1, 1]} : vector<2x96xf32> to vector<2x32xf32>
    %118 = vector.extract_strided_slice %113 {offsets = [0, 64], sizes = [2, 32], strides = [1, 1]} : vector<2x96xf32> to vector<2x32xf32>
    %119 = arith.mulf %117, %96 : vector<2x32xf32>
    %120 = arith.mulf %116, %115 : vector<2x32xf32>
    %121 = arith.addf %119, %120 : vector<2x32xf32>
    %122 = math.tanh %121 : vector<2x32xf32>
    %123 = arith.mulf %118, %122 : vector<2x32xf32>
    %c0_48 = arith.constant 0 : index
    %c4_49 = arith.constant 4 : index
    %c0_50 = arith.constant 0 : index
    %124 = vector.load %arg12[%c0_48, %c4_49, %c0_50] : memref<2x8x32xf32, #tpu.memory_space<vmem>>, vector<2x1x32xf32>
    %125 = vector.shape_cast %124 : vector<2x1x32xf32> to vector<2x32xf32>
    %126 = vector.shape_cast %123 : vector<2x32xf32> to vector<2x1x32xf32>
    tpu.vector_store %arg12[%c0_48, %c4_49, %c0_50], %126 {strides = array<i32>} : memref<2x8x32xf32, #tpu.memory_space<vmem>>, vector<2x1x32xf32>,
    %c5 = arith.constant 5 : index
    %c0_51 = arith.constant 0 : index
    %c0_52 = arith.constant 0 : index
    %127 = vector.load %arg2[%c5, %c0_51, %c0_52] : memref<8x32x128xf32, #tpu.memory_space<vmem>>, vector<1x32x128xf32>
    %128 = vector.shape_cast %127 : vector<1x32x128xf32> to vector<32x128xf32>
    %cst_53 = arith.constant dense<0.000000e+00> : vector<2x128xf32>
    %129 = tpu.matmul %123, %128, %cst_53 {dimension_numbers = #tpu.dot_dimension_numbers<[1], [0], [0], [1], [0, 0, 1, 1], [], []>} : vector<2x32xf32>, vector<32x128xf32>, vector<2x128xf32> -> vector<2x128xf32>
    %c0_54 = arith.constant 0 : index
    %c5_55 = arith.constant 5 : index
    %c0_56 = arith.constant 0 : index
    %130 = vector.load %arg1[%c0_54, %c5_55, %c0_56] : memref<2x8x128xf32, #tpu.memory_space<vmem>>, vector<2x1x128xf32>
    %131 = vector.shape_cast %130 : vector<2x1x128xf32> to vector<2x128xf32>
    %132 = arith.addf %129, %131 : vector<2x128xf32>
    %133 = vector.extract_strided_slice %132 {offsets = [0, 0], sizes = [2, 96], strides = [1, 1]} : vector<2x128xf32> to vector<2x96xf32>
    %134 = arith.negf %133 : vector<2x96xf32>
    %135 = math.exp %134 : vector<2x96xf32>
    %cst_57 = arith.constant 1.000000e+00 : f32
    %136 = vector.broadcast %cst_57 : f32 to vector<2x96xf32>
    %137 = arith.addf %136, %135 : vector<2x96xf32>
    %138 = arith.divf %136, %137 : vector<2x96xf32>
    %139 = vector.extract_strided_slice %132 {offsets = [0, 96], sizes = [2, 32], strides = [1, 1]} : vector<2x128xf32> to vector<2x32xf32>
    %140 = math.tanh %139 : vector<2x32xf32>
    %141 = vector.extract_strided_slice %138 {offsets = [0, 0], sizes = [2, 32], strides = [1, 1]} : vector<2x96xf32> to vector<2x32xf32>
    %142 = vector.extract_strided_slice %138 {offsets = [0, 32], sizes = [2, 32], strides = [1, 1]} : vector<2x96xf32> to vector<2x32xf32>
    %143 = vector.extract_strided_slice %138 {offsets = [0, 64], sizes = [2, 32], strides = [1, 1]} : vector<2x96xf32> to vector<2x32xf32>
    %144 = arith.mulf %142, %121 : vector<2x32xf32>
    %145 = arith.mulf %141, %140 : vector<2x32xf32>
    %146 = arith.addf %144, %145 : vector<2x32xf32>
    %147 = math.tanh %146 : vector<2x32xf32>
    %148 = arith.mulf %143, %147 : vector<2x32xf32>
    %c0_58 = arith.constant 0 : index
    %c5_59 = arith.constant 5 : index
    %c0_60 = arith.constant 0 : index
    %149 = vector.load %arg12[%c0_58, %c5_59, %c0_60] : memref<2x8x32xf32, #tpu.memory_space<vmem>>, vector<2x1x32xf32>
    %150 = vector.shape_cast %149 : vector<2x1x32xf32> to vector<2x32xf32>
    %151 = vector.shape_cast %148 : vector<2x32xf32> to vector<2x1x32xf32>
    tpu.vector_store %arg12[%c0_58, %c5_59, %c0_60], %151 {strides = array<i32>} : memref<2x8x32xf32, #tpu.memory_space<vmem>>, vector<2x1x32xf32>,
    %c6 = arith.constant 6 : index
    %c0_61 = arith.constant 0 : index
    %c0_62 = arith.constant 0 : index
    %152 = vector.load %arg2[%c6, %c0_61, %c0_62] : memref<8x32x128xf32, #tpu.memory_space<vmem>>, vector<1x32x128xf32>
    %153 = vector.shape_cast %152 : vector<1x32x128xf32> to vector<32x128xf32>
    %cst_63 = arith.constant dense<0.000000e+00> : vector<2x128xf32>
    %154 = tpu.matmul %148, %153, %cst_63 {dimension_numbers = #tpu.dot_dimension_numbers<[1], [0], [0], [1], [0, 0, 1, 1], [], []>} : vector<2x32xf32>, vector<32x128xf32>, vector<2x128xf32> -> vector<2x128xf32>
    %c0_64 = arith.constant 0 : index
    %c6_65 = arith.constant 6 : index
    %c0_66 = arith.constant 0 : index
    %155 = vector.load %arg1[%c0_64, %c6_65, %c0_66] : memref<2x8x128xf32, #tpu.memory_space<vmem>>, vector<2x1x128xf32>
    %156 = vector.shape_cast %155 : vector<2x1x128xf32> to vector<2x128xf32>
    %157 = arith.addf %154, %156 : vector<2x128xf32>
    %158 = vector.extract_strided_slice %157 {offsets = [0, 0], sizes = [2, 96], strides = [1, 1]} : vector<2x128xf32> to vector<2x96xf32>
    %159 = arith.negf %158 : vector<2x96xf32>
    %160 = math.exp %159 : vector<2x96xf32>
    %cst_67 = arith.constant 1.000000e+00 : f32
    %161 = vector.broadcast %cst_67 : f32 to vector<2x96xf32>
    %162 = arith.addf %161, %160 : vector<2x96xf32>
    %163 = arith.divf %161, %162 : vector<2x96xf32>
    %164 = vector.extract_strided_slice %157 {offsets = [0, 96], sizes = [2, 32], strides = [1, 1]} : vector<2x128xf32> to vector<2x32xf32>
    %165 = math.tanh %164 : vector<2x32xf32>
    %166 = vector.extract_strided_slice %163 {offsets = [0, 0], sizes = [2, 32], strides = [1, 1]} : vector<2x96xf32> to vector<2x32xf32>
    %167 = vector.extract_strided_slice %163 {offsets = [0, 32], sizes = [2, 32], strides = [1, 1]} : vector<2x96xf32> to vector<2x32xf32>
    %168 = vector.extract_strided_slice %163 {offsets = [0, 64], sizes = [2, 32], strides = [1, 1]} : vector<2x96xf32> to vector<2x32xf32>
    %169 = arith.mulf %167, %146 : vector<2x32xf32>
    %170 = arith.mulf %166, %165 : vector<2x32xf32>
    %171 = arith.addf %169, %170 : vector<2x32xf32>
    %172 = math.tanh %171 : vector<2x32xf32>
    %173 = arith.mulf %168, %172 : vector<2x32xf32>
    %c0_68 = arith.constant 0 : index
    %c6_69 = arith.constant 6 : index
    %c0_70 = arith.constant 0 : index
    %174 = vector.load %arg12[%c0_68, %c6_69, %c0_70] : memref<2x8x32xf32, #tpu.memory_space<vmem>>, vector<2x1x32xf32>
    %175 = vector.shape_cast %174 : vector<2x1x32xf32> to vector<2x32xf32>
    %176 = vector.shape_cast %173 : vector<2x32xf32> to vector<2x1x32xf32>
    tpu.vector_store %arg12[%c0_68, %c6_69, %c0_70], %176 {strides = array<i32>} : memref<2x8x32xf32, #tpu.memory_space<vmem>>, vector<2x1x32xf32>,
    %c7 = arith.constant 7 : index
    %c0_71 = arith.constant 0 : index
    %c0_72 = arith.constant 0 : index
    %177 = vector.load %arg2[%c7, %c0_71, %c0_72] : memref<8x32x128xf32, #tpu.memory_space<vmem>>, vector<1x32x128xf32>
    %178 = vector.shape_cast %177 : vector<1x32x128xf32> to vector<32x128xf32>
    %cst_73 = arith.constant dense<0.000000e+00> : vector<2x128xf32>
    %179 = tpu.matmul %173, %178, %cst_73 {dimension_numbers = #tpu.dot_dimension_numbers<[1], [0], [0], [1], [0, 0, 1, 1], [], []>} : vector<2x32xf32>, vector<32x128xf32>, vector<2x128xf32> -> vector<2x128xf32>
    %c0_74 = arith.constant 0 : index
    %c7_75 = arith.constant 7 : index
    %c0_76 = arith.constant 0 : index
    %180 = vector.load %arg1[%c0_74, %c7_75, %c0_76] : memref<2x8x128xf32, #tpu.memory_space<vmem>>, vector<2x1x128xf32>
    %181 = vector.shape_cast %180 : vector<2x1x128xf32> to vector<2x128xf32>
    %182 = arith.addf %179, %181 : vector<2x128xf32>
    %183 = vector.extract_strided_slice %182 {offsets = [0, 0], sizes = [2, 96], strides = [1, 1]} : vector<2x128xf32> to vector<2x96xf32>
    %184 = arith.negf %183 : vector<2x96xf32>
    %185 = math.exp %184 : vector<2x96xf32>
    %cst_77 = arith.constant 1.000000e+00 : f32
    %186 = vector.broadcast %cst_77 : f32 to vector<2x96xf32>
    %187 = arith.addf %186, %185 : vector<2x96xf32>
    %188 = arith.divf %186, %187 : vector<2x96xf32>
    %189 = vector.extract_strided_slice %182 {offsets = [0, 96], sizes = [2, 32], strides = [1, 1]} : vector<2x128xf32> to vector<2x32xf32>
    %190 = math.tanh %189 : vector<2x32xf32>
    %191 = vector.extract_strided_slice %188 {offsets = [0, 0], sizes = [2, 32], strides = [1, 1]} : vector<2x96xf32> to vector<2x32xf32>
    %192 = vector.extract_strided_slice %188 {offsets = [0, 32], sizes = [2, 32], strides = [1, 1]} : vector<2x96xf32> to vector<2x32xf32>
    %193 = vector.extract_strided_slice %188 {offsets = [0, 64], sizes = [2, 32], strides = [1, 1]} : vector<2x96xf32> to vector<2x32xf32>
    %194 = arith.mulf %192, %171 : vector<2x32xf32>
    %195 = arith.mulf %191, %190 : vector<2x32xf32>
    %196 = arith.addf %194, %195 : vector<2x32xf32>
    %197 = math.tanh %196 : vector<2x32xf32>
    %198 = arith.mulf %193, %197 : vector<2x32xf32>
    %c0_78 = arith.constant 0 : index
    %c7_79 = arith.constant 7 : index
    %c0_80 = arith.constant 0 : index
    %199 = vector.load %arg12[%c0_78, %c7_79, %c0_80] : memref<2x8x32xf32, #tpu.memory_space<vmem>>, vector<2x1x32xf32>
    %200 = vector.shape_cast %199 : vector<2x1x32xf32> to vector<2x32xf32>
    %201 = vector.shape_cast %198 : vector<2x32xf32> to vector<2x1x32xf32>
    tpu.vector_store %arg12[%c0_78, %c7_79, %c0_80], %201 {strides = array<i32>} : memref<2x8x32xf32, #tpu.memory_space<vmem>>, vector<2x1x32xf32>,
    %c0_81 = arith.constant 0 : index
    %c0_82 = arith.constant 0 : index
    %c0_83 = arith.constant 0 : index
    %202 = vector.load %arg12[%c0_81, %c0_82, %c0_83] : memref<2x8x32xf32, #tpu.memory_space<vmem>>, vector<2x8x32xf32>
    %203 = vector.shape_cast %202 : vector<2x8x32xf32> to vector<16x32xf32>
    %c0_84 = arith.constant 0 : index
    %c0_85 = arith.constant 0 : index
    %204 = vector.load %arg5[%c0_84, %c0_85] : memref<32x32xf32, #tpu.memory_space<vmem>>, vector<32x32xf32>
    %cst_86 = arith.constant dense<0.000000e+00> : vector<16x32xf32>
    %205 = tpu.matmul %203, %204, %cst_86 {dimension_numbers = #tpu.dot_dimension_numbers<[1], [0], [0], [1], [0, 0, 1, 1], [], []>} : vector<16x32xf32>, vector<32x32xf32>, vector<16x32xf32> -> vector<16x32xf32>
    %c0_87 = arith.constant 0 : index
    %c0_88 = arith.constant 0 : index
    %206 = vector.load %arg6[%c0_87, %c0_88] : memref<1x32xf32, #tpu.memory_space<vmem>>, vector<1x32xf32>
    %207 = vector.broadcast %206 : vector<1x32xf32> to vector<16x32xf32>
    %208 = arith.addf %205, %207 : vector<16x32xf32>
    %209 = vector.shape_cast %208 : vector<16x32xf32> to vector<2x8x32xf32>
    %c0_89 = arith.constant 0 : index
    %c0_90 = arith.constant 0 : index
    %210 = vector.load %arg7[%c0_89, %c0_90] : memref<32x32xf32, #tpu.memory_space<vmem>>, vector<32x32xf32>
    %c0_91 = arith.constant 0 : index
    %c0_92 = arith.constant 0 : index
    %211 = vector.load %arg8[%c0_91, %c0_92] : memref<1x32xf32, #tpu.memory_space<vmem>>, vector<1x32xf32>
    %c0_93 = arith.constant 0 : index
    %c0_94 = arith.constant 0 : index
    %212 = vector.load %arg9[%c0_93, %c0_94] : memref<1x32xf32, #tpu.memory_space<vmem>>, vector<1x32xf32>
    %213 = vector.shape_cast %212 : vector<1x32xf32> to vector<1x1x32xf32>
    %c0_95 = arith.constant 0 : index
    %c0_96 = arith.constant 0 : index
    %214 = vector.load %arg10[%c0_95, %c0_96] : memref<1x1xf32, #tpu.memory_space<vmem>>, vector<1x1xf32>
    %c0_97 = arith.constant 0 : index
    %c0_98 = arith.constant 0 : index
    %c0_99 = arith.constant 0 : index
    %215 = vector.load %arg3[%c0_97, %c0_98, %c0_99] : memref<8x32x128xf32, #tpu.memory_space<vmem>>, vector<1x32x128xf32>
    %216 = vector.shape_cast %215 : vector<1x32x128xf32> to vector<32x128xf32>
    %cst_100 = arith.constant dense<0.000000e+00> : vector<2x128xf32>
    %217 = tpu.matmul %198, %216, %cst_100 {dimension_numbers = #tpu.dot_dimension_numbers<[1], [0], [0], [1], [0, 0, 1, 1], [], []>} : vector<2x32xf32>, vector<32x128xf32>, vector<2x128xf32> -> vector<2x128xf32>
    %c0_101 = arith.constant 0 : index
    %c0_102 = arith.constant 0 : index
    %c0_103 = arith.constant 0 : index
    %218 = vector.load %arg4[%c0_101, %c0_102, %c0_103] : memref<8x1x128xf32, #tpu.memory_space<vmem>>, vector<1x1x128xf32>
    %219 = vector.shape_cast %218 : vector<1x1x128xf32> to vector<1x128xf32>
    %220 = vector.broadcast %219 : vector<1x128xf32> to vector<2x128xf32>
    %221 = arith.addf %217, %220 : vector<2x128xf32>
    %222 = vector.extract_strided_slice %221 {offsets = [0, 0], sizes = [2, 96], strides = [1, 1]} : vector<2x128xf32> to vector<2x96xf32>
    %223 = arith.negf %222 : vector<2x96xf32>
    %224 = math.exp %223 : vector<2x96xf32>
    %cst_104 = arith.constant 1.000000e+00 : f32
    %225 = vector.broadcast %cst_104 : f32 to vector<2x96xf32>
    %226 = arith.addf %225, %224 : vector<2x96xf32>
    %227 = arith.divf %225, %226 : vector<2x96xf32>
    %228 = vector.extract_strided_slice %221 {offsets = [0, 96], sizes = [2, 32], strides = [1, 1]} : vector<2x128xf32> to vector<2x32xf32>
    %229 = math.tanh %228 : vector<2x32xf32>
    %230 = vector.extract_strided_slice %227 {offsets = [0, 0], sizes = [2, 32], strides = [1, 1]} : vector<2x96xf32> to vector<2x32xf32>
    %231 = vector.extract_strided_slice %227 {offsets = [0, 32], sizes = [2, 32], strides = [1, 1]} : vector<2x96xf32> to vector<2x32xf32>
    %232 = vector.extract_strided_slice %227 {offsets = [0, 64], sizes = [2, 32], strides = [1, 1]} : vector<2x96xf32> to vector<2x32xf32>
    %233 = arith.mulf %231, %196 : vector<2x32xf32>
    %234 = arith.mulf %230, %229 : vector<2x32xf32>
    %235 = arith.addf %233, %234 : vector<2x32xf32>
    %236 = math.tanh %235 : vector<2x32xf32>
    %237 = arith.mulf %232, %236 : vector<2x32xf32>
    %cst_105 = arith.constant dense<0.000000e+00> : vector<2x32xf32>
    %238 = tpu.matmul %237, %210, %cst_105 {dimension_numbers = #tpu.dot_dimension_numbers<[1], [0], [0], [1], [0, 0, 1, 1], [], []>} : vector<2x32xf32>, vector<32x32xf32>, vector<2x32xf32> -> vector<2x32xf32>
    %239 = vector.broadcast %211 : vector<1x32xf32> to vector<2x32xf32>
    %240 = arith.addf %238, %239 : vector<2x32xf32>
    %241 = vector.shape_cast %240 : vector<2x32xf32> to vector<2x1x32xf32>
    %242 = vector.broadcast %241 : vector<2x1x32xf32> to vector<2x8x32xf32>
    %243 = arith.addf %209, %242 : vector<2x8x32xf32>
    %244 = math.tanh %243 : vector<2x8x32xf32>
    %245 = vector.broadcast %213 : vector<1x1x32xf32> to vector<2x8x32xf32>
    %246 = arith.mulf %244, %245 : vector<2x8x32xf32>
    %cst_106 = arith.constant dense<0.000000e+00> : vector<2x8xf32>
    %247 = vector.multi_reduction <add>, %246, %cst_106 [2] : vector<2x8x32xf32> to vector<2x8xf32>
    %248 = vector.broadcast %214 : vector<1x1xf32> to vector<2x8xf32>
    %249 = arith.addf %247, %248 : vector<2x8xf32>
    %cst_107 = arith.constant dense<0xFF800000> : vector<2xf32>
    %250 = vector.multi_reduction <maximumf>, %249, %cst_107 [1] : vector<2x8xf32> to vector<2xf32>
    %251 = vector.shape_cast %250 : vector<2xf32> to vector<2x1xf32>
    %252 = vector.broadcast %251 : vector<2x1xf32> to vector<2x8xf32>
    %253 = arith.subf %249, %252 : vector<2x8xf32>
    %254 = math.exp %253 : vector<2x8xf32>
    %cst_108 = arith.constant dense<0.000000e+00> : vector<2xf32>
    %255 = vector.multi_reduction <add>, %254, %cst_108 [1] : vector<2x8xf32> to vector<2xf32>
    %256 = vector.shape_cast %255 : vector<2xf32> to vector<2x1xf32>
    %257 = vector.broadcast %256 : vector<2x1xf32> to vector<2x8xf32>
    %258 = arith.divf %254, %257 : vector<2x8xf32>
    %c0_109 = arith.constant 0 : index
    %c0_110 = arith.constant 0 : index
    %c0_111 = arith.constant 0 : index
    %259 = vector.load %arg11[%c0_109, %c0_110, %c0_111] : memref<2x8x8xf32, #tpu.memory_space<vmem>>, vector<2x1x8xf32>
    %260 = vector.shape_cast %259 : vector<2x1x8xf32> to vector<2x8xf32>
    %261 = vector.shape_cast %258 : vector<2x8xf32> to vector<2x1x8xf32>
    tpu.vector_store %arg11[%c0_109, %c0_110, %c0_111], %261 {strides = array<i32>} : memref<2x8x8xf32, #tpu.memory_space<vmem>>, vector<2x1x8xf32>,
    %262 = vector.shape_cast %258 : vector<2x8xf32> to vector<2x1x8xf32>
    "tpu.trace_start"() <{level = 10 : i32, message = "bqs,bsh->bqh"}> : () -> ()
    %cst_112 = arith.constant dense<0.000000e+00> : vector<2x1x32xf32>
    %263 = tpu.matmul %262, %202, %cst_112 {dimension_numbers = #tpu.dot_dimension_numbers<[2], [1], [1], [2], [0, 0, 0, 1, 1, 2], [0], [0]>} : vector<2x1x8xf32>, vector<2x8x32xf32>, vector<2x1x32xf32> -> vector<2x1x32xf32>
    "tpu.trace_stop"() : () -> ()
    %264 = vector.shape_cast %263 : vector<2x1x32xf32> to vector<2x32xf32>
    %c1_113 = arith.constant 1 : index
    %c0_114 = arith.constant 0 : index
    %c0_115 = arith.constant 0 : index
    %265 = vector.load %arg3[%c1_113, %c0_114, %c0_115] : memref<8x32x128xf32, #tpu.memory_space<vmem>>, vector<1x32x128xf32>
    %266 = vector.shape_cast %265 : vector<1x32x128xf32> to vector<32x128xf32>
    %cst_116 = arith.constant dense<0.000000e+00> : vector<2x128xf32>
    %267 = tpu.matmul %264, %266, %cst_116 {dimension_numbers = #tpu.dot_dimension_numbers<[1], [0], [0], [1], [0, 0, 1, 1], [], []>} : vector<2x32xf32>, vector<32x128xf32>, vector<2x128xf32> -> vector<2x128xf32>
    %c1_117 = arith.constant 1 : index
    %c0_118 = arith.constant 0 : index
    %c0_119 = arith.constant 0 : index
    %268 = vector.load %arg4[%c1_117, %c0_118, %c0_119] : memref<8x1x128xf32, #tpu.memory_space<vmem>>, vector<1x1x128xf32>
    %269 = vector.shape_cast %268 : vector<1x1x128xf32> to vector<1x128xf32>
    %270 = vector.broadcast %269 : vector<1x128xf32> to vector<2x128xf32>
    %271 = arith.addf %267, %270 : vector<2x128xf32>
    %272 = vector.extract_strided_slice %271 {offsets = [0, 0], sizes = [2, 96], strides = [1, 1]} : vector<2x128xf32> to vector<2x96xf32>
    %273 = arith.negf %272 : vector<2x96xf32>
    %274 = math.exp %273 : vector<2x96xf32>
    %cst_120 = arith.constant 1.000000e+00 : f32
    %275 = vector.broadcast %cst_120 : f32 to vector<2x96xf32>
    %276 = arith.addf %275, %274 : vector<2x96xf32>
    %277 = arith.divf %275, %276 : vector<2x96xf32>
    %278 = vector.extract_strided_slice %271 {offsets = [0, 96], sizes = [2, 32], strides = [1, 1]} : vector<2x128xf32> to vector<2x32xf32>
    %279 = math.tanh %278 : vector<2x32xf32>
    %280 = vector.extract_strided_slice %277 {offsets = [0, 0], sizes = [2, 32], strides = [1, 1]} : vector<2x96xf32> to vector<2x32xf32>
    %281 = vector.extract_strided_slice %277 {offsets = [0, 32], sizes = [2, 32], strides = [1, 1]} : vector<2x96xf32> to vector<2x32xf32>
    %282 = vector.extract_strided_slice %277 {offsets = [0, 64], sizes = [2, 32], strides = [1, 1]} : vector<2x96xf32> to vector<2x32xf32>
    %283 = arith.mulf %281, %235 : vector<2x32xf32>
    %284 = arith.mulf %280, %279 : vector<2x32xf32>
    %285 = arith.addf %283, %284 : vector<2x32xf32>
    %286 = math.tanh %285 : vector<2x32xf32>
    %287 = arith.mulf %282, %286 : vector<2x32xf32>
    %cst_121 = arith.constant dense<0.000000e+00> : vector<2x32xf32>
    %288 = tpu.matmul %287, %210, %cst_121 {dimension_numbers = #tpu.dot_dimension_numbers<[1], [0], [0], [1], [0, 0, 1, 1], [], []>} : vector<2x32xf32>, vector<32x32xf32>, vector<2x32xf32> -> vector<2x32xf32>
    %289 = vector.broadcast %211 : vector<1x32xf32> to vector<2x32xf32>
    %290 = arith.addf %288, %289 : vector<2x32xf32>
    %291 = vector.shape_cast %290 : vector<2x32xf32> to vector<2x1x32xf32>
    %292 = vector.broadcast %291 : vector<2x1x32xf32> to vector<2x8x32xf32>
    %293 = arith.addf %209, %292 : vector<2x8x32xf32>
    %294 = math.tanh %293 : vector<2x8x32xf32>
    %295 = vector.broadcast %213 : vector<1x1x32xf32> to vector<2x8x32xf32>
    %296 = arith.mulf %294, %295 : vector<2x8x32xf32>
    %cst_122 = arith.constant dense<0.000000e+00> : vector<2x8xf32>
    %297 = vector.multi_reduction <add>, %296, %cst_122 [2] : vector<2x8x32xf32> to vector<2x8xf32>
    %298 = vector.broadcast %214 : vector<1x1xf32> to vector<2x8xf32>
    %299 = arith.addf %297, %298 : vector<2x8xf32>
    %cst_123 = arith.constant dense<0xFF800000> : vector<2xf32>
    %300 = vector.multi_reduction <maximumf>, %299, %cst_123 [1] : vector<2x8xf32> to vector<2xf32>
    %301 = vector.shape_cast %300 : vector<2xf32> to vector<2x1xf32>
    %302 = vector.broadcast %301 : vector<2x1xf32> to vector<2x8xf32>
    %303 = arith.subf %299, %302 : vector<2x8xf32>
    %304 = math.exp %303 : vector<2x8xf32>
    %cst_124 = arith.constant dense<0.000000e+00> : vector<2xf32>
    %305 = vector.multi_reduction <add>, %304, %cst_124 [1] : vector<2x8xf32> to vector<2xf32>
    %306 = vector.shape_cast %305 : vector<2xf32> to vector<2x1xf32>
    %307 = vector.broadcast %306 : vector<2x1xf32> to vector<2x8xf32>
    %308 = arith.divf %304, %307 : vector<2x8xf32>
    %c0_125 = arith.constant 0 : index
    %c1_126 = arith.constant 1 : index
    %c0_127 = arith.constant 0 : index
    %309 = vector.load %arg11[%c0_125, %c1_126, %c0_127] : memref<2x8x8xf32, #tpu.memory_space<vmem>>, vector<2x1x8xf32>
    %310 = vector.shape_cast %309 : vector<2x1x8xf32> to vector<2x8xf32>
    %311 = vector.shape_cast %308 : vector<2x8xf32> to vector<2x1x8xf32>
    tpu.vector_store %arg11[%c0_125, %c1_126, %c0_127], %311 {strides = array<i32>} : memref<2x8x8xf32, #tpu.memory_space<vmem>>, vector<2x1x8xf32>,
    %312 = vector.shape_cast %308 : vector<2x8xf32> to vector<2x1x8xf32>
    "tpu.trace_start"() <{level = 10 : i32, message = "bqs,bsh->bqh"}> : () -> ()
    %cst_128 = arith.constant dense<0.000000e+00> : vector<2x1x32xf32>
    %313 = tpu.matmul %312, %202, %cst_128 {dimension_numbers = #tpu.dot_dimension_numbers<[2], [1], [1], [2], [0, 0, 0, 1, 1, 2], [0], [0]>} : vector<2x1x8xf32>, vector<2x8x32xf32>, vector<2x1x32xf32> -> vector<2x1x32xf32>
    "tpu.trace_stop"() : () -> ()
    %314 = vector.shape_cast %313 : vector<2x1x32xf32> to vector<2x32xf32>
    %c2_129 = arith.constant 2 : index
    %c0_130 = arith.constant 0 : index
    %c0_131 = arith.constant 0 : index
    %315 = vector.load %arg3[%c2_129, %c0_130, %c0_131] : memref<8x32x128xf32, #tpu.memory_space<vmem>>, vector<1x32x128xf32>
    %316 = vector.shape_cast %315 : vector<1x32x128xf32> to vector<32x128xf32>
    %cst_132 = arith.constant dense<0.000000e+00> : vector<2x128xf32>
    %317 = tpu.matmul %314, %316, %cst_132 {dimension_numbers = #tpu.dot_dimension_numbers<[1], [0], [0], [1], [0, 0, 1, 1], [], []>} : vector<2x32xf32>, vector<32x128xf32>, vector<2x128xf32> -> vector<2x128xf32>
    %c2_133 = arith.constant 2 : index
    %c0_134 = arith.constant 0 : index
    %c0_135 = arith.constant 0 : index
    %318 = vector.load %arg4[%c2_133, %c0_134, %c0_135] : memref<8x1x128xf32, #tpu.memory_space<vmem>>, vector<1x1x128xf32>
    %319 = vector.shape_cast %318 : vector<1x1x128xf32> to vector<1x128xf32>
    %320 = vector.broadcast %319 : vector<1x128xf32> to vector<2x128xf32>
    %321 = arith.addf %317, %320 : vector<2x128xf32>
    %322 = vector.extract_strided_slice %321 {offsets = [0, 0], sizes = [2, 96], strides = [1, 1]} : vector<2x128xf32> to vector<2x96xf32>
    %323 = arith.negf %322 : vector<2x96xf32>
    %324 = math.exp %323 : vector<2x96xf32>
    %cst_136 = arith.constant 1.000000e+00 : f32
    %325 = vector.broadcast %cst_136 : f32 to vector<2x96xf32>
    %326 = arith.addf %325, %324 : vector<2x96xf32>
    %327 = arith.divf %325, %326 : vector<2x96xf32>
    %328 = vector.extract_strided_slice %321 {offsets = [0, 96], sizes = [2, 32], strides = [1, 1]} : vector<2x128xf32> to vector<2x32xf32>
    %329 = math.tanh %328 : vector<2x32xf32>
    %330 = vector.extract_strided_slice %327 {offsets = [0, 0], sizes = [2, 32], strides = [1, 1]} : vector<2x96xf32> to vector<2x32xf32>
    %331 = vector.extract_strided_slice %327 {offsets = [0, 32], sizes = [2, 32], strides = [1, 1]} : vector<2x96xf32> to vector<2x32xf32>
    %332 = vector.extract_strided_slice %327 {offsets = [0, 64], sizes = [2, 32], strides = [1, 1]} : vector<2x96xf32> to vector<2x32xf32>
    %333 = arith.mulf %331, %285 : vector<2x32xf32>
    %334 = arith.mulf %330, %329 : vector<2x32xf32>
    %335 = arith.addf %333, %334 : vector<2x32xf32>
    %336 = math.tanh %335 : vector<2x32xf32>
    %337 = arith.mulf %332, %336 : vector<2x32xf32>
    %cst_137 = arith.constant dense<0.000000e+00> : vector<2x32xf32>
    %338 = tpu.matmul %337, %210, %cst_137 {dimension_numbers = #tpu.dot_dimension_numbers<[1], [0], [0], [1], [0, 0, 1, 1], [], []>} : vector<2x32xf32>, vector<32x32xf32>, vector<2x32xf32> -> vector<2x32xf32>
    %339 = vector.broadcast %211 : vector<1x32xf32> to vector<2x32xf32>
    %340 = arith.addf %338, %339 : vector<2x32xf32>
    %341 = vector.shape_cast %340 : vector<2x32xf32> to vector<2x1x32xf32>
    %342 = vector.broadcast %341 : vector<2x1x32xf32> to vector<2x8x32xf32>
    %343 = arith.addf %209, %342 : vector<2x8x32xf32>
    %344 = math.tanh %343 : vector<2x8x32xf32>
    %345 = vector.broadcast %213 : vector<1x1x32xf32> to vector<2x8x32xf32>
    %346 = arith.mulf %344, %345 : vector<2x8x32xf32>
    %cst_138 = arith.constant dense<0.000000e+00> : vector<2x8xf32>
    %347 = vector.multi_reduction <add>, %346, %cst_138 [2] : vector<2x8x32xf32> to vector<2x8xf32>
    %348 = vector.broadcast %214 : vector<1x1xf32> to vector<2x8xf32>
    %349 = arith.addf %347, %348 : vector<2x8xf32>
    %cst_139 = arith.constant dense<0xFF800000> : vector<2xf32>
    %350 = vector.multi_reduction <maximumf>, %349, %cst_139 [1] : vector<2x8xf32> to vector<2xf32>
    %351 = vector.shape_cast %350 : vector<2xf32> to vector<2x1xf32>
    %352 = vector.broadcast %351 : vector<2x1xf32> to vector<2x8xf32>
    %353 = arith.subf %349, %352 : vector<2x8xf32>
    %354 = math.exp %353 : vector<2x8xf32>
    %cst_140 = arith.constant dense<0.000000e+00> : vector<2xf32>
    %355 = vector.multi_reduction <add>, %354, %cst_140 [1] : vector<2x8xf32> to vector<2xf32>
    %356 = vector.shape_cast %355 : vector<2xf32> to vector<2x1xf32>
    %357 = vector.broadcast %356 : vector<2x1xf32> to vector<2x8xf32>
    %358 = arith.divf %354, %357 : vector<2x8xf32>
    %c0_141 = arith.constant 0 : index
    %c2_142 = arith.constant 2 : index
    %c0_143 = arith.constant 0 : index
    %359 = vector.load %arg11[%c0_141, %c2_142, %c0_143] : memref<2x8x8xf32, #tpu.memory_space<vmem>>, vector<2x1x8xf32>
    %360 = vector.shape_cast %359 : vector<2x1x8xf32> to vector<2x8xf32>
    %361 = vector.shape_cast %358 : vector<2x8xf32> to vector<2x1x8xf32>
    tpu.vector_store %arg11[%c0_141, %c2_142, %c0_143], %361 {strides = array<i32>} : memref<2x8x8xf32, #tpu.memory_space<vmem>>, vector<2x1x8xf32>,
    %362 = vector.shape_cast %358 : vector<2x8xf32> to vector<2x1x8xf32>
    "tpu.trace_start"() <{level = 10 : i32, message = "bqs,bsh->bqh"}> : () -> ()
    %cst_144 = arith.constant dense<0.000000e+00> : vector<2x1x32xf32>
    %363 = tpu.matmul %362, %202, %cst_144 {dimension_numbers = #tpu.dot_dimension_numbers<[2], [1], [1], [2], [0, 0, 0, 1, 1, 2], [0], [0]>} : vector<2x1x8xf32>, vector<2x8x32xf32>, vector<2x1x32xf32> -> vector<2x1x32xf32>
    "tpu.trace_stop"() : () -> ()
    %364 = vector.shape_cast %363 : vector<2x1x32xf32> to vector<2x32xf32>
    %c3_145 = arith.constant 3 : index
    %c0_146 = arith.constant 0 : index
    %c0_147 = arith.constant 0 : index
    %365 = vector.load %arg3[%c3_145, %c0_146, %c0_147] : memref<8x32x128xf32, #tpu.memory_space<vmem>>, vector<1x32x128xf32>
    %366 = vector.shape_cast %365 : vector<1x32x128xf32> to vector<32x128xf32>
    %cst_148 = arith.constant dense<0.000000e+00> : vector<2x128xf32>
    %367 = tpu.matmul %364, %366, %cst_148 {dimension_numbers = #tpu.dot_dimension_numbers<[1], [0], [0], [1], [0, 0, 1, 1], [], []>} : vector<2x32xf32>, vector<32x128xf32>, vector<2x128xf32> -> vector<2x128xf32>
    %c3_149 = arith.constant 3 : index
    %c0_150 = arith.constant 0 : index
    %c0_151 = arith.constant 0 : index
    %368 = vector.load %arg4[%c3_149, %c0_150, %c0_151] : memref<8x1x128xf32, #tpu.memory_space<vmem>>, vector<1x1x128xf32>
    %369 = vector.shape_cast %368 : vector<1x1x128xf32> to vector<1x128xf32>
    %370 = vector.broadcast %369 : vector<1x128xf32> to vector<2x128xf32>
    %371 = arith.addf %367, %370 : vector<2x128xf32>
    %372 = vector.extract_strided_slice %371 {offsets = [0, 0], sizes = [2, 96], strides = [1, 1]} : vector<2x128xf32> to vector<2x96xf32>
    %373 = arith.negf %372 : vector<2x96xf32>
    %374 = math.exp %373 : vector<2x96xf32>
    %cst_152 = arith.constant 1.000000e+00 : f32
    %375 = vector.broadcast %cst_152 : f32 to vector<2x96xf32>
    %376 = arith.addf %375, %374 : vector<2x96xf32>
    %377 = arith.divf %375, %376 : vector<2x96xf32>
    %378 = vector.extract_strided_slice %371 {offsets = [0, 96], sizes = [2, 32], strides = [1, 1]} : vector<2x128xf32> to vector<2x32xf32>
    %379 = math.tanh %378 : vector<2x32xf32>
    %380 = vector.extract_strided_slice %377 {offsets = [0, 0], sizes = [2, 32], strides = [1, 1]} : vector<2x96xf32> to vector<2x32xf32>
    %381 = vector.extract_strided_slice %377 {offsets = [0, 32], sizes = [2, 32], strides = [1, 1]} : vector<2x96xf32> to vector<2x32xf32>
    %382 = vector.extract_strided_slice %377 {offsets = [0, 64], sizes = [2, 32], strides = [1, 1]} : vector<2x96xf32> to vector<2x32xf32>
    %383 = arith.mulf %381, %335 : vector<2x32xf32>
    %384 = arith.mulf %380, %379 : vector<2x32xf32>
    %385 = arith.addf %383, %384 : vector<2x32xf32>
    %386 = math.tanh %385 : vector<2x32xf32>
    %387 = arith.mulf %382, %386 : vector<2x32xf32>
    %cst_153 = arith.constant dense<0.000000e+00> : vector<2x32xf32>
    %388 = tpu.matmul %387, %210, %cst_153 {dimension_numbers = #tpu.dot_dimension_numbers<[1], [0], [0], [1], [0, 0, 1, 1], [], []>} : vector<2x32xf32>, vector<32x32xf32>, vector<2x32xf32> -> vector<2x32xf32>
    %389 = vector.broadcast %211 : vector<1x32xf32> to vector<2x32xf32>
    %390 = arith.addf %388, %389 : vector<2x32xf32>
    %391 = vector.shape_cast %390 : vector<2x32xf32> to vector<2x1x32xf32>
    %392 = vector.broadcast %391 : vector<2x1x32xf32> to vector<2x8x32xf32>
    %393 = arith.addf %209, %392 : vector<2x8x32xf32>
    %394 = math.tanh %393 : vector<2x8x32xf32>
    %395 = vector.broadcast %213 : vector<1x1x32xf32> to vector<2x8x32xf32>
    %396 = arith.mulf %394, %395 : vector<2x8x32xf32>
    %cst_154 = arith.constant dense<0.000000e+00> : vector<2x8xf32>
    %397 = vector.multi_reduction <add>, %396, %cst_154 [2] : vector<2x8x32xf32> to vector<2x8xf32>
    %398 = vector.broadcast %214 : vector<1x1xf32> to vector<2x8xf32>
    %399 = arith.addf %397, %398 : vector<2x8xf32>
    %cst_155 = arith.constant dense<0xFF800000> : vector<2xf32>
    %400 = vector.multi_reduction <maximumf>, %399, %cst_155 [1] : vector<2x8xf32> to vector<2xf32>
    %401 = vector.shape_cast %400 : vector<2xf32> to vector<2x1xf32>
    %402 = vector.broadcast %401 : vector<2x1xf32> to vector<2x8xf32>
    %403 = arith.subf %399, %402 : vector<2x8xf32>
    %404 = math.exp %403 : vector<2x8xf32>
    %cst_156 = arith.constant dense<0.000000e+00> : vector<2xf32>
    %405 = vector.multi_reduction <add>, %404, %cst_156 [1] : vector<2x8xf32> to vector<2xf32>
    %406 = vector.shape_cast %405 : vector<2xf32> to vector<2x1xf32>
    %407 = vector.broadcast %406 : vector<2x1xf32> to vector<2x8xf32>
    %408 = arith.divf %404, %407 : vector<2x8xf32>
    %c0_157 = arith.constant 0 : index
    %c3_158 = arith.constant 3 : index
    %c0_159 = arith.constant 0 : index
    %409 = vector.load %arg11[%c0_157, %c3_158, %c0_159] : memref<2x8x8xf32, #tpu.memory_space<vmem>>, vector<2x1x8xf32>
    %410 = vector.shape_cast %409 : vector<2x1x8xf32> to vector<2x8xf32>
    %411 = vector.shape_cast %408 : vector<2x8xf32> to vector<2x1x8xf32>
    tpu.vector_store %arg11[%c0_157, %c3_158, %c0_159], %411 {strides = array<i32>} : memref<2x8x8xf32, #tpu.memory_space<vmem>>, vector<2x1x8xf32>,
    %412 = vector.shape_cast %408 : vector<2x8xf32> to vector<2x1x8xf32>
    "tpu.trace_start"() <{level = 10 : i32, message = "bqs,bsh->bqh"}> : () -> ()
    %cst_160 = arith.constant dense<0.000000e+00> : vector<2x1x32xf32>
    %413 = tpu.matmul %412, %202, %cst_160 {dimension_numbers = #tpu.dot_dimension_numbers<[2], [1], [1], [2], [0, 0, 0, 1, 1, 2], [0], [0]>} : vector<2x1x8xf32>, vector<2x8x32xf32>, vector<2x1x32xf32> -> vector<2x1x32xf32>
    "tpu.trace_stop"() : () -> ()
    %414 = vector.shape_cast %413 : vector<2x1x32xf32> to vector<2x32xf32>
    %c4_161 = arith.constant 4 : index
    %c0_162 = arith.constant 0 : index
    %c0_163 = arith.constant 0 : index
    %415 = vector.load %arg3[%c4_161, %c0_162, %c0_163] : memref<8x32x128xf32, #tpu.memory_space<vmem>>, vector<1x32x128xf32>
    %416 = vector.shape_cast %415 : vector<1x32x128xf32> to vector<32x128xf32>
    %cst_164 = arith.constant dense<0.000000e+00> : vector<2x128xf32>
    %417 = tpu.matmul %414, %416, %cst_164 {dimension_numbers = #tpu.dot_dimension_numbers<[1], [0], [0], [1], [0, 0, 1, 1], [], []>} : vector<2x32xf32>, vector<32x128xf32>, vector<2x128xf32> -> vector<2x128xf32>
    %c4_165 = arith.constant 4 : index
    %c0_166 = arith.constant 0 : index
    %c0_167 = arith.constant 0 : index
    %418 = vector.load %arg4[%c4_165, %c0_166, %c0_167] : memref<8x1x128xf32, #tpu.memory_space<vmem>>, vector<1x1x128xf32>
    %419 = vector.shape_cast %418 : vector<1x1x128xf32> to vector<1x128xf32>
    %420 = vector.broadcast %419 : vector<1x128xf32> to vector<2x128xf32>
    %421 = arith.addf %417, %420 : vector<2x128xf32>
    %422 = vector.extract_strided_slice %421 {offsets = [0, 0], sizes = [2, 96], strides = [1, 1]} : vector<2x128xf32> to vector<2x96xf32>
    %423 = arith.negf %422 : vector<2x96xf32>
    %424 = math.exp %423 : vector<2x96xf32>
    %cst_168 = arith.constant 1.000000e+00 : f32
    %425 = vector.broadcast %cst_168 : f32 to vector<2x96xf32>
    %426 = arith.addf %425, %424 : vector<2x96xf32>
    %427 = arith.divf %425, %426 : vector<2x96xf32>
    %428 = vector.extract_strided_slice %421 {offsets = [0, 96], sizes = [2, 32], strides = [1, 1]} : vector<2x128xf32> to vector<2x32xf32>
    %429 = math.tanh %428 : vector<2x32xf32>
    %430 = vector.extract_strided_slice %427 {offsets = [0, 0], sizes = [2, 32], strides = [1, 1]} : vector<2x96xf32> to vector<2x32xf32>
    %431 = vector.extract_strided_slice %427 {offsets = [0, 32], sizes = [2, 32], strides = [1, 1]} : vector<2x96xf32> to vector<2x32xf32>
    %432 = vector.extract_strided_slice %427 {offsets = [0, 64], sizes = [2, 32], strides = [1, 1]} : vector<2x96xf32> to vector<2x32xf32>
    %433 = arith.mulf %431, %385 : vector<2x32xf32>
    %434 = arith.mulf %430, %429 : vector<2x32xf32>
    %435 = arith.addf %433, %434 : vector<2x32xf32>
    %436 = math.tanh %435 : vector<2x32xf32>
    %437 = arith.mulf %432, %436 : vector<2x32xf32>
    %cst_169 = arith.constant dense<0.000000e+00> : vector<2x32xf32>
    %438 = tpu.matmul %437, %210, %cst_169 {dimension_numbers = #tpu.dot_dimension_numbers<[1], [0], [0], [1], [0, 0, 1, 1], [], []>} : vector<2x32xf32>, vector<32x32xf32>, vector<2x32xf32> -> vector<2x32xf32>
    %439 = vector.broadcast %211 : vector<1x32xf32> to vector<2x32xf32>
    %440 = arith.addf %438, %439 : vector<2x32xf32>
    %441 = vector.shape_cast %440 : vector<2x32xf32> to vector<2x1x32xf32>
    %442 = vector.broadcast %441 : vector<2x1x32xf32> to vector<2x8x32xf32>
    %443 = arith.addf %209, %442 : vector<2x8x32xf32>
    %444 = math.tanh %443 : vector<2x8x32xf32>
    %445 = vector.broadcast %213 : vector<1x1x32xf32> to vector<2x8x32xf32>
    %446 = arith.mulf %444, %445 : vector<2x8x32xf32>
    %cst_170 = arith.constant dense<0.000000e+00> : vector<2x8xf32>
    %447 = vector.multi_reduction <add>, %446, %cst_170 [2] : vector<2x8x32xf32> to vector<2x8xf32>
    %448 = vector.broadcast %214 : vector<1x1xf32> to vector<2x8xf32>
    %449 = arith.addf %447, %448 : vector<2x8xf32>
    %cst_171 = arith.constant dense<0xFF800000> : vector<2xf32>
    %450 = vector.multi_reduction <maximumf>, %449, %cst_171 [1] : vector<2x8xf32> to vector<2xf32>
    %451 = vector.shape_cast %450 : vector<2xf32> to vector<2x1xf32>
    %452 = vector.broadcast %451 : vector<2x1xf32> to vector<2x8xf32>
    %453 = arith.subf %449, %452 : vector<2x8xf32>
    %454 = math.exp %453 : vector<2x8xf32>
    %cst_172 = arith.constant dense<0.000000e+00> : vector<2xf32>
    %455 = vector.multi_reduction <add>, %454, %cst_172 [1] : vector<2x8xf32> to vector<2xf32>
    %456 = vector.shape_cast %455 : vector<2xf32> to vector<2x1xf32>
    %457 = vector.broadcast %456 : vector<2x1xf32> to vector<2x8xf32>
    %458 = arith.divf %454, %457 : vector<2x8xf32>
    %c0_173 = arith.constant 0 : index
    %c4_174 = arith.constant 4 : index
    %c0_175 = arith.constant 0 : index
    %459 = vector.load %arg11[%c0_173, %c4_174, %c0_175] : memref<2x8x8xf32, #tpu.memory_space<vmem>>, vector<2x1x8xf32>
    %460 = vector.shape_cast %459 : vector<2x1x8xf32> to vector<2x8xf32>
    %461 = vector.shape_cast %458 : vector<2x8xf32> to vector<2x1x8xf32>
    tpu.vector_store %arg11[%c0_173, %c4_174, %c0_175], %461 {strides = array<i32>} : memref<2x8x8xf32, #tpu.memory_space<vmem>>, vector<2x1x8xf32>,
    %462 = vector.shape_cast %458 : vector<2x8xf32> to vector<2x1x8xf32>
    "tpu.trace_start"() <{level = 10 : i32, message = "bqs,bsh->bqh"}> : () -> ()
    %cst_176 = arith.constant dense<0.000000e+00> : vector<2x1x32xf32>
    %463 = tpu.matmul %462, %202, %cst_176 {dimension_numbers = #tpu.dot_dimension_numbers<[2], [1], [1], [2], [0, 0, 0, 1, 1, 2], [0], [0]>} : vector<2x1x8xf32>, vector<2x8x32xf32>, vector<2x1x32xf32> -> vector<2x1x32xf32>
    "tpu.trace_stop"() : () -> ()
    %464 = vector.shape_cast %463 : vector<2x1x32xf32> to vector<2x32xf32>
    %c5_177 = arith.constant 5 : index
    %c0_178 = arith.constant 0 : index
    %c0_179 = arith.constant 0 : index
    %465 = vector.load %arg3[%c5_177, %c0_178, %c0_179] : memref<8x32x128xf32, #tpu.memory_space<vmem>>, vector<1x32x128xf32>
    %466 = vector.shape_cast %465 : vector<1x32x128xf32> to vector<32x128xf32>
    %cst_180 = arith.constant dense<0.000000e+00> : vector<2x128xf32>
    %467 = tpu.matmul %464, %466, %cst_180 {dimension_numbers = #tpu.dot_dimension_numbers<[1], [0], [0], [1], [0, 0, 1, 1], [], []>} : vector<2x32xf32>, vector<32x128xf32>, vector<2x128xf32> -> vector<2x128xf32>
    %c5_181 = arith.constant 5 : index
    %c0_182 = arith.constant 0 : index
    %c0_183 = arith.constant 0 : index
    %468 = vector.load %arg4[%c5_181, %c0_182, %c0_183] : memref<8x1x128xf32, #tpu.memory_space<vmem>>, vector<1x1x128xf32>
    %469 = vector.shape_cast %468 : vector<1x1x128xf32> to vector<1x128xf32>
    %470 = vector.broadcast %469 : vector<1x128xf32> to vector<2x128xf32>
    %471 = arith.addf %467, %470 : vector<2x128xf32>
    %472 = vector.extract_strided_slice %471 {offsets = [0, 0], sizes = [2, 96], strides = [1, 1]} : vector<2x128xf32> to vector<2x96xf32>
    %473 = arith.negf %472 : vector<2x96xf32>
    %474 = math.exp %473 : vector<2x96xf32>
    %cst_184 = arith.constant 1.000000e+00 : f32
    %475 = vector.broadcast %cst_184 : f32 to vector<2x96xf32>
    %476 = arith.addf %475, %474 : vector<2x96xf32>
    %477 = arith.divf %475, %476 : vector<2x96xf32>
    %478 = vector.extract_strided_slice %471 {offsets = [0, 96], sizes = [2, 32], strides = [1, 1]} : vector<2x128xf32> to vector<2x32xf32>
    %479 = math.tanh %478 : vector<2x32xf32>
    %480 = vector.extract_strided_slice %477 {offsets = [0, 0], sizes = [2, 32], strides = [1, 1]} : vector<2x96xf32> to vector<2x32xf32>
    %481 = vector.extract_strided_slice %477 {offsets = [0, 32], sizes = [2, 32], strides = [1, 1]} : vector<2x96xf32> to vector<2x32xf32>
    %482 = vector.extract_strided_slice %477 {offsets = [0, 64], sizes = [2, 32], strides = [1, 1]} : vector<2x96xf32> to vector<2x32xf32>
    %483 = arith.mulf %481, %435 : vector<2x32xf32>
    %484 = arith.mulf %480, %479 : vector<2x32xf32>
    %485 = arith.addf %483, %484 : vector<2x32xf32>
    %486 = math.tanh %485 : vector<2x32xf32>
    %487 = arith.mulf %482, %486 : vector<2x32xf32>
    %cst_185 = arith.constant dense<0.000000e+00> : vector<2x32xf32>
    %488 = tpu.matmul %487, %210, %cst_185 {dimension_numbers = #tpu.dot_dimension_numbers<[1], [0], [0], [1], [0, 0, 1, 1], [], []>} : vector<2x32xf32>, vector<32x32xf32>, vector<2x32xf32> -> vector<2x32xf32>
    %489 = vector.broadcast %211 : vector<1x32xf32> to vector<2x32xf32>
    %490 = arith.addf %488, %489 : vector<2x32xf32>
    %491 = vector.shape_cast %490 : vector<2x32xf32> to vector<2x1x32xf32>
    %492 = vector.broadcast %491 : vector<2x1x32xf32> to vector<2x8x32xf32>
    %493 = arith.addf %209, %492 : vector<2x8x32xf32>
    %494 = math.tanh %493 : vector<2x8x32xf32>
    %495 = vector.broadcast %213 : vector<1x1x32xf32> to vector<2x8x32xf32>
    %496 = arith.mulf %494, %495 : vector<2x8x32xf32>
    %cst_186 = arith.constant dense<0.000000e+00> : vector<2x8xf32>
    %497 = vector.multi_reduction <add>, %496, %cst_186 [2] : vector<2x8x32xf32> to vector<2x8xf32>
    %498 = vector.broadcast %214 : vector<1x1xf32> to vector<2x8xf32>
    %499 = arith.addf %497, %498 : vector<2x8xf32>
    %cst_187 = arith.constant dense<0xFF800000> : vector<2xf32>
    %500 = vector.multi_reduction <maximumf>, %499, %cst_187 [1] : vector<2x8xf32> to vector<2xf32>
    %501 = vector.shape_cast %500 : vector<2xf32> to vector<2x1xf32>
    %502 = vector.broadcast %501 : vector<2x1xf32> to vector<2x8xf32>
    %503 = arith.subf %499, %502 : vector<2x8xf32>
    %504 = math.exp %503 : vector<2x8xf32>
    %cst_188 = arith.constant dense<0.000000e+00> : vector<2xf32>
    %505 = vector.multi_reduction <add>, %504, %cst_188 [1] : vector<2x8xf32> to vector<2xf32>
    %506 = vector.shape_cast %505 : vector<2xf32> to vector<2x1xf32>
    %507 = vector.broadcast %506 : vector<2x1xf32> to vector<2x8xf32>
    %508 = arith.divf %504, %507 : vector<2x8xf32>
    %c0_189 = arith.constant 0 : index
    %c5_190 = arith.constant 5 : index
    %c0_191 = arith.constant 0 : index
    %509 = vector.load %arg11[%c0_189, %c5_190, %c0_191] : memref<2x8x8xf32, #tpu.memory_space<vmem>>, vector<2x1x8xf32>
    %510 = vector.shape_cast %509 : vector<2x1x8xf32> to vector<2x8xf32>
    %511 = vector.shape_cast %508 : vector<2x8xf32> to vector<2x1x8xf32>
    tpu.vector_store %arg11[%c0_189, %c5_190, %c0_191], %511 {strides = array<i32>} : memref<2x8x8xf32, #tpu.memory_space<vmem>>, vector<2x1x8xf32>,
    %512 = vector.shape_cast %508 : vector<2x8xf32> to vector<2x1x8xf32>
    "tpu.trace_start"() <{level = 10 : i32, message = "bqs,bsh->bqh"}> : () -> ()
    %cst_192 = arith.constant dense<0.000000e+00> : vector<2x1x32xf32>
    %513 = tpu.matmul %512, %202, %cst_192 {dimension_numbers = #tpu.dot_dimension_numbers<[2], [1], [1], [2], [0, 0, 0, 1, 1, 2], [0], [0]>} : vector<2x1x8xf32>, vector<2x8x32xf32>, vector<2x1x32xf32> -> vector<2x1x32xf32>
    "tpu.trace_stop"() : () -> ()
    %514 = vector.shape_cast %513 : vector<2x1x32xf32> to vector<2x32xf32>
    %c6_193 = arith.constant 6 : index
    %c0_194 = arith.constant 0 : index
    %c0_195 = arith.constant 0 : index
    %515 = vector.load %arg3[%c6_193, %c0_194, %c0_195] : memref<8x32x128xf32, #tpu.memory_space<vmem>>, vector<1x32x128xf32>
    %516 = vector.shape_cast %515 : vector<1x32x128xf32> to vector<32x128xf32>
    %cst_196 = arith.constant dense<0.000000e+00> : vector<2x128xf32>
    %517 = tpu.matmul %514, %516, %cst_196 {dimension_numbers = #tpu.dot_dimension_numbers<[1], [0], [0], [1], [0, 0, 1, 1], [], []>} : vector<2x32xf32>, vector<32x128xf32>, vector<2x128xf32> -> vector<2x128xf32>
    %c6_197 = arith.constant 6 : index
    %c0_198 = arith.constant 0 : index
    %c0_199 = arith.constant 0 : index
    %518 = vector.load %arg4[%c6_197, %c0_198, %c0_199] : memref<8x1x128xf32, #tpu.memory_space<vmem>>, vector<1x1x128xf32>
    %519 = vector.shape_cast %518 : vector<1x1x128xf32> to vector<1x128xf32>
    %520 = vector.broadcast %519 : vector<1x128xf32> to vector<2x128xf32>
    %521 = arith.addf %517, %520 : vector<2x128xf32>
    %522 = vector.extract_strided_slice %521 {offsets = [0, 0], sizes = [2, 96], strides = [1, 1]} : vector<2x128xf32> to vector<2x96xf32>
    %523 = arith.negf %522 : vector<2x96xf32>
    %524 = math.exp %523 : vector<2x96xf32>
    %cst_200 = arith.constant 1.000000e+00 : f32
    %525 = vector.broadcast %cst_200 : f32 to vector<2x96xf32>
    %526 = arith.addf %525, %524 : vector<2x96xf32>
    %527 = arith.divf %525, %526 : vector<2x96xf32>
    %528 = vector.extract_strided_slice %521 {offsets = [0, 96], sizes = [2, 32], strides = [1, 1]} : vector<2x128xf32> to vector<2x32xf32>
    %529 = math.tanh %528 : vector<2x32xf32>
    %530 = vector.extract_strided_slice %527 {offsets = [0, 0], sizes = [2, 32], strides = [1, 1]} : vector<2x96xf32> to vector<2x32xf32>
    %531 = vector.extract_strided_slice %527 {offsets = [0, 32], sizes = [2, 32], strides = [1, 1]} : vector<2x96xf32> to vector<2x32xf32>
    %532 = vector.extract_strided_slice %527 {offsets = [0, 64], sizes = [2, 32], strides = [1, 1]} : vector<2x96xf32> to vector<2x32xf32>
    %533 = arith.mulf %531, %485 : vector<2x32xf32>
    %534 = arith.mulf %530, %529 : vector<2x32xf32>
    %535 = arith.addf %533, %534 : vector<2x32xf32>
    %536 = math.tanh %535 : vector<2x32xf32>
    %537 = arith.mulf %532, %536 : vector<2x32xf32>
    %cst_201 = arith.constant dense<0.000000e+00> : vector<2x32xf32>
    %538 = tpu.matmul %537, %210, %cst_201 {dimension_numbers = #tpu.dot_dimension_numbers<[1], [0], [0], [1], [0, 0, 1, 1], [], []>} : vector<2x32xf32>, vector<32x32xf32>, vector<2x32xf32> -> vector<2x32xf32>
    %539 = vector.broadcast %211 : vector<1x32xf32> to vector<2x32xf32>
    %540 = arith.addf %538, %539 : vector<2x32xf32>
    %541 = vector.shape_cast %540 : vector<2x32xf32> to vector<2x1x32xf32>
    %542 = vector.broadcast %541 : vector<2x1x32xf32> to vector<2x8x32xf32>
    %543 = arith.addf %209, %542 : vector<2x8x32xf32>
    %544 = math.tanh %543 : vector<2x8x32xf32>
    %545 = vector.broadcast %213 : vector<1x1x32xf32> to vector<2x8x32xf32>
    %546 = arith.mulf %544, %545 : vector<2x8x32xf32>
    %cst_202 = arith.constant dense<0.000000e+00> : vector<2x8xf32>
    %547 = vector.multi_reduction <add>, %546, %cst_202 [2] : vector<2x8x32xf32> to vector<2x8xf32>
    %548 = vector.broadcast %214 : vector<1x1xf32> to vector<2x8xf32>
    %549 = arith.addf %547, %548 : vector<2x8xf32>
    %cst_203 = arith.constant dense<0xFF800000> : vector<2xf32>
    %550 = vector.multi_reduction <maximumf>, %549, %cst_203 [1] : vector<2x8xf32> to vector<2xf32>
    %551 = vector.shape_cast %550 : vector<2xf32> to vector<2x1xf32>
    %552 = vector.broadcast %551 : vector<2x1xf32> to vector<2x8xf32>
    %553 = arith.subf %549, %552 : vector<2x8xf32>
    %554 = math.exp %553 : vector<2x8xf32>
    %cst_204 = arith.constant dense<0.000000e+00> : vector<2xf32>
    %555 = vector.multi_reduction <add>, %554, %cst_204 [1] : vector<2x8xf32> to vector<2xf32>
    %556 = vector.shape_cast %555 : vector<2xf32> to vector<2x1xf32>
    %557 = vector.broadcast %556 : vector<2x1xf32> to vector<2x8xf32>
    %558 = arith.divf %554, %557 : vector<2x8xf32>
    %c0_205 = arith.constant 0 : index
    %c6_206 = arith.constant 6 : index
    %c0_207 = arith.constant 0 : index
    %559 = vector.load %arg11[%c0_205, %c6_206, %c0_207] : memref<2x8x8xf32, #tpu.memory_space<vmem>>, vector<2x1x8xf32>
    %560 = vector.shape_cast %559 : vector<2x1x8xf32> to vector<2x8xf32>
    %561 = vector.shape_cast %558 : vector<2x8xf32> to vector<2x1x8xf32>
    tpu.vector_store %arg11[%c0_205, %c6_206, %c0_207], %561 {strides = array<i32>} : memref<2x8x8xf32, #tpu.memory_space<vmem>>, vector<2x1x8xf32>,
    %562 = vector.shape_cast %558 : vector<2x8xf32> to vector<2x1x8xf32>
    "tpu.trace_start"() <{level = 10 : i32, message = "bqs,bsh->bqh"}> : () -> ()
    %cst_208 = arith.constant dense<0.000000e+00> : vector<2x1x32xf32>
    %563 = tpu.matmul %562, %202, %cst_208 {dimension_numbers = #tpu.dot_dimension_numbers<[2], [1], [1], [2], [0, 0, 0, 1, 1, 2], [0], [0]>} : vector<2x1x8xf32>, vector<2x8x32xf32>, vector<2x1x32xf32> -> vector<2x1x32xf32>
    "tpu.trace_stop"() : () -> ()
    %564 = vector.shape_cast %563 : vector<2x1x32xf32> to vector<2x32xf32>
    %c7_209 = arith.constant 7 : index
    %c0_210 = arith.constant 0 : index
    %c0_211 = arith.constant 0 : index
    %565 = vector.load %arg3[%c7_209, %c0_210, %c0_211] : memref<8x32x128xf32, #tpu.memory_space<vmem>>, vector<1x32x128xf32>
    %566 = vector.shape_cast %565 : vector<1x32x128xf32> to vector<32x128xf32>
    %cst_212 = arith.constant dense<0.000000e+00> : vector<2x128xf32>
    %567 = tpu.matmul %564, %566, %cst_212 {dimension_numbers = #tpu.dot_dimension_numbers<[1], [0], [0], [1], [0, 0, 1, 1], [], []>} : vector<2x32xf32>, vector<32x128xf32>, vector<2x128xf32> -> vector<2x128xf32>
    %c7_213 = arith.constant 7 : index
    %c0_214 = arith.constant 0 : index
    %c0_215 = arith.constant 0 : index
    %568 = vector.load %arg4[%c7_213, %c0_214, %c0_215] : memref<8x1x128xf32, #tpu.memory_space<vmem>>, vector<1x1x128xf32>
    %569 = vector.shape_cast %568 : vector<1x1x128xf32> to vector<1x128xf32>
    %570 = vector.broadcast %569 : vector<1x128xf32> to vector<2x128xf32>
    %571 = arith.addf %567, %570 : vector<2x128xf32>
    %572 = vector.extract_strided_slice %571 {offsets = [0, 0], sizes = [2, 96], strides = [1, 1]} : vector<2x128xf32> to vector<2x96xf32>
    %573 = arith.negf %572 : vector<2x96xf32>
    %574 = math.exp %573 : vector<2x96xf32>
    %cst_216 = arith.constant 1.000000e+00 : f32
    %575 = vector.broadcast %cst_216 : f32 to vector<2x96xf32>
    %576 = arith.addf %575, %574 : vector<2x96xf32>
    %577 = arith.divf %575, %576 : vector<2x96xf32>
    %578 = vector.extract_strided_slice %571 {offsets = [0, 96], sizes = [2, 32], strides = [1, 1]} : vector<2x128xf32> to vector<2x32xf32>
    %579 = math.tanh %578 : vector<2x32xf32>
    %580 = vector.extract_strided_slice %577 {offsets = [0, 0], sizes = [2, 32], strides = [1, 1]} : vector<2x96xf32> to vector<2x32xf32>
    %581 = vector.extract_strided_slice %577 {offsets = [0, 32], sizes = [2, 32], strides = [1, 1]} : vector<2x96xf32> to vector<2x32xf32>
    %582 = vector.extract_strided_slice %577 {offsets = [0, 64], sizes = [2, 32], strides = [1, 1]} : vector<2x96xf32> to vector<2x32xf32>
    %583 = arith.mulf %581, %535 : vector<2x32xf32>
    %584 = arith.mulf %580, %579 : vector<2x32xf32>
    %585 = arith.addf %583, %584 : vector<2x32xf32>
    %586 = math.tanh %585 : vector<2x32xf32>
    %587 = arith.mulf %582, %586 : vector<2x32xf32>
    %cst_217 = arith.constant dense<0.000000e+00> : vector<2x32xf32>
    %588 = tpu.matmul %587, %210, %cst_217 {dimension_numbers = #tpu.dot_dimension_numbers<[1], [0], [0], [1], [0, 0, 1, 1], [], []>} : vector<2x32xf32>, vector<32x32xf32>, vector<2x32xf32> -> vector<2x32xf32>
    %589 = vector.broadcast %211 : vector<1x32xf32> to vector<2x32xf32>
    %590 = arith.addf %588, %589 : vector<2x32xf32>
    %591 = vector.shape_cast %590 : vector<2x32xf32> to vector<2x1x32xf32>
    %592 = vector.broadcast %591 : vector<2x1x32xf32> to vector<2x8x32xf32>
    %593 = arith.addf %209, %592 : vector<2x8x32xf32>
    %594 = math.tanh %593 : vector<2x8x32xf32>
    %595 = vector.broadcast %213 : vector<1x1x32xf32> to vector<2x8x32xf32>
    %596 = arith.mulf %594, %595 : vector<2x8x32xf32>
    %cst_218 = arith.constant dense<0.000000e+00> : vector<2x8xf32>
    %597 = vector.multi_reduction <add>, %596, %cst_218 [2] : vector<2x8x32xf32> to vector<2x8xf32>
    %598 = vector.broadcast %214 : vector<1x1xf32> to vector<2x8xf32>
    %599 = arith.addf %597, %598 : vector<2x8xf32>
    %cst_219 = arith.constant dense<0xFF800000> : vector<2xf32>
    %600 = vector.multi_reduction <maximumf>, %599, %cst_219 [1] : vector<2x8xf32> to vector<2xf32>
    %601 = vector.shape_cast %600 : vector<2xf32> to vector<2x1xf32>
    %602 = vector.broadcast %601 : vector<2x1xf32> to vector<2x8xf32>
    %603 = arith.subf %599, %602 : vector<2x8xf32>
    %604 = math.exp %603 : vector<2x8xf32>
    %cst_220 = arith.constant dense<0.000000e+00> : vector<2xf32>
    %605 = vector.multi_reduction <add>, %604, %cst_220 [1] : vector<2x8xf32> to vector<2xf32>
    %606 = vector.shape_cast %605 : vector<2xf32> to vector<2x1xf32>
    %607 = vector.broadcast %606 : vector<2x1xf32> to vector<2x8xf32>
    %608 = arith.divf %604, %607 : vector<2x8xf32>
    %c0_221 = arith.constant 0 : index
    %c7_222 = arith.constant 7 : index
    %c0_223 = arith.constant 0 : index
    %609 = vector.load %arg11[%c0_221, %c7_222, %c0_223] : memref<2x8x8xf32, #tpu.memory_space<vmem>>, vector<2x1x8xf32>
    %610 = vector.shape_cast %609 : vector<2x1x8xf32> to vector<2x8xf32>
    %611 = vector.shape_cast %608 : vector<2x8xf32> to vector<2x1x8xf32>
    tpu.vector_store %arg11[%c0_221, %c7_222, %c0_223], %611 {strides = array<i32>} : memref<2x8x8xf32, #tpu.memory_space<vmem>>, vector<2x1x8xf32>,
    return
  }
  func.func @transform_0(%arg0: i32) -> (i32, i32, i32) {
    %c0_i32 = arith.constant 0 : i32
    %c0_i32_0 = arith.constant 0 : i32
    %c0_i32_1 = arith.constant 0 : i32
    return %arg0, %c0_i32, %c0_i32_0 : i32, i32, i32
  }
  func.func @transform_1(%arg0: i32) -> (i32, i32, i32) {
    %c0_i32 = arith.constant 0 : i32
    %c0_i32_0 = arith.constant 0 : i32
    %c0_i32_1 = arith.constant 0 : i32
    %c0_i32_2 = arith.constant 0 : i32
    return %c0_i32, %c0_i32_0, %c0_i32_1 : i32, i32, i32
  }
  func.func @transform_2(%arg0: i32) -> (i32, i32, i32) {
    %c0_i32 = arith.constant 0 : i32
    %c0_i32_0 = arith.constant 0 : i32
    %c0_i32_1 = arith.constant 0 : i32
    %c0_i32_2 = arith.constant 0 : i32
    return %c0_i32, %c0_i32_0, %c0_i32_1 : i32, i32, i32
  }
  func.func @transform_3(%arg0: i32) -> (i32, i32, i32) {
    %c0_i32 = arith.constant 0 : i32
    %c0_i32_0 = arith.constant 0 : i32
    %c0_i32_1 = arith.constant 0 : i32
    %c0_i32_2 = arith.constant 0 : i32
    return %c0_i32, %c0_i32_0, %c0_i32_1 : i32, i32, i32
  }
  func.func @transform_4(%arg0: i32) -> (i32, i32) {
    %c0_i32 = arith.constant 0 : i32
    %c0_i32_0 = arith.constant 0 : i32
    %c0_i32_1 = arith.constant 0 : i32
    return %c0_i32, %c0_i32_0 : i32, i32
  }
  func.func @transform_5(%arg0: i32) -> (i32, i32) {
    %c0_i32 = arith.constant 0 : i32
    %c0_i32_0 = arith.constant 0 : i32
    %c0_i32_1 = arith.constant 0 : i32
    return %c0_i32, %c0_i32_0 : i32, i32
  }
  func.func @transform_6(%arg0: i32) -> (i32, i32) {
    %c0_i32 = arith.constant 0 : i32
    %c0_i32_0 = arith.constant 0 : i32
    %c0_i32_1 = arith.constant 0 : i32
    return %c0_i32, %c0_i32_0 : i32, i32
  }
  func.func @transform_7(%arg0: i32) -> (i32, i32) {
    %c0_i32 = arith.constant 0 : i32
    %c0_i32_0 = arith.constant 0 : i32
    %c0_i32_1 = arith.constant 0 : i32
    return %c0_i32, %c0_i32_0 : i32, i32
  }
  func.func @transform_8(%arg0: i32) -> (i32, i32) {
    %c0_i32 = arith.constant 0 : i32
    %c0_i32_0 = arith.constant 0 : i32
    %c0_i32_1 = arith.constant 0 : i32
    return %c0_i32, %c0_i32_0 : i32, i32
  }
  func.func @transform_9(%arg0: i32) -> (i32, i32) {
    %c0_i32 = arith.constant 0 : i32
    %c0_i32_0 = arith.constant 0 : i32
    %c0_i32_1 = arith.constant 0 : i32
    return %c0_i32, %c0_i32_0 : i32, i32
  }
  func.func @transform_10(%arg0: i32) -> (i32, i32, i32) {
    %c0_i32 = arith.constant 0 : i32
    %c0_i32_0 = arith.constant 0 : i32
    %c0_i32_1 = arith.constant 0 : i32
    return %arg0, %c0_i32, %c0_i32_0 : i32, i32, i32
  }
}

</mosaic_0001>

<bundles_post_ra>
// kernel: tpu_custom_call.1
= control target key start
LH: loop header
LB: loop body
LE: loop exit
PB: predicated region body
PF: predicated region fallthrough
CT: control target
= control target key end

     0   :  { %s6932_s0 = inlined_call_operand.hbm [shape: f32[2,8,128], index: 0, kind: input, shape index: {}]   ;;  %s6933_s1 = inlined_call_operand.hbm [shape: f32[8,32,128], index: 1, kind: input, shape index: {}]   ;;  %s6934_s2 = inlined_call_operand.hbm [shape: f32[8,32,128], index: 2, kind: input, shape index: {}]   ;;  %s6935_s3 = inlined_call_operand.hbm [shape: f32[8,1,128], index: 3, kind: input, shape index: {}]   ;;  %s6936_s4 = inlined_call_operand.hbm [shape: f32[32,32], index: 4, kind: input, shape index: {}]   ;;  %s6937_s5 = inlined_call_operand.vmem [shape: f32[1,32], index: 5, kind: input, shape index: {}]   ;;  %s6938_s6 = inlined_call_operand.hbm [shape: f32[32,32], index: 6, kind: input, shape index: {}]   ;;  %s6939_s7 = inlined_call_operand.vmem [shape: f32[1,32], index: 7, kind: input, shape index: {}]   ;;  %s6940_s8 = inlined_call_operand.vmem [shape: f32[1,32], index: 8, kind: input, shape index: {}]   ;;  %s6941_s9 = inlined_call_operand.<no memory space> [shape: f32[1,1], index: 9, kind: input, shape index: {}]   ;;  %s6942_s10 = inlined_call_operand.hbm [shape: f32[2,8,8], index: 10, kind: output, shape index: {}]  }
   0x1   :  { %v15_v0 = vstv %s6941_s9 }
   0x2   :  { %16 = vst [vmem:[#allocation3] sm:$0x1] %v15_v0 }
   0x3   :  { %17 = vsyncpa [#allocation5], 0 }
   0x4   :  { %18 = vsyncpa [#allocation8], 0 }
   0x5   :  { %19 = vsyncpa [#allocation11], 0 }
   0x6   :  { %20 = vsyncpa [#allocation14], 0 }
   0x7   :  { %21 = vsyncpa [#allocation6], 0  ;;  %s6015_s15 = smov [#allocation7]   ;;  %s6016_s17 = smov [#allocation10]  }
   0x8   :  { %s39_s16 = sshll.u32 %s6015_s15, 4  ;;  %s63_s18 = sshll.u32 %s6016_s17, 4  ;;  %s40_s16 = int_to_ptr.vmem [resolvable:$true] %s39_s16  ;;  %s64_s18 = int_to_ptr.vmem [resolvable:$true] %s63_s18 }
   0x9   :  { %s5873_s19 = scalar_lea.vmem %s40_s16, 4096  ;;  %p5878_p1 = scmp.lt.s32.totalorder %s40_s16, %s40_s16 }
   0xa   :  { %p5874_p0 = scmp.ne.s32.totalorder %s40_s16, %s5873_s19  ;;  %p5879_p2 = scmp.lt.s32.totalorder %s5873_s19, %s5873_s19 }
   0xc   :  { %p5880_p3 = por %p5879_p2, %p5878_p1 }
   0xe   :  { %p5881_p4 = pnand %p5880_p3, %p5874_p0 }
  0x10   :  { %5884 = shalt.err (!%p5881_p4)
}
  0x11   :  { %s6017_s9 = smov 128   ;;  %s6018_s20 = smov 8  }
  0x12   :  { %45 = dma.hbm_to_vmem [thread:$0]  %s6933_s1, 4096, %s40_s16, [#allocation8], %s6017_s9, %s6017_s9, %s6018_s20  }
  0x13   :  { %s5893_s23 = scalar_lea.vmem %s64_s18, 128  ;;  %p5898_p6 = scmp.lt.s32.totalorder %s64_s18, %s64_s18 }
  0x14   :  { %p5894_p5 = scmp.ne.s32.totalorder %s64_s18, %s5893_s23  ;;  %p5899_p7 = scmp.lt.s32.totalorder %s5893_s23, %s5893_s23 }
  0x16   :  { %p5900_p8 = por %p5899_p7, %p5898_p6 }
  0x18   :  { %p5901_p9 = pnand %p5900_p8, %p5894_p5 }
  0x1a   :  { %5904 = shalt.err (!%p5901_p9)
}
  0x1b   :  { %s6019_s24 = smov 16   ;;  %s6020_s25 = smov 1  }
  0x1c   :  { %69 = dma.hbm_to_vmem [thread:$0]  %s6935_s3, 128, %s64_s18, [#allocation11], %s6019_s24, %s6019_s24, %s6020_s25  }
  0x1d   :  { %s6021_s28 = smov [#allocation4]   ;;  %s6022_s30 = smov [#allocation9]  }
  0x1e   :  { %s27_s29 = sshll.u32 %s6021_s28, 4  ;;  %s51_s11 = sshll.u32 %s6022_s30, 4  ;;  %s28_s29 = int_to_ptr.vmem [resolvable:$true] %s27_s29  ;;  %s52_s11 = int_to_ptr.vmem [resolvable:$true] %s51_s11 }
  0x1f   :  { %s5913_s1 = scalar_lea.vmem %s28_s29, 256  ;;  %p5918_p11 = scmp.lt.s32.totalorder %s28_s29, %s28_s29 }
  0x20   :  { %p5914_p10 = scmp.ne.s32.totalorder %s28_s29, %s5913_s1  ;;  %p5919_p12 = scmp.lt.s32.totalorder %s5913_s1, %s5913_s1 }
  0x22   :  { %p5920_p13 = por %p5919_p12, %p5918_p11 }
  0x24   :  { %p5921_p0 = pnand %p5920_p13, %p5914_p10 }
  0x26   :  { %5924 = shalt.err (!%p5921_p0)
}
  0x27   :  { %33 = dma.hbm_to_vmem [thread:$0]  %s6932_s0, 256, %s28_s29, [#allocation5], %s6017_s9, %s6017_s9, %s6018_s20  }
  0x28   :  { %s5933_s3 = scalar_lea.vmem %s52_s11, 4096  ;;  %p5938_p2 = scmp.lt.s32.totalorder %s52_s11, %s52_s11 }
  0x29   :  { %p5934_p1 = scmp.ne.s32.totalorder %s52_s11, %s5933_s3  ;;  %p5939_p3 = scmp.lt.s32.totalorder %s5933_s3, %s5933_s3 }
  0x2b   :  { %p5940_p4 = por %p5939_p3, %p5938_p2 }
  0x2d   :  { %p5941_p5 = pnand %p5940_p4, %p5934_p1 }
  0x2f   :  { %5944 = shalt.err (!%p5941_p5)
}
  0x30   :  { %57 = dma.hbm_to_vmem [thread:$0]  %s6934_s2, 4096, %s52_s11, [#allocation8], %s6017_s9, %s6017_s9, %s6018_s20  }
  0x31   :  { %s6023_s16 = smov [#allocation12]   ;;  %s6024_s18 = smov [#allocation13]  }
  0x32   :  { %s75_s17 = sshll.u32 %s6023_s16, 4  ;;  %s89_s19 = sshll.u32 %s6024_s18, 4  ;;  %s76_s17 = int_to_ptr.vmem [resolvable:$true] %s75_s17  ;;  %s90_s19 = int_to_ptr.vmem [resolvable:$true] %s89_s19 }
  0x33   :  { %s5953_s0 = scalar_lea.vmem %s76_s17, 512  ;;  %p5958_p7 = scmp.lt.s32.totalorder %s76_s17, %s76_s17 }
  0x34   :  { %p5954_p6 = scmp.ne.s32.totalorder %s76_s17, %s5953_s0  ;;  %p5959_p8 = scmp.lt.s32.totalorder %s5953_s0, %s5953_s0 }
  0x36   :  { %p5960_p9 = por %p5959_p8, %p5958_p7 }
  0x38   :  { %p5961_p10 = pnand %p5960_p9, %p5954_p6 }
  0x3a   :  { %5964 = shalt.err (!%p5961_p10)
}
  0x3b   :  { %81 = dma.hbm_to_vmem [thread:$0]  %s6936_s4, 512, %s76_s17, [#allocation11], %s6017_s9, %s6017_s9, %s6018_s20  }
  0x3c   :  { %s5973_s2 = scalar_lea.vmem %s90_s19, 512  ;;  %p5978_p12 = scmp.lt.s32.totalorder %s90_s19, %s90_s19 }
  0x3d   :  { %p5974_p11 = scmp.ne.s32.totalorder %s90_s19, %s5973_s2  ;;  %p5979_p13 = scmp.lt.s32.totalorder %s5973_s2, %s5973_s2 }
  0x3f   :  { %p5980_p0 = por %p5979_p13, %p5978_p12 }
  0x41   :  { %p5981_p1 = pnand %p5980_p0, %p5974_p11 }
  0x43   :  { %5984 = shalt.err (!%p5981_p1)
}
  0x44   :  { %95 = dma.hbm_to_vmem [thread:$0]  %s6938_s6, 512, %s90_s19, [#allocation14], %s6017_s9, %s6017_s9, %s6018_s20  }
  0x45   :  { %6005 = dma.done.wait [#allocation5], 256  }
  0x46   :  { %6006 = vsyncadd [#allocation5], 4294967040 }
  0x47   :  { %6007 = dma.done.wait [#allocation8], 8192  }
  0x48   :  { %6008 = vsyncadd [#allocation8], 4294959104 }
  0x49   :  { %6009 = dma.done.wait [#allocation11], 640  }
  0x4a   :  { %6010 = vsyncadd [#allocation11], 4294966656 }
  0x4b   :  { %6011 = dma.done.wait [#allocation14], 512  }
  0x4c   :  { %6012 = vsyncadd [#allocation14], 4294966784  ;;  %v6025_v1 = vmov 0.0   ;;  %vm6026_vm0 = vmmov 0   ;;  %v123_v2 = vld [vmem:[#allocation7 + $0x18] sm:$0xff]  ;;  %v122_v3 = vld [vmem:[#allocation7 + $0x10] sm:$0xff] }
  0x4d   :  { %5269 = vmatprep.subr.mxu0 %v6025_v1  ;;  %5277 = vmatprep.mubr.msk.f32.mxu0 %vm6026_vm0, %v6025_v1  ;;  %v121_v4 = vld [vmem:[#allocation7 + $0x8] sm:$0xff]  ;;  %v120_v5 = vld [vmem:[#allocation7] sm:$0xff]  ;;  %v125_v6 = vld [vmem:[#allocation4 + $0x8] sm:$0x1]  ;;  %vm129_vm1 = vcmask 1041409   ;;  %s6027_s4 = smov 32  }
  0x4e   :  { %5280 = vmatprep.subr.mxu1 %v6025_v1  ;;  %5288 = vmatprep.mubr.msk.f32.mxu1 %vm6026_vm0, %v6025_v1  ;;  %v128_v7 = vrot.slane %v125_v6, 7  ;;  %v124_v8 = vld [vmem:[#allocation4] sm:$0x1]  ;;  %v274_v23 = vld [vmem:[#allocation7 + $0x38] sm:$0xff]  ;;  %v272_v25 = vld [vmem:[#allocation7 + $0x28] sm:$0xff]  ;;  %s6028_s6 = smov 64  }
  0x4f   :  { %5270 = vmatpush3.msra.mxu0 %v123_v2  ;;  %v273_v24 = vld [vmem:[#allocation7 + $0x30] sm:$0xff]  ;;  %5281 = vmatpush3.msra.mxu1 %v274_v23  ;;  %v271_v26 = vld [vmem:[#allocation7 + $0x20] sm:$0xff]  ;;  %vm132_vm2 = vcmask 261120   ;;  %v276_v31 = vld [vmem:[#allocation4 + $0x9] sm:$0x1]  ;;  %vm267_vm3 = vcmask 253952  }
  0x50   :  { %5271 = vmatprep.subr.mxu0 %v6025_v1  ;;  %v130_v9 = vsel %vm129_vm1, %v128_v7, %v124_v8  ;;  %5282 = vmatprep.subr.mxu1 %v6025_v1  ;;  %v281_v32 = vrot.slane %v276_v31, 7  ;;  %v275_v33 = vld [vmem:[#allocation4 + $0x1] sm:$0x1]  ;;  %v423_v48 = vld [vmem:[#allocation7 + $0x58] sm:$0xff]  ;;  %v421_v50 = vld [vmem:[#allocation7 + $0x48] sm:$0xff]  ;;  %vm1680_vm4 = vcmask 58368  }
  0x51   :  { %5272 = vmatpush3.msra.mxu0 %v122_v3  ;;  %5283 = vmatpush3.msra.mxu1 %v273_v24  ;;  %v422_v49 = vld [vmem:[#allocation7 + $0x50] sm:$0xff]  ;;  %v420_v51 = vld [vmem:[#allocation7 + $0x40] sm:$0xff]  ;;  %v425_v56 = vld [vmem:[#allocation4 + $0xa] sm:$0x1]  ;;  %vm1755_vm5 = vcmask 57344   ;;  %vm1758_vm6 = vcmask 64512  }
  0x52   :  { %5273 = vmatprep.subr.mxu0 %v6025_v1  ;;  %5284 = vmatprep.subr.mxu1 %v6025_v1  ;;  %v282_v34 = vsel %vm129_vm1, %v281_v32, %v275_v33  ;;  %v430_v57 = vrot.slane %v425_v56, 7  ;;  %v424_v58 = vld [vmem:[#allocation4 + $0x2] sm:$0x1] }
  0x53   :  { %5274 = vmatpush3.msra.mxu0 %v121_v4  ;;  %5285 = vmatpush3.msra.mxu1 %v272_v25 }
  0x54   :  { %5275 = vmatprep.subr.mxu0 %v6025_v1  ;;  %5286 = vmatprep.subr.mxu1 %v6025_v1  ;;  %v431_v59 = vsel %vm129_vm1, %v430_v57, %v424_v58 }
  0x55   :  { %5276 = vmatpush3.msra.mxu0 %v120_v5  ;;  %5287 = vmatpush3.msra.mxu1 %v271_v26 }
  0x56   :  { %5278 = vmatmul.mubr.f32.vlgmr.msra.gmra.mxu0 %v6025_v1  ;;  %5291 = vmatprep.subr.mxu0 %v6025_v1 }
  0x57   :  { %5299 = vmatprep.mubr.msk.f32.mxu0 %vm6026_vm0, %v6025_v1  ;;  %5302 = vmatprep.subr.mxu1 %v6025_v1 }
  0x58   :  { %5292 = vmatpush3.msra.mxu0 %v423_v48 }
  0x59   :  { %5293 = vmatprep.subr.mxu0 %v6025_v1 }
  0x5a   :  { %5294 = vmatpush3.msra.mxu0 %v422_v49 }
  0x5b   :  { %5295 = vmatprep.subr.mxu0 %v6025_v1 }
  0x5c   :  { %5296 = vmatpush3.msra.mxu0 %v421_v50 }
  0x5d   :  { %5297 = vmatprep.subr.mxu0 %v6025_v1 }
  0x5e   :  { %5298 = vmatpush3.msra.mxu0 %v420_v51 }
  0x5f   :  { %5313 = vmatprep.subr.mxu0 %v6025_v1 }
 0x116   :  { %v202_v10 = vpop.f32.mrf.mxu0 }
 0x117   :  { %v203_v11 = vadd.f32 %v202_v10, %v130_v9  ;;  %v572_v10 = vld [vmem:[#allocation7 + $0x78] sm:$0xff] }
 0x118   :  { %v5279_v12 = vpop.f32.mrf.mxu0 }
 0x119   :  { %5633 = vtanh.f32 %v203_v11  ;;  %v5048_v14 = vmul.f32 -1.442695, %v203_v11  ;;  %v571_v11 = vld [vmem:[#allocation7 + $0x70] sm:$0xff]  ;;  %v570_v12 = vld [vmem:[#allocation7 + $0x68] sm:$0xff] }
 0x11b   :  { %5635 = vpow2.f32 %v5048_v14 }
 0x126   :  { %v5634_v13 = vpop.eup %5633 }
 0x127   :  { %215 = vrot.lane.b32.xlu0 %v5634_v13, %s6027_s4  ;;  %v569_v13 = vld [vmem:[#allocation7 + $0x60] sm:$0xff] }
 0x128   :  { %v5636_v15 = vpop.eup %5635 }
 0x129   :  { %v209_v16 = vadd.f32 1.0, %v5636_v15 }
 0x12b   :  { %5637 = vrcp.f32 %v209_v16 }
 0x138   :  { %v5638_v17 = vpop.eup %5637 }
 0x139   :  { %v213_v20 = vmul.f32 0.0, %v5638_v17 }
 0x199   :  { %v216_v18 = vpop.permute.xlu0 %215 }
 0x19a   :  { %v218_v19 = vmul.f32 %v5638_v17, %v216_v18  ;;  %v574_v18 = vld [vmem:[#allocation4 + $0xb] sm:$0x1] }
 0x19c   :  { %220 = vrot.lane.b32.xlu0 %v218_v19, %s6027_s4  ;;  %v579_v19 = vrot.slane %v574_v18, 7 }
 0x20e   :  { %v221_v21 = vpop.permute.xlu0 %220 }
 0x20f   :  { %v223_v22 = vadd.f32 %v221_v21, %v213_v20  ;;  %v573_v20 = vld [vmem:[#allocation4 + $0x3] sm:$0x1] }
 0x210   :  { %v580_v21 = vsel %vm129_vm1, %v579_v19, %v573_v20 }
 0x211   :  { %5639 = vtanh.f32 %v223_v22 }
 0x21e   :  { %v5640_v27 = vpop.eup %5639 }
 0x21f   :  { %226 = vrot.lane.b32.xlu1 %v5640_v27, %s6027_s4 }
 0x291   :  { %v227_v28 = vpop.permute.xlu1 %226 }
 0x292   :  { %v6144_v29 = vmul.f32 %v5638_v17, %v227_v28 }
 0x294   :  { %277 = vrot.lane.b32.xlu1 %v6144_v29, %s6028_s6 }
 0x306   :  { %v278_v30 = vpop.permute.xlu1 %277 }
 0x307   :  { %5289 = vmatmul.mubr.msk.f32.vlgmr.msra.gmra.mxu1 %vm132_vm2, %v278_v30 }
 0x308   :  { %5310 = vmatprep.mubr.msk.f32.mxu1 %vm6026_vm0, %v6025_v1  ;;  %5303 = vmatpush3.msra.mxu1 %v572_v10 }
 0x309   :  { %5304 = vmatprep.subr.mxu1 %v6025_v1 }
 0x30a   :  { %5305 = vmatpush3.msra.mxu1 %v571_v11 }
 0x30b   :  { %5306 = vmatprep.subr.mxu1 %v6025_v1 }
 0x30c   :  { %5307 = vmatpush3.msra.mxu1 %v570_v12 }
 0x30d   :  { %5308 = vmatprep.subr.mxu1 %v6025_v1 }
 0x30e   :  { %5309 = vmatpush3.msra.mxu1 %v569_v13 }
 0x30f   :  { %5324 = vmatprep.subr.mxu1 %v6025_v1 }
 0x3c7   :  { %v352_v35 = vpop.f32.mrf.mxu1 }
 0x3c8   :  { %v353_v36 = vadd.f32 %v352_v35, %v282_v34 }
 0x3c9   :  { %v5290_v37 = vpop.f32.mrf.mxu1 }
 0x3ca   :  { %5641 = vtanh.f32 %v353_v36  ;;  %v5050_v39 = vmul.f32 -1.442695, %v353_v36  ;;  %v721_v36 = vld [vmem:[#allocation7 + $0x98] sm:$0xff]  ;;  %v720_v37 = vld [vmem:[#allocation7 + $0x90] sm:$0xff] }
 0x3cc   :  { %5643 = vpow2.f32 %v5050_v39  ;;  %v718_v39 = vld [vmem:[#allocation7 + $0x80] sm:$0xff] }
 0x3d7   :  { %v5642_v38 = vpop.eup %5641 }
 0x3d8   :  { %365 = vrot.lane.b32.xlu0 %v5642_v38, %s6027_s4  ;;  %v719_v38 = vld [vmem:[#allocation7 + $0x88] sm:$0xff] }
 0x3d9   :  { %v5644_v40 = vpop.eup %5643 }
 0x3da   :  { %v359_v41 = vadd.f32 1.0, %v5644_v40 }
 0x3dc   :  { %5645 = vrcp.f32 %v359_v41 }
 0x3e9   :  { %v5646_v42 = vpop.eup %5645 }
 0x3ea   :  { %v363_v45 = vmul.f32 %v5646_v42, %v223_v22 }
 0x44a   :  { %v366_v43 = vpop.permute.xlu0 %365 }
 0x44b   :  { %v368_v44 = vmul.f32 %v5646_v42, %v366_v43 }
 0x44d   :  { %370 = vrot.lane.b32.xlu1 %v368_v44, %s6027_s4  ;;  %v723_v44 = vld [vmem:[#allocation4 + $0xc] sm:$0x1] }
 0x4bf   :  { %v371_v46 = vpop.permute.xlu1 %370 }
 0x4c0   :  { %v373_v47 = vadd.f32 %v371_v46, %v363_v45  ;;  %v728_v45 = vrot.slane %v723_v44, 7  ;;  %v722_v46 = vld [vmem:[#allocation4 + $0x4] sm:$0x1] }
 0x4c2   :  { %5647 = vtanh.f32 %v373_v47 }
 0x4cf   :  { %v5648_v52 = vpop.eup %5647 }
 0x4d0   :  { %376 = vrot.lane.b32.xlu0 %v5648_v52, %s6027_s4 }
 0x542   :  { %v377_v53 = vpop.permute.xlu0 %376 }
 0x543   :  { %v6159_v54 = vmul.f32 %v5646_v42, %v377_v53 }
 0x545   :  { %426 = vrot.lane.b32.xlu1 %v6159_v54, %s6028_s6 }
 0x5b7   :  { %v427_v55 = vpop.permute.xlu1 %426 }
 0x5b8   :  { %5300 = vmatmul.mubr.msk.f32.vlgmr.msra.gmra.mxu0 %vm132_vm2, %v427_v55 }
 0x5b9   :  { %5321 = vmatprep.mubr.msk.f32.mxu0 %vm6026_vm0, %v6025_v1  ;;  %5314 = vmatpush3.msra.mxu0 %v721_v36  ;;  %v1020_v36 = vld [vmem:[#allocation4 + $0x6] sm:$0x1] }
 0x5ba   :  { %5315 = vmatprep.subr.mxu0 %v6025_v1 }
 0x5bb   :  { %5316 = vmatpush3.msra.mxu0 %v720_v37 }
 0x5bc   :  { %5317 = vmatprep.subr.mxu0 %v6025_v1 }
 0x5bd   :  { %5318 = vmatpush3.msra.mxu0 %v719_v38 }
 0x5be   :  { %5319 = vmatprep.subr.mxu0 %v6025_v1 }
 0x5bf   :  { %5320 = vmatpush3.msra.mxu0 %v718_v39 }
 0x5c0   :  { %5335 = vmatprep.subr.mxu0 %v6025_v1 }
 0x678   :  { %v501_v60 = vpop.f32.mrf.mxu0 }
 0x679   :  { %v502_v61 = vadd.f32 %v501_v60, %v431_v59 }
 0x67a   :  { %v5301_v62 = vpop.f32.mrf.mxu0 }
 0x67b   :  { %5649 = vtanh.f32 %v502_v61  ;;  %v5052_v0 = vmul.f32 -1.442695, %v502_v61  ;;  %v870_v62 = vld [vmem:[#allocation7 + $0xb8] sm:$0xff] }
 0x67d   :  { %5651 = vpow2.f32 %v5052_v0  ;;  %v868_v0 = vld [vmem:[#allocation7 + $0xa8] sm:$0xff] }
 0x688   :  { %v5650_v63 = vpop.eup %5649 }
 0x689   :  { %514 = vrot.lane.b32.xlu0 %v5650_v63, %s6027_s4  ;;  %v869_v63 = vld [vmem:[#allocation7 + $0xb0] sm:$0xff] }
 0x68a   :  { %v5652_v2 = vpop.eup %5651 }
 0x68b   :  { %v508_v3 = vadd.f32 1.0, %v5652_v2  ;;  %v867_v2 = vld [vmem:[#allocation7 + $0xa0] sm:$0xff] }
 0x68d   :  { %5653 = vrcp.f32 %v508_v3 }
 0x69a   :  { %v5654_v4 = vpop.eup %5653 }
 0x69b   :  { %v512_v7 = vmul.f32 %v5654_v4, %v373_v47  ;;  %v729_v47 = vsel %vm129_vm1, %v728_v45, %v722_v46 }
 0x6fb   :  { %v515_v5 = vpop.permute.xlu0 %514 }
 0x6fc   :  { %v517_v6 = vmul.f32 %v5654_v4, %v515_v5 }
 0x6fe   :  { %519 = vrot.lane.b32.xlu1 %v517_v6, %s6027_s4 }
 0x770   :  { %v520_v8 = vpop.permute.xlu1 %519 }
 0x771   :  { %v522_v9 = vadd.f32 %v520_v8, %v512_v7  ;;  %v872_v7 = vld [vmem:[#allocation4 + $0xd] sm:$0x1] }
 0x772   :  { %v877_v8 = vrot.slane %v872_v7, 7 }
 0x773   :  { %5655 = vtanh.f32 %v522_v9 }
 0x780   :  { %v5656_v14 = vpop.eup %5655 }
 0x781   :  { %525 = vrot.lane.b32.xlu0 %v5656_v14, %s6027_s4 }
 0x7f3   :  { %v526_v15 = vpop.permute.xlu0 %525 }
 0x7f4   :  { %v6174_v16 = vmul.f32 %v5654_v4, %v526_v15 }
 0x7f6   :  { %575 = vrot.lane.b32.xlu1 %v6174_v16, %s6028_s6 }
 0x868   :  { %v576_v17 = vpop.permute.xlu1 %575 }
 0x869   :  { %5311 = vmatmul.mubr.msk.f32.vlgmr.msra.gmra.mxu1 %vm132_vm2, %v576_v17 }
 0x86a   :  { %5332 = vmatprep.mubr.msk.f32.mxu1 %vm6026_vm0, %v6025_v1  ;;  %5325 = vmatpush3.msra.mxu1 %v870_v62 }
 0x86b   :  { %5326 = vmatprep.subr.mxu1 %v6025_v1 }
 0x86c   :  { %5327 = vmatpush3.msra.mxu1 %v869_v63  ;;  %v1169_v63 = vld [vmem:[#allocation4 + $0x7] sm:$0x1] }
 0x86d   :  { %5328 = vmatprep.subr.mxu1 %v6025_v1 }
 0x86e   :  { %5329 = vmatpush3.msra.mxu1 %v868_v0 }
 0x86f   :  { %5330 = vmatprep.subr.mxu1 %v6025_v1 }
 0x870   :  { %5331 = vmatpush3.msra.mxu1 %v867_v2 }
 0x871   :  { %5346 = vmatprep.subr.mxu1 %v6025_v1 }
 0x929   :  { %v650_v22 = vpop.f32.mrf.mxu1 }
 0x92a   :  { %v651_v23 = vadd.f32 %v650_v22, %v580_v21 }
 0x92b   :  { %v5312_v24 = vpop.f32.mrf.mxu1 }
 0x92c   :  { %5657 = vtanh.f32 %v651_v23  ;;  %v5054_v26 = vmul.f32 -1.442695, %v651_v23 }
 0x92e   :  { %5659 = vpow2.f32 %v5054_v26  ;;  %v1018_v26 = vld [vmem:[#allocation7 + $0xd0] sm:$0xff] }
 0x939   :  { %v5658_v25 = vpop.eup %5657 }
 0x93a   :  { %663 = vrot.lane.b32.xlu0 %v5658_v25, %s6027_s4  ;;  %v1019_v25 = vld [vmem:[#allocation7 + $0xd8] sm:$0xff] }
 0x93b   :  { %v5660_v27 = vpop.eup %5659 }
 0x93c   :  { %v657_v28 = vadd.f32 1.0, %v5660_v27  ;;  %v1017_v27 = vld [vmem:[#allocation7 + $0xc8] sm:$0xff] }
 0x93e   :  { %5661 = vrcp.f32 %v657_v28  ;;  %v1016_v28 = vld [vmem:[#allocation7 + $0xc0] sm:$0xff] }
 0x94b   :  { %v5662_v30 = vpop.eup %5661 }
 0x94c   :  { %v661_v33 = vmul.f32 %v5662_v30, %v522_v9  ;;  %v871_v9 = vld [vmem:[#allocation4 + $0x5] sm:$0x1] }
 0x94d   :  { %v878_v10 = vsel %vm129_vm1, %v877_v8, %v871_v9 }
 0x9ac   :  { %v664_v31 = vpop.permute.xlu0 %663 }
 0x9ad   :  { %v666_v32 = vmul.f32 %v5662_v30, %v664_v31 }
 0x9af   :  { %668 = vrot.lane.b32.xlu1 %v666_v32, %s6027_s4 }
 0xa21   :  { %v669_v34 = vpop.permute.xlu1 %668 }
 0xa22   :  { %v671_v35 = vadd.f32 %v669_v34, %v661_v33  ;;  %v1021_v34 = vld [vmem:[#allocation4 + $0xe] sm:$0x1] }
 0xa24   :  { %5663 = vtanh.f32 %v671_v35 }
 0xa31   :  { %v5664_v40 = vpop.eup %5663 }
 0xa32   :  { %674 = vrot.lane.b32.xlu0 %v5664_v40, %s6027_s4 }
 0xaa4   :  { %v675_v41 = vpop.permute.xlu0 %674 }
 0xaa5   :  { %v6189_v42 = vmul.f32 %v5662_v30, %v675_v41 }
 0xaa7   :  { %724 = vrot.lane.b32.xlu1 %v6189_v42, %s6028_s6 }
 0xb19   :  { %v725_v43 = vpop.permute.xlu1 %724 }
 0xb1a   :  { %5322 = vmatmul.mubr.msk.f32.vlgmr.msra.gmra.mxu0 %vm132_vm2, %v725_v43 }
 0xb1b   :  { %5343 = vmatprep.mubr.msk.f32.mxu0 %vm6026_vm0, %v6025_v1  ;;  %5336 = vmatpush3.msra.mxu0 %v1019_v25  ;;  %v5066_v25 = vld [vmem:[#allocation10] ss:$0 sm:$0xff] }
 0xb1c   :  { %5337 = vmatprep.subr.mxu0 %v6025_v1 }
 0xb1d   :  { %5338 = vmatpush3.msra.mxu0 %v1018_v26 }
 0xb1e   :  { %5339 = vmatprep.subr.mxu0 %v6025_v1 }
 0xb1f   :  { %5340 = vmatpush3.msra.mxu0 %v1017_v27 }
 0xb20   :  { %5341 = vmatprep.subr.mxu0 %v6025_v1 }
 0xb21   :  { %5342 = vmatpush3.msra.mxu0 %v1016_v28 }
 0xbda   :  { %v799_v48 = vpop.f32.mrf.mxu0 }
 0xbdb   :  { %v800_v49 = vadd.f32 %v799_v48, %v729_v47 }
 0xbdc   :  { %v5323_v50 = vpop.f32.mrf.mxu0 }
 0xbdd   :  { %5665 = vtanh.f32 %v800_v49  ;;  %v5056_v52 = vmul.f32 -1.442695, %v800_v49 }
 0xbdf   :  { %5667 = vpow2.f32 %v5056_v52  ;;  %v1168_v52 = vld [vmem:[#allocation7 + $0xf8] sm:$0xff] }
 0xbea   :  { %v5666_v51 = vpop.eup %5665 }
 0xbeb   :  { %812 = vrot.lane.b32.xlu0 %v5666_v51, %s6027_s4 }
 0xbec   :  { %v5668_v53 = vpop.eup %5667 }
 0xbed   :  { %v806_v55 = vadd.f32 1.0, %v5668_v53  ;;  %v1167_v53 = vld [vmem:[#allocation7 + $0xf0] sm:$0xff] }
 0xbef   :  { %5669 = vrcp.f32 %v806_v55  ;;  %v1166_v55 = vld [vmem:[#allocation7 + $0xe8] sm:$0xff] }
 0xbfc   :  { %v5670_v56 = vpop.eup %5669 }
 0xbfd   :  { %v810_v59 = vmul.f32 %v5670_v56, %v671_v35  ;;  %v1026_v35 = vrot.slane %v1021_v34, 7 }
 0xbff   :  { %v1027_v37 = vsel %vm129_vm1, %v1026_v35, %v1020_v36  ;;  %v6029_v35 = vmov 1966171168  }
 0xc00   :  { %v232_v36 = vunpack.c.l.s4 %v6029_v35 }
 0xc5d   :  { %v813_v57 = vpop.permute.xlu0 %812 }
 0xc5e   :  { %v815_v58 = vmul.f32 %v5670_v56, %v813_v57 }
 0xc60   :  { %817 = vrot.lane.b32.xlu1 %v815_v58, %s6027_s4 }
 0xcd2   :  { %v818_v60 = vpop.permute.xlu1 %817 }
 0xcd3   :  { %v820_v61 = vadd.f32 %v818_v60, %v810_v59 }
 0xcd5   :  { %5671 = vtanh.f32 %v820_v61 }
 0xce2   :  { %v5672_v3 = vpop.eup %5671 }
 0xce3   :  { %823 = vrot.lane.b32.xlu0 %v5672_v3, %s6027_s4 }
 0xd55   :  { %v824_v4 = vpop.permute.xlu0 %823 }
 0xd56   :  { %v6204_v5 = vmul.f32 %v5670_v56, %v824_v4  ;;  %v1165_v56 = vld [vmem:[#allocation7 + $0xe0] sm:$0xff] }
 0xd58   :  { %873 = vrot.lane.b32.xlu1 %v6204_v5, %s6028_s6 }
 0xdca   :  { %v874_v6 = vpop.permute.xlu1 %873 }
 0xdcb   :  { %5333 = vmatmul.mubr.msk.f32.vlgmr.msra.gmra.mxu1 %vm132_vm2, %v874_v6 }
 0xdcc   :  { %5354 = vmatprep.mubr.msk.f32.mxu1 %vm6026_vm0, %v6025_v1  ;;  %5347 = vmatpush3.msra.mxu1 %v1168_v52 }
 0xdcd   :  { %5348 = vmatprep.subr.mxu1 %v6025_v1 }
 0xdce   :  { %5349 = vmatpush3.msra.mxu1 %v1167_v53 }
 0xdcf   :  { %5350 = vmatprep.subr.mxu1 %v6025_v1 }
 0xdd0   :  { %5351 = vmatpush3.msra.mxu1 %v1166_v55 }
 0xdd1   :  { %5352 = vmatprep.subr.mxu1 %v6025_v1 }
 0xdd2   :  { %5353 = vmatpush3.msra.mxu1 %v1165_v56 }
 0xdd3   :  { %5368 = vmatprep.subr.mxu1 %v6025_v1 }
 0xe8b   :  { %v948_v11 = vpop.f32.mrf.mxu1 }
 0xe8c   :  { %v949_v12 = vadd.f32 %v948_v11, %v878_v10 }
 0xe8d   :  { %v5334_v13 = vpop.f32.mrf.mxu1 }
 0xe8e   :  { %5673 = vtanh.f32 %v949_v12  ;;  %v5058_v15 = vmul.f32 -1.442695, %v949_v12 }
 0xe90   :  { %5675 = vpow2.f32 %v5058_v15 }
 0xe9b   :  { %v5674_v14 = vpop.eup %5673 }
 0xe9c   :  { %961 = vrot.lane.b32.xlu0 %v5674_v14, %s6027_s4 }
 0xe9d   :  { %v5676_v17 = vpop.eup %5675 }
 0xe9e   :  { %v955_v18 = vadd.f32 1.0, %v5676_v17  ;;  %v1417_v17 = vld [vmem:[#allocation9 + $0x18] sm:$0xff] }
 0xea0   :  { %5677 = vrcp.f32 %v955_v18  ;;  %v1416_v18 = vld [vmem:[#allocation9 + $0x10] sm:$0xff] }
 0xead   :  { %v5678_v19 = vpop.eup %5677 }
 0xeae   :  { %v959_v22 = vmul.f32 %v5678_v19, %v820_v61  ;;  %v1170_v61 = vld [vmem:[#allocation4 + $0xf] sm:$0x1] }
 0xeaf   :  { %v1175_v62 = vrot.slane %v1170_v61, 7 }
 0xeb1   :  { %v1176_v0 = vsel %vm129_vm1, %v1175_v62, %v1169_v63 }
 0xf0e   :  { %v962_v20 = vpop.permute.xlu0 %961 }
 0xf0f   :  { %v964_v21 = vmul.f32 %v5678_v19, %v962_v20  ;;  %v1414_v20 = vld [vmem:[#allocation9] sm:$0xff] }
 0xf11   :  { %966 = vrot.lane.b32.xlu1 %v964_v21, %s6027_s4 }
 0xf83   :  { %v967_v23 = vpop.permute.xlu1 %966 }
 0xf84   :  { %v969_v24 = vadd.f32 %v967_v23, %v959_v22 }
 0xf86   :  { %5679 = vtanh.f32 %v969_v24 }
 0xf93   :  { %v5680_v30 = vpop.eup %5679 }
 0xf94   :  { %972 = vrot.lane.b32.xlu0 %v5680_v30, %s6027_s4 }
0x1006   :  { %v973_v31 = vpop.permute.xlu0 %972 }
0x1007   :  { %v6218_v32 = vmul.f32 %v5678_v19, %v973_v31  ;;  %v1415_v19 = vld [vmem:[#allocation9 + $0x8] sm:$0xff] }
0x1009   :  { %1022 = vrot.lane.b32.xlu1 %v6218_v32, %s6028_s6 }
0x107b   :  { %v1023_v33 = vpop.permute.xlu1 %1022 }
0x107c   :  { %5344 = vmatmul.mubr.msk.f32.vlgmr.msra.gmra.mxu0 %vm132_vm2, %v1023_v33 }
0x113c   :  { %v1097_v38 = vpop.f32.mrf.mxu0 }
0x113d   :  { %v1098_v39 = vadd.f32 %v1097_v38, %v1027_v37  ;;  %v234_v37 = vlaneseq  ;;  %v233_v38 = vunpack.c.0.s8 %v232_v36  ;;  %v1318_v36 = vld [vmem:[#allocation12 + $0x18] sm:$0xff] }
0x113e   :  { %v5345_v40 = vpop.f32.mrf.mxu0  ;;  %5357 = vmatprep.subr.mxu0 %v1318_v36 }
0x113f   :  { %5681 = vtanh.f32 %v1098_v39  ;;  %v5060_v43 = vmul.f32 -1.442695, %v1098_v39  ;;  %v6258_v39 = vshrl.u32 %v234_v37, 7  ;;  %5358 = vmatpush3.msra.mxu0 %v1318_v36 }
0x1141   :  { %5683 = vpow2.f32 %v5060_v43  ;;  %v6261_v40 = vsub.s32 %v233_v38, %v6258_v39  ;;  %v1317_v38 = vld [vmem:[#allocation12 + $0x10] sm:$0xff] }
0x1142   :  { %5359 = vmatprep.subr.mxu0 %v1317_v38 }
0x1143   :  { %5360 = vmatpush3.msra.mxu0 %v1317_v38 }
0x114c   :  { %v5682_v41 = vpop.eup %5681 }
0x114d   :  { %1110 = vrot.lane.b32.xlu0 %v5682_v41, %s6027_s4  ;;  %v237_v41 = vrot.slane %v6144_v29, %v6261_v40  ;;  %v834_v29 = vrot.slane %v6204_v5, %v6261_v40 }
0x114e   :  { %v5684_v44 = vpop.eup %5683 }
0x114f   :  { %v1104_v45 = vadd.f32 1.0, %v5684_v44  ;;  %v238_v53 = vcombine.high %v237_v41, %v237_v41 }
0x1151   :  { %5685 = vrcp.f32 %v1104_v45  ;;  %v245_v45 = vrot.slane %v237_v41, %v6261_v40  ;;  %v1316_v41 = vld [vmem:[#allocation12 + $0x8] sm:$0xff] }
0x1152   :  { %5361 = vmatprep.subr.mxu0 %v1316_v41 }
0x1153   :  { %5362 = vmatpush3.msra.mxu0 %v1316_v41 }
0x115e   :  { %v5686_v46 = vpop.eup %5685 }
0x115f   :  { %v1108_v49 = vmul.f32 %v5686_v46, %v969_v24 }
0x11bf   :  { %v1111_v47 = vpop.permute.xlu0 %1110 }
0x11c0   :  { %v1113_v48 = vmul.f32 %v5686_v46, %v1111_v47 }
0x11c2   :  { %1115 = vrot.lane.b32.xlu1 %v1113_v48, %s6027_s4  ;;  %v6272_v48 = vsub.s32 0, %v6258_v39 }
0x1234   :  { %v1116_v50 = vpop.permute.xlu1 %1115 }
0x1235   :  { %v1118_v51 = vadd.f32 %v1116_v50, %v1108_v49  ;;  %v256_v50 = vrot.slane %v245_v45, %v6272_v48 }
0x1237   :  { %5687 = vtanh.f32 %v1118_v51 }
0x1244   :  { %v5688_v57 = vpop.eup %5687 }
0x1245   :  { %1121 = vrot.lane.b32.xlu0 %v5688_v57, %s6027_s4 }
0x12b7   :  { %v1122_v58 = vpop.permute.xlu0 %1121 }
0x12b8   :  { %v6231_v59 = vmul.f32 %v5686_v46, %v1122_v58  ;;  %v536_v46 = vrot.slane %v6174_v16, %v6261_v40  ;;  %v252_v58 = vrot.slane %v238_v53, %v6261_v40 }
0x12ba   :  { %1171 = vrot.lane.b32.xlu1 %v6231_v59, %s6028_s6  ;;  %v544_v49 = vrot.slane %v536_v46, %v6261_v40  ;;  %v1132_v16 = vrot.slane %v6231_v59, %v6261_v40  ;;  %v537_v5 = vcombine.high %v536_v46, %v536_v46  ;;  %v260_v59 = vrot.slane %v252_v58, %v6272_v48 }
0x12bc   :  { %v555_v52 = vrot.slane %v544_v49, %v6272_v48  ;;  %v1140_v55 = vrot.slane %v1132_v16, %v6261_v40  ;;  %v551_v61 = vrot.slane %v537_v5, %v6261_v40  ;;  %v1133_v62 = vcombine.high %v1132_v16, %v1132_v16 }
0x12be   :  { %v1151_v57 = vrot.slane %v1140_v55, %v6272_v48  ;;  %v559_v63 = vrot.slane %v551_v61, %v6272_v48 }
0x132c   :  { %v1172_v60 = vpop.permute.xlu1 %1171 }
0x132d   :  { %5355 = vmatmul.mubr.msk.f32.vlgmr.msra.gmra.mxu1 %vm132_vm2, %v1172_v60  ;;  %v835_v60 = vcombine.high %v834_v29, %v834_v29 }
0x132e   :  { %5376 = vmatprep.mubr.msk.f32.mxu1 %vm6026_vm0, %v6025_v1  ;;  %5369 = vmatpush3.msra.mxu1 %v1417_v17 }
0x132f   :  { %5370 = vmatprep.subr.mxu1 %v6025_v1 }
0x1330   :  { %5371 = vmatpush3.msra.mxu1 %v1416_v18 }
0x1331   :  { %5372 = vmatprep.subr.mxu1 %v6025_v1 }
0x1332   :  { %5373 = vmatpush3.msra.mxu1 %v1415_v19  ;;  %v983_v19 = vrot.slane %v6218_v32, %v6261_v40 }
0x1333   :  { %5374 = vmatprep.subr.mxu1 %v6025_v1 }
0x1334   :  { %5375 = vmatpush3.msra.mxu1 %v1414_v20 }
0x1335   :  { %5390 = vmatprep.subr.mxu1 %v6025_v1 }
0x13ed   :  { %v1246_v2 = vpop.f32.mrf.mxu1 }
0x13ee   :  { %v1247_v3 = vadd.f32 %v1246_v2, %v1176_v0  ;;  %v849_v0 = vrot.slane %v835_v60, %v6261_v40 }
0x13ef   :  { %v5356_v4 = vpop.f32.mrf.mxu1 }
0x13f0   :  { %5689 = vtanh.f32 %v1247_v3  ;;  %v5062_v7 = vmul.f32 -1.442695, %v1247_v3  ;;  %v857_v2 = vrot.slane %v849_v0, %v6272_v48  ;;  %v1147_v3 = vrot.slane %v1133_v62, %v6261_v40  ;;  %v6371_v62 = vld [vmem:[#allocation13 + $0x10] sm:$0xff]  ;;  %v6381_v0 = vld [vmem:[#allocation13] sm:$0xff] }
0x13f2   :  { %5691 = vpow2.f32 %v5062_v7  ;;  %v1155_v4 = vrot.slane %v1147_v3, %v6272_v48  ;;  %v6030_v3 = vmov 0  }
0x13f3   :  { %5631 = vset.pattern.permute.xlu0 %v6030_v3  ;;  %5632 = vset.pattern.permute.xlu1 %v6030_v3 }
0x13fd   :  { %v5690_v6 = vpop.eup %5689 }
0x13fe   :  { %1259 = vrot.lane.b32.xlu0 %v5690_v6, %s6027_s4 }
0x13ff   :  { %v5692_v8 = vpop.eup %5691 }
0x1400   :  { %v1253_v9 = vadd.f32 1.0, %v5692_v8 }
0x1402   :  { %5693 = vrcp.f32 %v1253_v9 }
0x140f   :  { %v5694_v10 = vpop.eup %5693 }
0x1410   :  { %v1257_v13 = vmul.f32 %v5694_v10, %v1118_v51  ;;  %v842_v51 = vrot.slane %v834_v29, %v6261_v40 }
0x1412   :  { %v853_v56 = vrot.slane %v842_v51, %v6272_v48 }
0x1470   :  { %v1260_v11 = vpop.permute.xlu0 %1259 }
0x1471   :  { %v1262_v12 = vmul.f32 %v5694_v10, %v1260_v11  ;;  %v387_v11 = vrot.slane %v6159_v54, %v6261_v40 }
0x1473   :  { %1264 = vrot.lane.b32.xlu1 %v1262_v12, %s6027_s4  ;;  %v388_v32 = vcombine.high %v387_v11, %v387_v11 }
0x14e5   :  { %v1265_v14 = vpop.permute.xlu1 %1264 }
0x14e6   :  { %v6241_v15 = vadd.f32 %v1265_v14, %v1257_v13  ;;  %v395_v13 = vrot.slane %v387_v11, %v6261_v40  ;;  %v685_v14 = vrot.slane %v6189_v42, %v6261_v40  ;;  %v991_v42 = vrot.slane %v983_v19, %v6261_v40 }
0x14e8   :  { %5695 = vtanh.f32 %v6241_v15  ;;  %v693_v18 = vrot.slane %v685_v14, %v6261_v40  ;;  %v406_v54 = vrot.slane %v395_v13, %v6272_v48 }
0x14f5   :  { %v5696_v21 = vpop.eup %5695 }
0x14f6   :  { %1270 = vrot.lane.b32.xlu0 %v5696_v21, %s6027_s4 }
0x1568   :  { %v1271_v22 = vpop.permute.xlu0 %1270 }
0x1569   :  { %v6249_v23 = vmul.f32 %v5694_v10, %v1271_v22  ;;  %v704_v22 = vrot.slane %v693_v18, %v6272_v48 }
0x156b   :  { %1425 = vrot.lane.b32.xlu1 %v6249_v23, %s6028_s6  ;;  %v1281_v21 = vrot.slane %v6249_v23, %v6261_v40 }
0x15dd   :  { %v1426_v24 = vpop.permute.xlu1 %1425 }
0x15de   :  { %5377 = vmatmul.mubr.msk.f32.vlgmr.msra.gmra.mxu1 %vm132_vm2, %v1426_v24 }
0x15df   :  { %5392 = vmatprep.mubr.msk.f32.mxu1 %vm6026_vm0, %v6025_v1 }
0x169e   :  { %v1495_v26 = vpop.f32.mrf.mxu1 }
0x169f   :  { %v1496_v27 = vadd.f32 %v5066_v25, %v1495_v26  ;;  %v1289_v25 = vrot.slane %v1281_v21, %v6261_v40  ;;  %v1002_v26 = vrot.slane %v991_v42, %v6272_v48 }
0x16a0   :  { %v5378_v28 = vpop.f32.mrf.mxu1 }
0x16a1   :  { %5697 = vtanh.f32 %v1496_v27  ;;  %v5068_v31 = vmul.f32 -1.442695, %v1496_v27  ;;  %v686_v28 = vcombine.high %v685_v14, %v685_v14  ;;  %v1300_v23 = vrot.slane %v1289_v25, %v6272_v48 }
0x16a3   :  { %5699 = vpow2.f32 %v5068_v31  ;;  %v700_v35 = vrot.slane %v686_v28, %v6261_v40 }
0x16a5   :  { %v708_v45 = vrot.slane %v700_v35, %v6272_v48 }
0x16ae   :  { %v5698_v30 = vpop.eup %5697 }
0x16af   :  { %1508 = vrot.lane.b32.xlu0 %v5698_v30, %s6027_s4  ;;  %v402_v30 = vrot.slane %v388_v32, %v6261_v40 }
0x16b0   :  { %v5700_v33 = vpop.eup %5699 }
0x16b1   :  { %v1502_v34 = vadd.f32 1.0, %v5700_v33  ;;  %v984_v33 = vcombine.high %v983_v19, %v983_v19 }
0x16b3   :  { %5701 = vrcp.f32 %v1502_v34  ;;  %v410_v34 = vrot.slane %v402_v30, %v6272_v48  ;;  %v998_v46 = vrot.slane %v984_v33, %v6261_v40  ;;  %v1669_v30 = vand.u32 127, %v234_v37 }
0x16b5   :  { %v1006_v49 = vrot.slane %v998_v46, %v6272_v48  ;;  %v6421_v33 = vsub.s32 %v1669_v30, %v6258_v39  ;;  %v6432_v46 = vsub.s32 1, %v6258_v39 }
0x16c0   :  { %v6265_v43 = vpop.eup %5701 }
0x16c1   :  { %v1506_v6 = vmul.f32 %v6265_v43, %v6241_v15 }
0x1721   :  { %v1509_v44 = vpop.permute.xlu0 %1508 }
0x1722   :  { %v1511_v47 = vmul.f32 %v6265_v43, %v1509_v44  ;;  %v1282_v44 = vcombine.high %v1281_v21, %v1281_v21 }
0x1724   :  { %1513 = vrot.lane.b32.xlu1 %v1511_v47, %s6027_s4  ;;  %v1315_v47 = vld [vmem:[#allocation12] sm:$0xff]  ;;  %v1296_v29 = vrot.slane %v1282_v44, %v6261_v40 }
0x1725   :  { %5363 = vmatprep.subr.mxu0 %v1315_v47 }
0x1726   :  { %5364 = vmatpush3.msra.mxu0 %v1315_v47 }
0x1727   :  { %5379 = vmatprep.subr.mxu0 %v6025_v1 }
0x1728   :  { %261 = vrot.lane.b32.xlu1 %v256_v50, %s6028_s6  ;;  %v1304_v50 = vrot.slane %v1296_v29, %v6272_v48 }
0x172c   :  { %560 = vrot.lane.b32.xlu1 %v555_v52, %s6028_s6 }
0x1730   :  { %858 = vrot.lane.b32.xlu1 %v853_v56, %s6028_s6 }
0x1734   :  { %1156 = vrot.lane.b32.xlu1 %v1151_v57, %s6028_s6 }
0x1738   :  { %263 = vrot.lane.b32.xlu1 %v260_v59, %s6028_s6  ;;  %v6365_v59 = vld [vmem:[#allocation13 + $0x18] sm:$0xff] }
0x173c   :  { %562 = vrot.lane.b32.xlu1 %v559_v63, %s6028_s6  ;;  %v6377_v63 = vld [vmem:[#allocation13 + $0x8] sm:$0xff] }
0x1740   :  { %860 = vrot.lane.b32.xlu1 %v857_v2, %s6028_s6 }
0x1744   :  { %1158 = vrot.lane.b32.xlu1 %v1155_v4, %s6028_s6 }
0x1796   :  { %v1514_v7 = vpop.permute.xlu1 %1513 }
0x1797   :  { %v6304_v8 = vadd.f32 %v1514_v7, %v1506_v6  ;;  %v6393_v7 = vld [vmem:[%s6939_s7] ss:$0 sm:$0xff] }
0x1799   :  { %5703 = vtanh.f32 %v6304_v8 }
0x179a   :  { %v262_v9 = vpop.permute.xlu1 %261 }
0x179b   :  { %268 = vst.msk [vmem:[#allocation2] sm:$0x1] %vm267_vm3, %v262_v9 }
0x179e   :  { %v561_v10 = vpop.permute.xlu1 %560 }
0x179f   :  { %566 = vst.msk [vmem:[#allocation2 + $0x2] sm:$0x1] %vm267_vm3, %v561_v10 }
0x17a2   :  { %v859_v12 = vpop.permute.xlu1 %858 }
0x17a3   :  { %864 = vst.msk [vmem:[#allocation2 + $0x4] sm:$0x1] %vm267_vm3, %v859_v12 }
0x17a6   :  { %v5704_v15 = vpop.eup %5703  ;;  %v1157_v17 = vpop.permute.xlu1 %1156 }
0x17a7   :  { %1162 = vst.msk [vmem:[#allocation2 + $0x6] sm:$0x1] %vm267_vm3, %v1157_v17  ;;  %1519 = vrot.lane.b32.xlu0 %v5704_v15, %s6027_s4  ;;  %v5063_v15 = vld [vmem:[%s6937_s5] ss:$0 sm:$0xff] }
0x17aa   :  { %v264_v20 = vpop.permute.xlu1 %263 }
0x17ab   :  { %269 = vst.msk [vmem:[#allocation2 + $0x8] sm:$0x1] %vm267_vm3, %v264_v20  ;;  %411 = vrot.lane.b32.xlu0 %v406_v54, %s6028_s6 }
0x17ae   :  { %v563_v24 = vpop.permute.xlu1 %562 }
0x17af   :  { %567 = vst.msk [vmem:[#allocation2 + $0xa] sm:$0x1] %vm267_vm3, %v563_v24  ;;  %709 = vrot.lane.b32.xlu0 %v704_v22, %s6028_s6  ;;  %v6413_v22 = vld [vmem:[%s6940_s8] ss:$0 sm:$0xff] }
0x17b2   :  { %v861_v27 = vpop.permute.xlu1 %860 }
0x17b3   :  { %865 = vst.msk [vmem:[#allocation2 + $0xc] sm:$0x1] %vm267_vm3, %v861_v27  ;;  %1007 = vrot.lane.b32.xlu0 %v1002_v26, %s6028_s6 }
0x17b6   :  { %v1159_v31 = vpop.permute.xlu1 %1158 }
0x17b7   :  { %1163 = vst.msk [vmem:[#allocation2 + $0xe] sm:$0x1] %vm267_vm3, %v1159_v31  ;;  %1305 = vrot.lane.b32.xlu0 %v1300_v23, %s6028_s6  ;;  %v5072_v23 = vld [vmem:[#allocation3] ss:$0 sm:$0xff] }
0x17bb   :  { %413 = vrot.lane.b32.xlu0 %v410_v34, %s6028_s6 }
0x17bf   :  { %711 = vrot.lane.b32.xlu0 %v708_v45, %s6028_s6 }
0x17c3   :  { %1009 = vrot.lane.b32.xlu0 %v1006_v49, %s6028_s6 }
0x17c7   :  { %1307 = vrot.lane.b32.xlu0 %v1304_v50, %s6028_s6 }
0x1819   :  { %v1520_v51 = vpop.permute.xlu0 %1519 }
0x181a   :  { %v1522_v16 = vmul.f32 %v6265_v43, %v1520_v51 }
0x181c   :  { %1530 = vrot.lane.b32.xlu1 %v1522_v16, %s6028_s6 }
0x181d   :  { %v412_v52 = vpop.permute.xlu0 %411 }
0x181e   :  { %417 = vst.msk [vmem:[#allocation2 + $0x1] sm:$0x1] %vm267_vm3, %v412_v52 }
0x1821   :  { %v710_v53 = vpop.permute.xlu0 %709 }
0x1822   :  { %715 = vst.msk [vmem:[#allocation2 + $0x3] sm:$0x1] %vm267_vm3, %v710_v53 }
0x1825   :  { %v1008_v55 = vpop.permute.xlu0 %1007 }
0x1826   :  { %1013 = vst.msk [vmem:[#allocation2 + $0x5] sm:$0x1] %vm267_vm3, %v1008_v55 }
0x1829   :  { %v1306_v56 = vpop.permute.xlu0 %1305 }
0x182a   :  { %1311 = vst.msk [vmem:[#allocation2 + $0x7] sm:$0x1] %vm267_vm3, %v1306_v56 }
0x182d   :  { %v414_v5 = vpop.permute.xlu0 %413 }
0x182e   :  { %418 = vst.msk [vmem:[#allocation2 + $0x9] sm:$0x1] %vm267_vm3, %v414_v5 }
0x1831   :  { %v712_v57 = vpop.permute.xlu0 %711  ;;  %v6356_v58 = vld [vmem:[#allocation2] sm:$0xff] }
0x1832   :  { %716 = vst.msk [vmem:[#allocation2 + $0xb] sm:$0x1] %vm267_vm3, %v712_v57  ;;  %5365 = vmatprep.mubr.msk.f32.mxu0 %vm132_vm2, %v6356_v58  ;;  %5391 = vmatpush3.msra.mxu1 %v6356_v58 }
0x1833   :  { %5395 = vmatprep.subr.mxu1 %v6025_v1 }
0x1835   :  { %v1010_v43 = vpop.permute.xlu0 %1009 }
0x1836   :  { %1014 = vst.msk [vmem:[#allocation2 + $0xd] sm:$0x1] %vm267_vm3, %v1010_v43 }
0x1839   :  { %v1308_v60 = vpop.permute.xlu0 %1307 }
0x183a   :  { %1312 = vst.msk [vmem:[#allocation2 + $0xf] sm:$0x1] %vm267_vm3, %v1308_v60 }
0x1841   :  { %v6367_v61 = vld [vmem:[#allocation2 + $0x8] sm:$0xff] }
0x1842   :  { %5366 = vmatmul.mubr.msk.f32.vlgmr.msra.gmra.mxu0 %vm132_vm2, %v6367_v61 }
0x1843   :  { %5380 = vmatpush3.msra.mxu0 %v6365_v59  ;;  %5387 = vmatprep.mubr.msk.f32.mxu0 %vm6026_vm0, %v6025_v1 }
0x1844   :  { %5381 = vmatprep.subr.mxu0 %v6025_v1 }
0x1845   :  { %5382 = vmatpush3.msra.mxu0 %v6371_v62 }
0x1846   :  { %5383 = vmatprep.subr.mxu0 %v6025_v1 }
0x1847   :  { %5384 = vmatpush3.msra.mxu0 %v6377_v63 }
0x1848   :  { %5385 = vmatprep.subr.mxu0 %v6025_v1 }
0x1849   :  { %5386 = vmatpush3.msra.mxu0 %v6381_v0 }
0x184a   :  { %5400 = vmatprep.subr.mxu0 %v6025_v1 }
0x188e   :  { %v1531_v2 = vpop.permute.xlu1 %1530 }
0x188f   :  { %5388 = vmatmul.mubr.msk.f32.vlgmr.msra.gmra.mxu0 %vm132_vm2, %v1531_v2 }
0x1890   :  { %5408 = vmatprep.mubr.msk.f32.mxu0 %vm6026_vm0, %v6025_v1 }
0x1902   :  { %v5367_v4 = vpop.f32.mrf.mxu0 }
0x1903   :  { %v6405_v54 = vadd.f32 %v5367_v4, %v5063_v15 }
0x1904   :  { %v1398_v6 = vpop.f32.mrf.mxu0 }
0x1905   :  { %v6401_v17 = vadd.f32 %v5063_v15, %v1398_v6 }
0x194f   :  { %v1600_v9 = vpop.f32.mrf.mxu0 }
0x1950   :  { %v1601_v10 = vadd.f32 %v6393_v7, %v1600_v9 }
0x1951   :  { %v5389_v11 = vpop.f32.mrf.mxu0 }
0x1952   :  { %v1611_v12 = vrot.slane %v1601_v10, %v6261_v40 }
0x1954   :  { %v1612_v13 = vcombine.high %v1611_v12, %v1611_v12  ;;  %v1619_v14 = vrot.slane %v1611_v12, %v6261_v40 }
0x1956   :  { %v1626_v18 = vrot.slane %v1612_v13, %v6261_v40  ;;  %v1630_v19 = vrot.slane %v1619_v14, %v6272_v48 }
0x1958   :  { %v1634_v20 = vrot.slane %v1626_v18, %v6272_v48  ;;  %v1637_v42 = vadd.f32 %v1630_v19, %v6401_v17  ;;  %v1907_v18 = vld [vmem:[#allocation9 + $0x38] sm:$0xff]  ;;  %v1906_v19 = vld [vmem:[#allocation9 + $0x30] sm:$0xff] }
0x1959   :  { %5401 = vmatpush3.msra.mxu0 %v1907_v18 }
0x195a   :  { %v1638_v21 = vadd.f32 %v1634_v20, %v6405_v54  ;;  %5705 = vtanh.f32 %v1637_v42  ;;  %5402 = vmatprep.subr.mxu0 %v6025_v1  ;;  %v1905_v20 = vld [vmem:[#allocation9 + $0x28] sm:$0xff]  ;;  %v1904_v42 = vld [vmem:[#allocation9 + $0x20] sm:$0xff] }
0x195b   :  { %5403 = vmatpush3.msra.mxu0 %v1906_v19 }
0x195c   :  { %5707 = vtanh.f32 %v1638_v21  ;;  %5404 = vmatprep.subr.mxu0 %v6025_v1 }
0x195d   :  { %5405 = vmatpush3.msra.mxu0 %v1905_v20 }
0x195e   :  { %5406 = vmatprep.subr.mxu0 %v6025_v1 }
0x195f   :  { %5407 = vmatpush3.msra.mxu0 %v1904_v42 }
0x1960   :  { %5422 = vmatprep.subr.mxu0 %v6025_v1 }
0x1967   :  { %v5706_v24 = vpop.eup %5705 }
0x1968   :  { %v1647_v32 = vmul.f32 %v5706_v24, %v6413_v22 }
0x1969   :  { %v5708_v25 = vpop.eup %5707 }
0x196a   :  { %v1649_v26 = vsel %vm132_vm2, %v1647_v32, 0.0  ;;  %v1648_v27 = vmul.f32 %v5708_v25, %v6413_v22 }
0x196b   :  { %1650 = vadd.xlane.f32.xlu0 %v1649_v26 }
0x196c   :  { %v1652_v28 = vsel %vm132_vm2, %v1648_v27, 0.0 }
0x196d   :  { %1653 = vadd.xlane.f32.xlu1 %v1652_v28  ;;  %v5075_v28 = vld [vmem:[#allocation10 + $0x1] ss:$0 sm:$0xff] }
0x1981   :  { %1661 = vperm.xlu0 %5631, %v5072_v23  }
0x19f4   :  { %v1651_v31 = vpop.xlane.xlu0 %1650 }
0x19f6   :  { %v1654_v34 = vpop.xlane.xlu1 %1653 }
0x19fc   :  { %v6423_v35 = vpop.permute.xlu0 %1661 }
0x19fd   :  { %v1664_v36 = vadd.f32 %v6423_v35, %v1651_v31  ;;  %v1665_v38 = vadd.f32 %v6423_v35, %v1654_v34 }
0x19ff   :  { %v1673_v41 = vrot.slane %v1664_v36, %v6421_v33  ;;  %v1677_v44 = vrot.slane %v1665_v38, %v6421_v33 }
0x1a01   :  { %v1678_v45 = vsel %vm129_vm1, %v1677_v44, %v1673_v41 }
0x1a02   :  { %v1681_v37 = vsel %vm1680_vm4, %v1678_v45, -inf }
0x1a03   :  { %1682 = vmax.xlane.f32.xlu1 %v1681_v37 }
0x1a8c   :  { %v1683_v47 = vpop.xlane.xlu1 %1682 }
0x1a8d   :  { %v1688_v49 = vrot.slane %v1683_v47, %v6272_v48  ;;  %v1692_v29 = vrot.slane %v1683_v47, %v6432_v46 }
0x1a8f   :  { %v1695_v50 = vsub.f32 %v1664_v36, %v1688_v49  ;;  %v1696_v51 = vsub.f32 %v1665_v38, %v1692_v29 }
0x1a91   :  { %v1697_v16 = vmul.f32 1.442695, %v1695_v50  ;;  %v1699_v52 = vmul.f32 1.442695, %v1696_v51 }
0x1a93   :  { %5709 = vpow2.f32 %v1697_v16 }
0x1a94   :  { %5711 = vpow2.f32 %v1699_v52 }
0x1aa0   :  { %v5710_v53 = vpop.eup %5709 }
0x1aa1   :  { %1704 = vperm.xlu1 %5632, %v5710_v53   ;;  %v5712_v55 = vpop.eup %5711 }
0x1aa5   :  { %1707 = vperm.xlu1 %5632, %v5712_v55  }
0x1b1c   :  { %v1705_v56 = vpop.permute.xlu1 %1704 }
0x1b1d   :  { %v1712_v39 = vrot.slane %v1705_v56, %v6421_v33 }
0x1b20   :  { %v1708_v5 = vpop.permute.xlu1 %1707 }
0x1b21   :  { %v1716_v57 = vrot.slane %v1708_v5, %v6421_v33 }
0x1b23   :  { %v1717_v43 = vsel %vm129_vm1, %v1716_v57, %v1712_v39 }
0x1b24   :  { %v1719_v60 = vsel %vm1680_vm4, %v1717_v43, 0.0 }
0x1b25   :  { %1720 = vadd.xlane.f32.xlu1 %v1719_v60 }
0x1bae   :  { %v1721_v2 = vpop.xlane.xlu1 %1720 }
0x1baf   :  { %v1726_v3 = vrot.slane %v1721_v2, %v6272_v48  ;;  %v1730_v4 = vrot.slane %v1721_v2, %v6432_v46 }
0x1bb1   :  { %5713 = vrcp.f32 %v1726_v3 }
0x1bb2   :  { %5715 = vrcp.f32 %v1730_v4 }
0x1bbe   :  { %v5714_v6 = vpop.eup %5713 }
0x1bbf   :  { %v1734_v9 = vmul.f32 %v5714_v6, %v5710_v53  ;;  %v5716_v10 = vpop.eup %5715 }
0x1bc0   :  { %v1736_v11 = vmul.f32 %v5716_v10, %v5712_v55 }
0x1bc1   :  { %1740 = vperm.xlu0 %5631, %v1734_v9  }
0x1bc5   :  { %1743 = vperm.xlu0 %5631, %v1736_v11  }
0x1c3c   :  { %v1741_v12 = vpop.permute.xlu0 %1740 }
0x1c3d   :  { %v1748_v13 = vrot.slane %v1741_v12, %v6421_v33 }
0x1c3f   :  { %1756 = vst.msk [vmem:[#allocation15] sm:$0x1] %vm1755_vm5, %v1748_v13  ;;  %5393 = vmatmul.mubr.msk.f32.vlgmr.msra.gmra.mxu1 %vm1758_vm6, %v1748_v13 }
0x1c40   :  { %5396 = vmatpush3.msra.mxu1 %v6367_v61  ;;  %v1744_v14 = vpop.permute.xlu0 %1743  ;;  %5397 = vmatprep.mubr.msk.f32.mxu1 %vm6026_vm0, %v6025_v1 }
0x1c41   :  { %v1752_v15 = vrot.slane %v1744_v14, %v6421_v33  ;;  %5411 = vmatprep.subr.mxu1 %v6025_v1 }
0x1c43   :  { %1757 = vst.msk [vmem:[#allocation15 + $0x8] sm:$0x1] %vm1755_vm5, %v1752_v15  ;;  %5398 = vmatmul.mubr.msk.f32.vlgmr.msra.gmra.mxu1 %vm1758_vm6, %v1752_v15 }
0x1c44   :  { %5412 = vmatpush3.msra.mxu1 %v6365_v59  ;;  %5419 = vmatprep.mubr.msk.f32.mxu1 %vm6026_vm0, %v6025_v1 }
0x1c45   :  { %5413 = vmatprep.subr.mxu1 %v6025_v1 }
0x1c46   :  { %5414 = vmatpush3.msra.mxu1 %v6371_v62 }
0x1c47   :  { %5415 = vmatprep.subr.mxu1 %v6025_v1 }
0x1c48   :  { %5416 = vmatpush3.msra.mxu1 %v6377_v63 }
0x1c49   :  { %5417 = vmatprep.subr.mxu1 %v6025_v1 }
0x1c4a   :  { %5418 = vmatpush3.msra.mxu1 %v6381_v0 }
0x1c4b   :  { %5427 = vmatprep.subr.mxu1 %v6025_v1 }
0x1cff   :  { %v1827_v21 = vpop.f32.mrf.mxu1 }
0x1d01   :  { %v5394_v24 = vpop.f32.mrf.mxu1 }
0x1d03   :  { %v1899_v32 = vpop.f32.mrf.mxu1 }
0x1d04   :  { %v1918_v25 = vrot.slane %v1899_v32, 7 }
0x1d05   :  { %v5399_v26 = vpop.f32.mrf.mxu1 }
0x1d06   :  { %v1919_v27 = vsel %vm129_vm1, %v1918_v25, %v1827_v21 }
0x1d07   :  { %5409 = vmatmul.mubr.msk.f32.vlgmr.msra.gmra.mxu0 %vm132_vm2, %v1919_v27 }
0x1d08   :  { %5423 = vmatpush3.msra.mxu0 %v6356_v58  ;;  %5424 = vmatprep.mubr.msk.f32.mxu0 %vm6026_vm0, %v6025_v1 }
0x1d09   :  { %5432 = vmatprep.subr.mxu0 %v6025_v1 }
0x1dc7   :  { %v1988_v23 = vpop.f32.mrf.mxu0 }
0x1dc8   :  { %v1989_v30 = vadd.f32 %v5075_v28, %v1988_v23 }
0x1dc9   :  { %v5410_v31 = vpop.f32.mrf.mxu0 }
0x1dca   :  { %5717 = vtanh.f32 %v1989_v30  ;;  %v5077_v36 = vmul.f32 -1.442695, %v1989_v30 }
0x1dcc   :  { %5719 = vpow2.f32 %v5077_v36 }
0x1dd7   :  { %v5718_v34 = vpop.eup %5717 }
0x1dd8   :  { %2001 = vrot.lane.b32.xlu0 %v5718_v34, %s6027_s4 }
0x1dd9   :  { %v5720_v38 = vpop.eup %5719 }
0x1dda   :  { %v1995_v41 = vadd.f32 1.0, %v5720_v38 }
0x1ddc   :  { %5721 = vrcp.f32 %v1995_v41 }
0x1de9   :  { %v5722_v44 = vpop.eup %5721 }
0x1dea   :  { %v1999_v47 = vmul.f32 %v5722_v44, %v6304_v8 }
0x1e4a   :  { %v2002_v45 = vpop.permute.xlu0 %2001 }
0x1e4b   :  { %v2004_v37 = vmul.f32 %v5722_v44, %v2002_v45 }
0x1e4d   :  { %2006 = vrot.lane.b32.xlu0 %v2004_v37, %s6027_s4 }
0x1ebf   :  { %v2007_v49 = vpop.permute.xlu0 %2006 }
0x1ec0   :  { %v6475_v29 = vadd.f32 %v2007_v49, %v1999_v47 }
0x1ec2   :  { %5723 = vtanh.f32 %v6475_v29 }
0x1ecf   :  { %v5724_v50 = vpop.eup %5723 }
0x1ed0   :  { %2012 = vrot.lane.b32.xlu0 %v5724_v50, %s6027_s4 }
0x1f42   :  { %v2013_v51 = vpop.permute.xlu0 %2012 }
0x1f43   :  { %v2015_v16 = vmul.f32 %v5722_v44, %v2013_v51 }
0x1f45   :  { %2017 = vrot.lane.b32.xlu0 %v2015_v16, %s6028_s6 }
0x1fb7   :  { %v2018_v52 = vpop.permute.xlu0 %2017 }
0x1fb8   :  { %5420 = vmatmul.mubr.msk.f32.vlgmr.msra.gmra.mxu1 %vm132_vm2, %v2018_v52 }
0x1fb9   :  { %5428 = vmatpush3.msra.mxu1 %v6367_v61  ;;  %5429 = vmatprep.mubr.msk.f32.mxu1 %vm6026_vm0, %v6025_v1 }
0x1fba   :  { %5443 = vmatprep.subr.mxu1 %v6025_v1 }
0x2078   :  { %v2087_v8 = vpop.f32.mrf.mxu1 }
0x2079   :  { %v2088_v53 = vadd.f32 %v6393_v7, %v2087_v8 }
0x207a   :  { %v5421_v55 = vpop.f32.mrf.mxu1 }
0x207b   :  { %v2098_v56 = vrot.slane %v2088_v53, %v6261_v40 }
0x207d   :  { %v2099_v5 = vcombine.high %v2098_v56, %v2098_v56  ;;  %v2106_v39 = vrot.slane %v2098_v56, %v6261_v40 }
0x207f   :  { %v2113_v57 = vrot.slane %v2099_v5, %v6261_v40  ;;  %v2117_v43 = vrot.slane %v2106_v39, %v6272_v48  ;;  %v2374_v5 = vld [vmem:[#allocation9 + $0x58] sm:$0xff]  ;;  %v2373_v39 = vld [vmem:[#allocation9 + $0x50] sm:$0xff] }
0x2081   :  { %v2121_v60 = vrot.slane %v2113_v57, %v6272_v48  ;;  %v2124_v2 = vadd.f32 %v2117_v43, %v6401_v17  ;;  %v2372_v57 = vld [vmem:[#allocation9 + $0x48] sm:$0xff]  ;;  %v2371_v43 = vld [vmem:[#allocation9 + $0x40] sm:$0xff] }
0x2083   :  { %v2125_v3 = vadd.f32 %v2121_v60, %v6405_v54  ;;  %5725 = vtanh.f32 %v2124_v2 }
0x2085   :  { %5727 = vtanh.f32 %v2125_v3 }
0x2090   :  { %v5726_v4 = vpop.eup %5725 }
0x2091   :  { %v2128_v6 = vmul.f32 %v5726_v4, %v6413_v22 }
0x2092   :  { %v5728_v9 = vpop.eup %5727 }
0x2093   :  { %v2130_v10 = vsel %vm132_vm2, %v2128_v6, 0.0  ;;  %v2129_v11 = vmul.f32 %v5728_v9, %v6413_v22 }
0x2094   :  { %2131 = vadd.xlane.f32.xlu1 %v2130_v10  ;;  %v5081_v10 = vld [vmem:[#allocation10 + $0x2] ss:$0 sm:$0xff] }
0x2095   :  { %v2133_v12 = vsel %vm132_vm2, %v2129_v11, 0.0 }
0x2096   :  { %2134 = vadd.xlane.f32.xlu0 %v2133_v12 }
0x211d   :  { %v2132_v13 = vpop.xlane.xlu1 %2131 }
0x211e   :  { %v2136_v14 = vadd.f32 %v2132_v13, %v6423_v35 }
0x211f   :  { %v2135_v15 = vpop.xlane.xlu0 %2134 }
0x2120   :  { %v2137_v18 = vadd.f32 %v2135_v15, %v6423_v35  ;;  %v2143_v19 = vrot.slane %v2136_v14, %v6421_v33 }
0x2122   :  { %v2147_v20 = vrot.slane %v2137_v18, %v6421_v33 }
0x2124   :  { %v2148_v42 = vsel %vm129_vm1, %v2147_v20, %v2143_v19 }
0x2125   :  { %v2150_v21 = vsel %vm1680_vm4, %v2148_v42, -inf }
0x2126   :  { %2151 = vmax.xlane.f32.xlu1 %v2150_v21 }
0x21af   :  { %v2152_v24 = vpop.xlane.xlu1 %2151 }
0x21b0   :  { %v2157_v32 = vrot.slane %v2152_v24, %v6272_v48  ;;  %v2161_v25 = vrot.slane %v2152_v24, %v6432_v46 }
0x21b2   :  { %v2164_v26 = vsub.f32 %v2136_v14, %v2157_v32  ;;  %v2165_v27 = vsub.f32 %v2137_v18, %v2161_v25 }
0x21b4   :  { %v2166_v28 = vmul.f32 1.442695, %v2164_v26  ;;  %v2168_v23 = vmul.f32 1.442695, %v2165_v27 }
0x21b6   :  { %5729 = vpow2.f32 %v2166_v28 }
0x21b7   :  { %5731 = vpow2.f32 %v2168_v23 }
0x21c3   :  { %v5730_v30 = vpop.eup %5729 }
0x21c4   :  { %2173 = vperm.xlu1 %5632, %v5730_v30   ;;  %v5732_v31 = vpop.eup %5731 }
0x21c8   :  { %2176 = vperm.xlu1 %5632, %v5732_v31  }
0x223f   :  { %v2174_v34 = vpop.permute.xlu1 %2173 }
0x2240   :  { %v2181_v38 = vrot.slane %v2174_v34, %v6421_v33 }
0x2243   :  { %v2177_v36 = vpop.permute.xlu1 %2176 }
0x2244   :  { %v2185_v41 = vrot.slane %v2177_v36, %v6421_v33 }
0x2246   :  { %v2186_v44 = vsel %vm129_vm1, %v2185_v41, %v2181_v38 }
0x2247   :  { %v2188_v45 = vsel %vm1680_vm4, %v2186_v44, 0.0 }
0x2248   :  { %2189 = vadd.xlane.f32.xlu1 %v2188_v45 }
0x22d1   :  { %v2190_v37 = vpop.xlane.xlu1 %2189 }
0x22d2   :  { %v2199_v47 = vrot.slane %v2190_v37, %v6432_v46  ;;  %v2195_v49 = vrot.slane %v2190_v37, %v6272_v48 }
0x22d4   :  { %5733 = vrcp.f32 %v2199_v47 }
0x22d5   :  { %5735 = vrcp.f32 %v2195_v49 }
0x22e1   :  { %v5734_v50 = vpop.eup %5733 }
0x22e2   :  { %v2205_v51 = vmul.f32 %v5734_v50, %v5732_v31  ;;  %v5736_v16 = vpop.eup %5735 }
0x22e3   :  { %v2203_v52 = vmul.f32 %v5736_v16, %v5730_v30 }
0x22e4   :  { %2212 = vperm.xlu0 %5631, %v2205_v51  }
0x22e8   :  { %2209 = vperm.xlu0 %5631, %v2203_v52  }
0x235f   :  { %v2213_v8 = vpop.permute.xlu0 %2212 }
0x2360   :  { %v2221_v53 = vrot.slane %v2213_v8, %v6421_v33 }
0x2362   :  { %2225 = vst.msk [vmem:[#allocation15 + $0x9] sm:$0x1] %vm1755_vm5, %v2221_v53  ;;  %5430 = vmatmul.mubr.msk.f32.vlgmr.msra.gmra.mxu1 %vm1758_vm6, %v2221_v53 }
0x2363   :  { %v2210_v55 = vpop.permute.xlu0 %2209  ;;  %5444 = vmatpush3.msra.mxu1 %v6365_v59  ;;  %5451 = vmatprep.mubr.msk.f32.mxu1 %vm6026_vm0, %v6025_v1 }
0x2364   :  { %v2217_v56 = vrot.slane %v2210_v55, %v6421_v33  ;;  %5445 = vmatprep.subr.mxu1 %v6025_v1 }
0x2365   :  { %5446 = vmatpush3.msra.mxu1 %v6371_v62 }
0x2366   :  { %2224 = vst.msk [vmem:[#allocation15 + $0x1] sm:$0x1] %vm1755_vm5, %v2217_v56  ;;  %5425 = vmatmul.mubr.msk.f32.vlgmr.msra.gmra.mxu0 %vm1758_vm6, %v2217_v56  ;;  %5447 = vmatprep.subr.mxu1 %v6025_v1 }
0x2367   :  { %5433 = vmatpush3.msra.mxu0 %v2374_v5  ;;  %5440 = vmatprep.mubr.msk.f32.mxu0 %vm6026_vm0, %v6025_v1 }
0x2368   :  { %5434 = vmatprep.subr.mxu0 %v6025_v1  ;;  %5448 = vmatpush3.msra.mxu1 %v6377_v63 }
0x2369   :  { %5449 = vmatprep.subr.mxu1 %v6025_v1  ;;  %5435 = vmatpush3.msra.mxu0 %v2373_v39 }
0x236a   :  { %5450 = vmatpush3.msra.mxu1 %v6381_v0  ;;  %5436 = vmatprep.subr.mxu0 %v6025_v1 }
0x236b   :  { %5459 = vmatprep.subr.mxu1 %v6025_v1  ;;  %5437 = vmatpush3.msra.mxu0 %v2372_v57 }
0x236c   :  { %5438 = vmatprep.subr.mxu0 %v6025_v1 }
0x236d   :  { %5439 = vmatpush3.msra.mxu0 %v2371_v43 }
0x236e   :  { %5454 = vmatprep.subr.mxu0 %v6025_v1 }
0x2422   :  { %v2366_v60 = vpop.f32.mrf.mxu1 }
0x2423   :  { %v2385_v3 = vrot.slane %v2366_v60, 7 }
0x2424   :  { %v5431_v2 = vpop.f32.mrf.mxu1 }
0x2426   :  { %v2294_v4 = vpop.f32.mrf.mxu0 }
0x2427   :  { %v2386_v6 = vsel %vm129_vm1, %v2385_v3, %v2294_v4 }
0x2428   :  { %v5426_v9 = vpop.f32.mrf.mxu0  ;;  %5441 = vmatmul.mubr.msk.f32.vlgmr.msra.gmra.mxu0 %vm132_vm2, %v2386_v6 }
0x2429   :  { %5455 = vmatpush3.msra.mxu0 %v6356_v58  ;;  %5456 = vmatprep.mubr.msk.f32.mxu0 %vm6026_vm0, %v6025_v1 }
0x242a   :  { %5464 = vmatprep.subr.mxu0 %v6025_v1 }
0x24e8   :  { %v2455_v11 = vpop.f32.mrf.mxu0 }
0x24e9   :  { %v2456_v12 = vadd.f32 %v5081_v10, %v2455_v11 }
0x24ea   :  { %v5442_v13 = vpop.f32.mrf.mxu0 }
0x24eb   :  { %5737 = vtanh.f32 %v2456_v12  ;;  %v5083_v15 = vmul.f32 -1.442695, %v2456_v12 }
0x24ed   :  { %5739 = vpow2.f32 %v5083_v15 }
0x24f8   :  { %v5738_v14 = vpop.eup %5737 }
0x24f9   :  { %2468 = vrot.lane.b32.xlu0 %v5738_v14, %s6027_s4 }
0x24fa   :  { %v5740_v18 = vpop.eup %5739 }
0x24fb   :  { %v2462_v19 = vadd.f32 1.0, %v5740_v18 }
0x24fd   :  { %5741 = vrcp.f32 %v2462_v19 }
0x250a   :  { %v5742_v20 = vpop.eup %5741 }
0x250b   :  { %v2466_v24 = vmul.f32 %v5742_v20, %v6475_v29 }
0x256b   :  { %v2469_v42 = vpop.permute.xlu0 %2468 }
0x256c   :  { %v2471_v21 = vmul.f32 %v5742_v20, %v2469_v42 }
0x256e   :  { %2473 = vrot.lane.b32.xlu0 %v2471_v21, %s6027_s4 }
0x25e0   :  { %v2474_v32 = vpop.permute.xlu0 %2473 }
0x25e1   :  { %v6542_v25 = vadd.f32 %v2474_v32, %v2466_v24 }
0x25e3   :  { %5743 = vtanh.f32 %v6542_v25 }
0x25f0   :  { %v5744_v26 = vpop.eup %5743 }
0x25f1   :  { %2479 = vrot.lane.b32.xlu1 %v5744_v26, %s6027_s4 }
0x2663   :  { %v2480_v27 = vpop.permute.xlu1 %2479 }
0x2664   :  { %v2482_v28 = vmul.f32 %v5742_v20, %v2480_v27 }
0x2666   :  { %2484 = vrot.lane.b32.xlu0 %v2482_v28, %s6028_s6 }
0x26d8   :  { %v2485_v23 = vpop.permute.xlu0 %2484 }
0x26d9   :  { %5452 = vmatmul.mubr.msk.f32.vlgmr.msra.gmra.mxu1 %vm132_vm2, %v2485_v23 }
0x26da   :  { %5460 = vmatpush3.msra.mxu1 %v6367_v61  ;;  %5461 = vmatprep.mubr.msk.f32.mxu1 %vm6026_vm0, %v6025_v1 }
0x26db   :  { %5475 = vmatprep.subr.mxu1 %v6025_v1 }
0x2799   :  { %v2554_v29 = vpop.f32.mrf.mxu1 }
0x279a   :  { %v2555_v30 = vadd.f32 %v6393_v7, %v2554_v29 }
0x279b   :  { %v5453_v31 = vpop.f32.mrf.mxu1 }
0x279c   :  { %v2565_v34 = vrot.slane %v2555_v30, %v6261_v40 }
0x279e   :  { %v2566_v36 = vcombine.high %v2565_v34, %v2565_v34  ;;  %v2573_v38 = vrot.slane %v2565_v34, %v6261_v40 }
0x27a0   :  { %v2580_v41 = vrot.slane %v2566_v36, %v6261_v40  ;;  %v2584_v44 = vrot.slane %v2573_v38, %v6272_v48  ;;  %v2841_v36 = vld [vmem:[#allocation9 + $0x78] sm:$0xff]  ;;  %v2840_v38 = vld [vmem:[#allocation9 + $0x70] sm:$0xff] }
0x27a2   :  { %v2588_v45 = vrot.slane %v2580_v41, %v6272_v48  ;;  %v2591_v37 = vadd.f32 %v2584_v44, %v6401_v17  ;;  %v2839_v41 = vld [vmem:[#allocation9 + $0x68] sm:$0xff]  ;;  %v2838_v44 = vld [vmem:[#allocation9 + $0x60] sm:$0xff] }
0x27a4   :  { %v2592_v47 = vadd.f32 %v2588_v45, %v6405_v54  ;;  %5745 = vtanh.f32 %v2591_v37 }
0x27a6   :  { %5747 = vtanh.f32 %v2592_v47 }
0x27b1   :  { %v5746_v49 = vpop.eup %5745 }
0x27b2   :  { %v2595_v50 = vmul.f32 %v5746_v49, %v6413_v22 }
0x27b3   :  { %v5748_v51 = vpop.eup %5747 }
0x27b4   :  { %v2597_v16 = vsel %vm132_vm2, %v2595_v50, 0.0  ;;  %v2596_v52 = vmul.f32 %v5748_v51, %v6413_v22 }
0x27b5   :  { %2598 = vadd.xlane.f32.xlu0 %v2597_v16  ;;  %v5087_v16 = vld [vmem:[#allocation10 + $0x3] ss:$0 sm:$0xff] }
0x27b6   :  { %v2600_v8 = vsel %vm132_vm2, %v2596_v52, 0.0 }
0x27b7   :  { %2601 = vadd.xlane.f32.xlu1 %v2600_v8 }
0x283e   :  { %v2599_v53 = vpop.xlane.xlu0 %2598 }
0x283f   :  { %v2603_v55 = vadd.f32 %v2599_v53, %v6423_v35 }
0x2840   :  { %v2602_v56 = vpop.xlane.xlu1 %2601 }
0x2841   :  { %v2604_v5 = vadd.f32 %v2602_v56, %v6423_v35  ;;  %v2610_v39 = vrot.slane %v2603_v55, %v6421_v33 }
0x2843   :  { %v2614_v57 = vrot.slane %v2604_v5, %v6421_v33 }
0x2845   :  { %v2615_v43 = vsel %vm129_vm1, %v2614_v57, %v2610_v39 }
0x2846   :  { %v2617_v60 = vsel %vm1680_vm4, %v2615_v43, -inf }
0x2847   :  { %2618 = vmax.xlane.f32.xlu0 %v2617_v60 }
0x28d0   :  { %v2619_v2 = vpop.xlane.xlu0 %2618 }
0x28d1   :  { %v2624_v3 = vrot.slane %v2619_v2, %v6272_v48  ;;  %v2628_v4 = vrot.slane %v2619_v2, %v6432_v46 }
0x28d3   :  { %v2631_v6 = vsub.f32 %v2603_v55, %v2624_v3  ;;  %v2632_v9 = vsub.f32 %v2604_v5, %v2628_v4 }
0x28d5   :  { %v2633_v10 = vmul.f32 1.442695, %v2631_v6  ;;  %v2635_v11 = vmul.f32 1.442695, %v2632_v9 }
0x28d7   :  { %5749 = vpow2.f32 %v2633_v10 }
0x28d8   :  { %5751 = vpow2.f32 %v2635_v11 }
0x28e4   :  { %v5750_v12 = vpop.eup %5749 }
0x28e5   :  { %v5752_v13 = vpop.eup %5751  ;;  %2640 = vperm.xlu0 %5631, %v5750_v12  }
0x28e6   :  { %2643 = vperm.xlu1 %5632, %v5752_v13  }
0x2960   :  { %v2641_v14 = vpop.permute.xlu0 %2640 }
0x2961   :  { %v2644_v15 = vpop.permute.xlu1 %2643  ;;  %v2648_v18 = vrot.slane %v2641_v14, %v6421_v33 }
0x2962   :  { %v2652_v19 = vrot.slane %v2644_v15, %v6421_v33 }
0x2964   :  { %v2653_v20 = vsel %vm129_vm1, %v2652_v19, %v2648_v18 }
0x2965   :  { %v2655_v42 = vsel %vm1680_vm4, %v2653_v20, 0.0 }
0x2966   :  { %2656 = vadd.xlane.f32.xlu0 %v2655_v42 }
0x29ef   :  { %v2657_v21 = vpop.xlane.xlu0 %2656 }
0x29f0   :  { %v2666_v24 = vrot.slane %v2657_v21, %v6432_v46  ;;  %v2662_v32 = vrot.slane %v2657_v21, %v6272_v48 }
0x29f2   :  { %5753 = vrcp.f32 %v2666_v24 }
0x29f3   :  { %5755 = vrcp.f32 %v2662_v32 }
0x29ff   :  { %v5754_v26 = vpop.eup %5753 }
0x2a00   :  { %v2672_v27 = vmul.f32 %v5754_v26, %v5752_v13  ;;  %v5756_v28 = vpop.eup %5755 }
0x2a01   :  { %v2670_v23 = vmul.f32 %v5756_v28, %v5750_v12 }
0x2a02   :  { %2679 = vperm.xlu1 %5632, %v2672_v27  }
0x2a06   :  { %2676 = vperm.xlu1 %5632, %v2670_v23  }
0x2a7d   :  { %v2680_v29 = vpop.permute.xlu1 %2679 }
0x2a7e   :  { %v2688_v30 = vrot.slane %v2680_v29, %v6421_v33 }
0x2a80   :  { %2692 = vst.msk [vmem:[#allocation15 + $0xa] sm:$0x1] %vm1755_vm5, %v2688_v30  ;;  %5462 = vmatmul.mubr.msk.f32.vlgmr.msra.gmra.mxu1 %vm1758_vm6, %v2688_v30 }
0x2a81   :  { %v2677_v31 = vpop.permute.xlu1 %2676  ;;  %5476 = vmatpush3.msra.mxu1 %v6365_v59  ;;  %5483 = vmatprep.mubr.msk.f32.mxu1 %vm6026_vm0, %v6025_v1 }
0x2a82   :  { %v2684_v34 = vrot.slane %v2677_v31, %v6421_v33  ;;  %5477 = vmatprep.subr.mxu1 %v6025_v1 }
0x2a83   :  { %5478 = vmatpush3.msra.mxu1 %v6371_v62 }
0x2a84   :  { %2691 = vst.msk [vmem:[#allocation15 + $0x2] sm:$0x1] %vm1755_vm5, %v2684_v34  ;;  %5457 = vmatmul.mubr.msk.f32.vlgmr.msra.gmra.mxu0 %vm1758_vm6, %v2684_v34  ;;  %5479 = vmatprep.subr.mxu1 %v6025_v1 }
0x2a85   :  { %5465 = vmatpush3.msra.mxu0 %v2841_v36  ;;  %5472 = vmatprep.mubr.msk.f32.mxu0 %vm6026_vm0, %v6025_v1 }
0x2a86   :  { %5466 = vmatprep.subr.mxu0 %v6025_v1  ;;  %5480 = vmatpush3.msra.mxu1 %v6377_v63 }
0x2a87   :  { %5481 = vmatprep.subr.mxu1 %v6025_v1  ;;  %5467 = vmatpush3.msra.mxu0 %v2840_v38 }
0x2a88   :  { %5482 = vmatpush3.msra.mxu1 %v6381_v0  ;;  %5468 = vmatprep.subr.mxu0 %v6025_v1 }
0x2a89   :  { %5491 = vmatprep.subr.mxu1 %v6025_v1  ;;  %5469 = vmatpush3.msra.mxu0 %v2839_v41 }
0x2a8a   :  { %5470 = vmatprep.subr.mxu0 %v6025_v1 }
0x2a8b   :  { %5471 = vmatpush3.msra.mxu0 %v2838_v44 }
0x2a8c   :  { %5486 = vmatprep.subr.mxu0 %v6025_v1 }
0x2b40   :  { %v2833_v45 = vpop.f32.mrf.mxu1 }
0x2b41   :  { %v2852_v47 = vrot.slane %v2833_v45, 7 }
0x2b42   :  { %v5463_v37 = vpop.f32.mrf.mxu1 }
0x2b44   :  { %v2761_v49 = vpop.f32.mrf.mxu0 }
0x2b45   :  { %v2853_v50 = vsel %vm129_vm1, %v2852_v47, %v2761_v49 }
0x2b46   :  { %v5458_v51 = vpop.f32.mrf.mxu0  ;;  %5473 = vmatmul.mubr.msk.f32.vlgmr.msra.gmra.mxu0 %vm132_vm2, %v2853_v50 }
0x2b47   :  { %5487 = vmatpush3.msra.mxu0 %v6356_v58  ;;  %5488 = vmatprep.mubr.msk.f32.mxu0 %vm6026_vm0, %v6025_v1 }
0x2b48   :  { %5496 = vmatprep.subr.mxu0 %v6025_v1 }
0x2c06   :  { %v2922_v52 = vpop.f32.mrf.mxu0 }
0x2c07   :  { %v2923_v8 = vadd.f32 %v5087_v16, %v2922_v52 }
0x2c08   :  { %v5474_v53 = vpop.f32.mrf.mxu0 }
0x2c09   :  { %5757 = vtanh.f32 %v2923_v8  ;;  %v5089_v56 = vmul.f32 -1.442695, %v2923_v8 }
0x2c0b   :  { %5759 = vpow2.f32 %v5089_v56 }
0x2c16   :  { %v5758_v55 = vpop.eup %5757 }
0x2c17   :  { %2935 = vrot.lane.b32.xlu1 %v5758_v55, %s6027_s4 }
0x2c18   :  { %v5760_v5 = vpop.eup %5759 }
0x2c19   :  { %v2929_v39 = vadd.f32 1.0, %v5760_v5 }
0x2c1b   :  { %5761 = vrcp.f32 %v2929_v39 }
0x2c28   :  { %v5762_v57 = vpop.eup %5761 }
0x2c29   :  { %v2933_v60 = vmul.f32 %v5762_v57, %v6542_v25 }
0x2c89   :  { %v2936_v58 = vpop.permute.xlu1 %2935 }
0x2c8a   :  { %v2938_v43 = vmul.f32 %v5762_v57, %v2936_v58 }
0x2c8c   :  { %2940 = vrot.lane.b32.xlu1 %v2938_v43, %s6027_s4 }
0x2cfe   :  { %v2941_v2 = vpop.permute.xlu1 %2940 }
0x2cff   :  { %v6609_v3 = vadd.f32 %v2941_v2, %v2933_v60 }
0x2d01   :  { %5763 = vtanh.f32 %v6609_v3 }
0x2d0e   :  { %v5764_v4 = vpop.eup %5763 }
0x2d0f   :  { %2946 = vrot.lane.b32.xlu1 %v5764_v4, %s6027_s4 }
0x2d81   :  { %v2947_v6 = vpop.permute.xlu1 %2946 }
0x2d82   :  { %v2949_v9 = vmul.f32 %v5762_v57, %v2947_v6 }
0x2d84   :  { %2951 = vrot.lane.b32.xlu1 %v2949_v9, %s6028_s6 }
0x2df6   :  { %v2952_v10 = vpop.permute.xlu1 %2951 }
0x2df7   :  { %5484 = vmatmul.mubr.msk.f32.vlgmr.msra.gmra.mxu1 %vm132_vm2, %v2952_v10 }
0x2df8   :  { %5492 = vmatpush3.msra.mxu1 %v6367_v61  ;;  %5493 = vmatprep.mubr.msk.f32.mxu1 %vm6026_vm0, %v6025_v1 }
0x2df9   :  { %5507 = vmatprep.subr.mxu1 %v6025_v1 }
0x2eb7   :  { %v3021_v25 = vpop.f32.mrf.mxu1 }
0x2eb8   :  { %v3022_v11 = vadd.f32 %v6393_v7, %v3021_v25  ;;  %v3308_v25 = vld [vmem:[#allocation9 + $0x98] sm:$0xff] }
0x2eb9   :  { %v5485_v12 = vpop.f32.mrf.mxu1 }
0x2eba   :  { %v3032_v13 = vrot.slane %v3022_v11, %v6261_v40  ;;  %v3305_v11 = vld [vmem:[#allocation9 + $0x80] sm:$0xff] }
0x2ebc   :  { %v3033_v14 = vcombine.high %v3032_v13, %v3032_v13  ;;  %v3040_v15 = vrot.slane %v3032_v13, %v6261_v40 }
0x2ebe   :  { %v3047_v18 = vrot.slane %v3033_v14, %v6261_v40  ;;  %v3051_v19 = vrot.slane %v3040_v15, %v6272_v48 }
0x2ec0   :  { %v3055_v61 = vrot.slane %v3047_v18, %v6272_v48  ;;  %v3058_v20 = vadd.f32 %v3051_v19, %v6401_v17  ;;  %v6669_v18 = vld [vmem:[#allocation2] sm:$0xff] }
0x2ec1   :  { %v5093_v19 = vld [vmem:[#allocation10 + $0x4] ss:$0 sm:$0xff] }
0x2ec2   :  { %v3059_v42 = vadd.f32 %v3055_v61, %v6405_v54  ;;  %5765 = vtanh.f32 %v3058_v20 }
0x2ec4   :  { %5767 = vtanh.f32 %v3059_v42 }
0x2ecf   :  { %v5766_v21 = vpop.eup %5765 }
0x2ed0   :  { %v3062_v7 = vmul.f32 %v5766_v21, %v6413_v22 }
0x2ed1   :  { %v5768_v24 = vpop.eup %5767 }
0x2ed2   :  { %v3064_v32 = vsel %vm132_vm2, %v3062_v7, 0.0  ;;  %v3063_v26 = vmul.f32 %v5768_v24, %v6413_v22 }
0x2ed3   :  { %3065 = vadd.xlane.f32.xlu0 %v3064_v32 }
0x2ed4   :  { %v3067_v27 = vsel %vm132_vm2, %v3063_v26, 0.0 }
0x2ed5   :  { %3068 = vadd.xlane.f32.xlu1 %v3067_v27 }
0x2f5c   :  { %v3066_v28 = vpop.xlane.xlu0 %3065 }
0x2f5d   :  { %v3070_v23 = vadd.f32 %v3066_v28, %v6423_v35 }
0x2f5e   :  { %v3069_v29 = vpop.xlane.xlu1 %3068 }
0x2f5f   :  { %v3071_v30 = vadd.f32 %v3069_v29, %v6423_v35  ;;  %v3077_v31 = vrot.slane %v3070_v23, %v6421_v33 }
0x2f61   :  { %v3081_v34 = vrot.slane %v3071_v30, %v6421_v33 }
0x2f63   :  { %v3082_v36 = vsel %vm129_vm1, %v3081_v34, %v3077_v31 }
0x2f64   :  { %v3084_v38 = vsel %vm1680_vm4, %v3082_v36, -inf }
0x2f65   :  { %3085 = vmax.xlane.f32.xlu0 %v3084_v38 }
0x2fee   :  { %v3086_v22 = vpop.xlane.xlu0 %3085 }
0x2fef   :  { %v3091_v41 = vrot.slane %v3086_v22, %v6272_v48  ;;  %v3095_v44 = vrot.slane %v3086_v22, %v6432_v46  ;;  %v6684_v22 = vld [vmem:[#allocation2 + $0x8] sm:$0xff] }
0x2ff1   :  { %v3098_v45 = vsub.f32 %v3070_v23, %v3091_v41  ;;  %v3099_v37 = vsub.f32 %v3071_v30, %v3095_v44  ;;  %v6693_v41 = vld [vmem:[%s6939_s7] ss:$0 sm:$0xff] }
0x2ff3   :  { %v3100_v47 = vmul.f32 1.442695, %v3098_v45  ;;  %v3102_v49 = vmul.f32 1.442695, %v3099_v37 }
0x2ff5   :  { %5769 = vpow2.f32 %v3100_v47 }
0x2ff6   :  { %5771 = vpow2.f32 %v3102_v49 }
0x3002   :  { %v5770_v50 = vpop.eup %5769 }
0x3003   :  { %3107 = vperm.xlu0 %5631, %v5770_v50   ;;  %v5772_v51 = vpop.eup %5771 }
0x3007   :  { %3110 = vperm.xlu0 %5631, %v5772_v51  }
0x307e   :  { %v3108_v16 = vpop.permute.xlu0 %3107 }
0x307f   :  { %v3115_v8 = vrot.slane %v3108_v16, %v6421_v33 }
0x3082   :  { %v3111_v52 = vpop.permute.xlu0 %3110 }
0x3083   :  { %v3119_v53 = vrot.slane %v3111_v52, %v6421_v33 }
0x3085   :  { %v3120_v55 = vsel %vm129_vm1, %v3119_v53, %v3115_v8 }
0x3086   :  { %v3122_v56 = vsel %vm1680_vm4, %v3120_v55, 0.0  ;;  %v6706_v55 = vld [vmem:[%s6940_s8] ss:$0 sm:$0xff]  ;;  %s6031_s8 = smov [#allocation15]  }
0x3087   :  { %3123 = vadd.xlane.f32.xlu0 %v3122_v56  ;;  %s5033_s12 = sshll.u32 %s6031_s8, 4  ;;  %s5034_s12 = int_to_ptr.vmem [resolvable:$true] %s5033_s12 }
0x3088   :  { %s5985_s13 = scalar_lea.vmem %s5034_s12, 256  ;;  %p5990_p3 = scmp.lt.s32.totalorder %s5034_s12, %s5034_s12 }
0x3089   :  { %p5986_p2 = scmp.ne.s32.totalorder %s5034_s12, %s5985_s13  ;;  %p5991_p4 = scmp.lt.s32.totalorder %s5985_s13, %s5985_s13 }
0x308b   :  { %p5992_p5 = por %p5991_p4, %p5990_p3 }
0x308d   :  { %p5993_p6 = pnand %p5992_p5, %p5986_p2 }
0x3110   :  { %v3124_v5 = vpop.xlane.xlu0 %3123 }
0x3111   :  { %v3133_v39 = vrot.slane %v3124_v5, %v6432_v46  ;;  %v3129_v57 = vrot.slane %v3124_v5, %v6272_v48 }
0x3113   :  { %5773 = vrcp.f32 %v3133_v39 }
0x3114   :  { %5775 = vrcp.f32 %v3129_v57 }
0x3120   :  { %v5774_v58 = vpop.eup %5773 }
0x3121   :  { %v3139_v43 = vmul.f32 %v5774_v58, %v5772_v51  ;;  %v5776_v60 = vpop.eup %5775 }
0x3122   :  { %v3137_v2 = vmul.f32 %v5776_v60, %v5770_v50 }
0x3123   :  { %3146 = vperm.xlu1 %5632, %v3139_v43  }
0x3127   :  { %3143 = vperm.xlu1 %5632, %v3137_v2  }
0x319e   :  { %v3147_v4 = vpop.permute.xlu1 %3146 }
0x319f   :  { %v3155_v6 = vrot.slane %v3147_v4, %v6421_v33 }
0x31a1   :  { %3159 = vst.msk [vmem:[#allocation15 + $0xb] sm:$0x1] %vm1755_vm5, %v3155_v6  ;;  %5494 = vmatmul.mubr.msk.f32.vlgmr.msra.gmra.mxu1 %vm1758_vm6, %v3155_v6 }
0x31a2   :  { %v3144_v9 = vpop.permute.xlu1 %3143  ;;  %5508 = vmatpush3.msra.mxu1 %v6365_v59  ;;  %5515 = vmatprep.mubr.msk.f32.mxu1 %vm6026_vm0, %v6025_v1  ;;  %v3307_v59 = vld [vmem:[#allocation9 + $0x90] sm:$0xff] }
0x31a3   :  { %v3151_v10 = vrot.slane %v3144_v9, %v6421_v33  ;;  %5509 = vmatprep.subr.mxu1 %v6025_v1 }
0x31a4   :  { %5510 = vmatpush3.msra.mxu1 %v6371_v62  ;;  %v3306_v62 = vld [vmem:[#allocation9 + $0x88] sm:$0xff] }
0x31a5   :  { %3158 = vst.msk [vmem:[#allocation15 + $0x3] sm:$0x1] %vm1755_vm5, %v3151_v10  ;;  %5489 = vmatmul.mubr.msk.f32.vlgmr.msra.gmra.mxu0 %vm1758_vm6, %v3151_v10  ;;  %5511 = vmatprep.subr.mxu1 %v6025_v1 }
0x31a6   :  { %5497 = vmatpush3.msra.mxu0 %v3308_v25  ;;  %5504 = vmatprep.mubr.msk.f32.mxu0 %vm6026_vm0, %v6025_v1 }
0x31a7   :  { %5498 = vmatprep.subr.mxu0 %v6025_v1  ;;  %5512 = vmatpush3.msra.mxu1 %v6377_v63 }
0x31a8   :  { %5513 = vmatprep.subr.mxu1 %v6025_v1  ;;  %5499 = vmatpush3.msra.mxu0 %v3307_v59 }
0x31a9   :  { %5514 = vmatpush3.msra.mxu1 %v6381_v0  ;;  %5500 = vmatprep.subr.mxu0 %v6025_v1 }
0x31aa   :  { %5523 = vmatprep.subr.mxu1 %v6025_v1  ;;  %5501 = vmatpush3.msra.mxu0 %v3306_v62 }
0x31ab   :  { %5502 = vmatprep.subr.mxu0 %v6025_v1 }
0x31ac   :  { %5503 = vmatpush3.msra.mxu0 %v3305_v11 }
0x31ad   :  { %5518 = vmatprep.subr.mxu0 %v6025_v1 }
0x3261   :  { %v3300_v12 = vpop.f32.mrf.mxu1 }
0x3262   :  { %v3319_v13 = vrot.slane %v3300_v12, 7 }
0x3263   :  { %v5495_v63 = vpop.f32.mrf.mxu1 }
0x3265   :  { %v3228_v14 = vpop.f32.mrf.mxu0 }
0x3266   :  { %v3320_v0 = vsel %vm129_vm1, %v3319_v13, %v3228_v14 }
0x3267   :  { %v5490_v15 = vpop.f32.mrf.mxu0  ;;  %5505 = vmatmul.mubr.msk.f32.vlgmr.msra.gmra.mxu0 %vm132_vm2, %v3320_v0 }
0x3268   :  { %5519 = vmatpush3.msra.mxu0 %v6669_v18  ;;  %5520 = vmatprep.mubr.msk.f32.mxu0 %vm6026_vm0, %v6025_v1 }
0x3269   :  { %5528 = vmatprep.subr.mxu0 %v6025_v1 }
0x3327   :  { %v3389_v61 = vpop.f32.mrf.mxu0 }
0x3328   :  { %v3390_v20 = vadd.f32 %v5093_v19, %v3389_v61 }
0x3329   :  { %v5506_v42 = vpop.f32.mrf.mxu0 }
0x332a   :  { %5777 = vtanh.f32 %v3390_v20  ;;  %v5095_v7 = vmul.f32 -1.442695, %v3390_v20 }
0x332c   :  { %5779 = vpow2.f32 %v5095_v7 }
0x3337   :  { %v5778_v21 = vpop.eup %5777 }
0x3338   :  { %3402 = vrot.lane.b32.xlu1 %v5778_v21, %s6027_s4 }
0x3339   :  { %v5780_v24 = vpop.eup %5779 }
0x333a   :  { %v3396_v32 = vadd.f32 1.0, %v5780_v24 }
0x333c   :  { %5781 = vrcp.f32 %v3396_v32 }
0x3349   :  { %v5782_v26 = vpop.eup %5781 }
0x334a   :  { %v3400_v23 = vmul.f32 %v5782_v26, %v6609_v3 }
0x33aa   :  { %v3403_v27 = vpop.permute.xlu1 %3402 }
0x33ab   :  { %v3405_v28 = vmul.f32 %v5782_v26, %v3403_v27 }
0x33ad   :  { %3407 = vrot.lane.b32.xlu1 %v3405_v28, %s6027_s4 }
0x341f   :  { %v3408_v29 = vpop.permute.xlu1 %3407 }
0x3420   :  { %v6678_v30 = vadd.f32 %v3408_v29, %v3400_v23 }
0x3422   :  { %5783 = vtanh.f32 %v6678_v30 }
0x342f   :  { %v5784_v31 = vpop.eup %5783 }
0x3430   :  { %3413 = vrot.lane.b32.xlu0 %v5784_v31, %s6027_s4 }
0x34a2   :  { %v3414_v34 = vpop.permute.xlu0 %3413 }
0x34a3   :  { %v3416_v36 = vmul.f32 %v5782_v26, %v3414_v34 }
0x34a5   :  { %3418 = vrot.lane.b32.xlu1 %v3416_v36, %s6028_s6 }
0x3517   :  { %v3419_v38 = vpop.permute.xlu1 %3418 }
0x3518   :  { %5516 = vmatmul.mubr.msk.f32.vlgmr.msra.gmra.mxu1 %vm132_vm2, %v3419_v38  ;;  %v6729_v38 = vld [vmem:[#allocation13 + $0x18] sm:$0xff] }
0x3519   :  { %5524 = vmatpush3.msra.mxu1 %v6684_v22  ;;  %5525 = vmatprep.mubr.msk.f32.mxu1 %vm6026_vm0, %v6025_v1 }
0x351a   :  { %5539 = vmatprep.subr.mxu1 %v6025_v1 }
0x35d8   :  { %v3488_v3 = vpop.f32.mrf.mxu1 }
0x35d9   :  { %v3489_v44 = vadd.f32 %v6693_v41, %v3488_v3 }
0x35da   :  { %v5517_v45 = vpop.f32.mrf.mxu1 }
0x35db   :  { %v3499_v37 = vrot.slane %v3489_v44, %v6261_v40  ;;  %v3775_v44 = vld [vmem:[#allocation9 + $0xb8] sm:$0xff] }
0x35dc   :  { %v6736_v45 = vld [vmem:[#allocation13 + $0x10] sm:$0xff] }
0x35dd   :  { %v3500_v47 = vcombine.high %v3499_v37, %v3499_v37  ;;  %v3507_v49 = vrot.slane %v3499_v37, %v6261_v40  ;;  %v6745_v37 = vld [vmem:[#allocation13 + $0x8] sm:$0xff] }
0x35df   :  { %v3514_v50 = vrot.slane %v3500_v47, %v6261_v40  ;;  %v3518_v51 = vrot.slane %v3507_v49, %v6272_v48  ;;  %v6749_v47 = vld [vmem:[#allocation13] sm:$0xff]  ;;  %v3774_v49 = vld [vmem:[#allocation9 + $0xb0] sm:$0xff] }
0x35e1   :  { %v3522_v16 = vrot.slane %v3514_v50, %v6272_v48  ;;  %v3525_v52 = vadd.f32 %v3518_v51, %v6401_v17  ;;  %v3773_v50 = vld [vmem:[#allocation9 + $0xa8] sm:$0xff]  ;;  %v3772_v51 = vld [vmem:[#allocation9 + $0xa0] sm:$0xff] }
0x35e3   :  { %v3526_v8 = vadd.f32 %v3522_v16, %v6405_v54  ;;  %5785 = vtanh.f32 %v3525_v52 }
0x35e5   :  { %5787 = vtanh.f32 %v3526_v8 }
0x35f0   :  { %v5786_v53 = vpop.eup %5785 }
0x35f1   :  { %v3529_v56 = vmul.f32 %v6706_v55, %v5786_v53 }
0x35f2   :  { %v5788_v5 = vpop.eup %5787 }
0x35f3   :  { %v3531_v39 = vsel %vm132_vm2, %v3529_v56, 0.0  ;;  %v3530_v57 = vmul.f32 %v6706_v55, %v5788_v5 }
0x35f4   :  { %3532 = vadd.xlane.f32.xlu1 %v3531_v39  ;;  %v5099_v39 = vld [vmem:[#allocation10 + $0x5] ss:$0 sm:$0xff] }
0x35f5   :  { %v3534_v58 = vsel %vm132_vm2, %v3530_v57, 0.0 }
0x35f6   :  { %3535 = vadd.xlane.f32.xlu0 %v3534_v58 }
0x367d   :  { %v3533_v43 = vpop.xlane.xlu1 %3532 }
0x367e   :  { %v3537_v60 = vadd.f32 %v3533_v43, %v6423_v35 }
0x367f   :  { %v3536_v2 = vpop.xlane.xlu0 %3535 }
0x3680   :  { %v3538_v4 = vadd.f32 %v3536_v2, %v6423_v35  ;;  %v3544_v6 = vrot.slane %v3537_v60, %v6421_v33 }
0x3682   :  { %v3548_v9 = vrot.slane %v3538_v4, %v6421_v33 }
0x3684   :  { %v3549_v10 = vsel %vm129_vm1, %v3548_v9, %v3544_v6 }
0x3685   :  { %v3551_v25 = vsel %vm1680_vm4, %v3549_v10, -inf }
0x3686   :  { %3552 = vmax.xlane.f32.xlu1 %v3551_v25 }
0x370f   :  { %v3553_v59 = vpop.xlane.xlu1 %3552 }
0x3710   :  { %v3558_v62 = vrot.slane %v3553_v59, %v6272_v48  ;;  %v3562_v11 = vrot.slane %v3553_v59, %v6432_v46 }
0x3712   :  { %v3565_v12 = vsub.f32 %v3537_v60, %v3558_v62  ;;  %v3566_v63 = vsub.f32 %v3538_v4, %v3562_v11 }
0x3714   :  { %v3567_v13 = vmul.f32 1.442695, %v3565_v12  ;;  %v3569_v14 = vmul.f32 1.442695, %v3566_v63 }
0x3716   :  { %5789 = vpow2.f32 %v3567_v13 }
0x3717   :  { %5791 = vpow2.f32 %v3569_v14 }
0x3723   :  { %v5790_v0 = vpop.eup %5789 }
0x3724   :  { %v5792_v15 = vpop.eup %5791  ;;  %3574 = vperm.xlu1 %5632, %v5790_v0  }
0x3725   :  { %3577 = vperm.xlu0 %5631, %v5792_v15  }
0x379f   :  { %v3575_v19 = vpop.permute.xlu1 %3574 }
0x37a0   :  { %v3578_v61 = vpop.permute.xlu0 %3577  ;;  %v3582_v20 = vrot.slane %v3575_v19, %v6421_v33 }
0x37a1   :  { %v3586_v42 = vrot.slane %v3578_v61, %v6421_v33 }
0x37a3   :  { %v3587_v21 = vsel %vm129_vm1, %v3586_v42, %v3582_v20 }
0x37a4   :  { %v3589_v7 = vsel %vm1680_vm4, %v3587_v21, 0.0 }
0x37a5   :  { %3590 = vadd.xlane.f32.xlu1 %v3589_v7 }
0x382e   :  { %v3591_v24 = vpop.xlane.xlu1 %3590 }
0x382f   :  { %v3600_v32 = vrot.slane %v3591_v24, %v6432_v46  ;;  %v3596_v26 = vrot.slane %v3591_v24, %v6272_v48 }
0x3831   :  { %5793 = vrcp.f32 %v3600_v32 }
0x3832   :  { %5795 = vrcp.f32 %v3596_v26 }
0x383e   :  { %v5794_v27 = vpop.eup %5793 }
0x383f   :  { %v3606_v28 = vmul.f32 %v5794_v27, %v5792_v15  ;;  %v5796_v23 = vpop.eup %5795 }
0x3840   :  { %v3604_v29 = vmul.f32 %v5796_v23, %v5790_v0 }
0x3841   :  { %3613 = vperm.xlu0 %5631, %v3606_v28  }
0x3845   :  { %3610 = vperm.xlu0 %5631, %v3604_v29  }
0x38bc   :  { %v3614_v31 = vpop.permute.xlu0 %3613 }
0x38bd   :  { %v3622_v34 = vrot.slane %v3614_v31, %v6421_v33 }
0x38bf   :  { %3626 = vst.msk [vmem:[#allocation15 + $0xc] sm:$0x1] %vm1755_vm5, %v3622_v34  ;;  %5526 = vmatmul.mubr.msk.f32.vlgmr.msra.gmra.mxu1 %vm1758_vm6, %v3622_v34 }
0x38c0   :  { %v3611_v36 = vpop.permute.xlu0 %3610  ;;  %5540 = vmatpush3.msra.mxu1 %v6729_v38  ;;  %5547 = vmatprep.mubr.msk.f32.mxu1 %vm6026_vm0, %v6025_v1 }
0x38c1   :  { %v3618_v3 = vrot.slane %v3611_v36, %v6421_v33  ;;  %5541 = vmatprep.subr.mxu1 %v6025_v1 }
0x38c2   :  { %5542 = vmatpush3.msra.mxu1 %v6736_v45 }
0x38c3   :  { %3625 = vst.msk [vmem:[#allocation15 + $0x4] sm:$0x1] %vm1755_vm5, %v3618_v3  ;;  %5521 = vmatmul.mubr.msk.f32.vlgmr.msra.gmra.mxu0 %vm1758_vm6, %v3618_v3  ;;  %5543 = vmatprep.subr.mxu1 %v6025_v1 }
0x38c4   :  { %5529 = vmatpush3.msra.mxu0 %v3775_v44  ;;  %5536 = vmatprep.mubr.msk.f32.mxu0 %vm6026_vm0, %v6025_v1 }
0x38c5   :  { %5530 = vmatprep.subr.mxu0 %v6025_v1  ;;  %5544 = vmatpush3.msra.mxu1 %v6745_v37 }
0x38c6   :  { %5545 = vmatprep.subr.mxu1 %v6025_v1  ;;  %5531 = vmatpush3.msra.mxu0 %v3774_v49 }
0x38c7   :  { %5546 = vmatpush3.msra.mxu1 %v6749_v47  ;;  %5532 = vmatprep.subr.mxu0 %v6025_v1 }
0x38c8   :  { %5555 = vmatprep.subr.mxu1 %v6025_v1  ;;  %5533 = vmatpush3.msra.mxu0 %v3773_v50 }
0x38c9   :  { %5534 = vmatprep.subr.mxu0 %v6025_v1 }
0x38ca   :  { %5535 = vmatpush3.msra.mxu0 %v3772_v51 }
0x38cb   :  { %5550 = vmatprep.subr.mxu0 %v6025_v1 }
0x397f   :  { %v3767_v16 = vpop.f32.mrf.mxu1 }
0x3980   :  { %v3786_v8 = vrot.slane %v3767_v16, 7 }
0x3981   :  { %v5527_v52 = vpop.f32.mrf.mxu1 }
0x3983   :  { %v3695_v53 = vpop.f32.mrf.mxu0 }
0x3984   :  { %v3787_v56 = vsel %vm129_vm1, %v3786_v8, %v3695_v53 }
0x3985   :  { %v5522_v5 = vpop.f32.mrf.mxu0  ;;  %5537 = vmatmul.mubr.msk.f32.vlgmr.msra.gmra.mxu0 %vm132_vm2, %v3787_v56 }
0x3986   :  { %5551 = vmatpush3.msra.mxu0 %v6669_v18  ;;  %5552 = vmatprep.mubr.msk.f32.mxu0 %vm6026_vm0, %v6025_v1 }
0x3987   :  { %5560 = vmatprep.subr.mxu0 %v6025_v1 }
0x3a45   :  { %v3856_v57 = vpop.f32.mrf.mxu0 }
0x3a46   :  { %v3857_v58 = vadd.f32 %v5099_v39, %v3856_v57 }
0x3a47   :  { %v5538_v43 = vpop.f32.mrf.mxu0 }
0x3a48   :  { %5797 = vtanh.f32 %v3857_v58  ;;  %v5101_v2 = vmul.f32 -1.442695, %v3857_v58 }
0x3a4a   :  { %5799 = vpow2.f32 %v5101_v2 }
0x3a55   :  { %v5798_v60 = vpop.eup %5797 }
0x3a56   :  { %3869 = vrot.lane.b32.xlu0 %v5798_v60, %s6027_s4 }
0x3a57   :  { %v5800_v4 = vpop.eup %5799 }
0x3a58   :  { %v3863_v6 = vadd.f32 1.0, %v5800_v4 }
0x3a5a   :  { %5801 = vrcp.f32 %v3863_v6 }
0x3a67   :  { %v5802_v9 = vpop.eup %5801 }
0x3a68   :  { %v3867_v59 = vmul.f32 %v5802_v9, %v6678_v30 }
0x3ac8   :  { %v3870_v10 = vpop.permute.xlu0 %3869 }
0x3ac9   :  { %v3872_v25 = vmul.f32 %v5802_v9, %v3870_v10 }
0x3acb   :  { %3874 = vrot.lane.b32.xlu0 %v3872_v25, %s6027_s4 }
0x3b3d   :  { %v3875_v62 = vpop.permute.xlu0 %3874 }
0x3b3e   :  { %v6765_v11 = vadd.f32 %v3875_v62, %v3867_v59 }
0x3b40   :  { %5803 = vtanh.f32 %v6765_v11 }
0x3b4d   :  { %v5804_v12 = vpop.eup %5803 }
0x3b4e   :  { %3880 = vrot.lane.b32.xlu0 %v5804_v12, %s6027_s4 }
0x3bc0   :  { %v3881_v63 = vpop.permute.xlu0 %3880 }
0x3bc1   :  { %v3883_v13 = vmul.f32 %v5802_v9, %v3881_v63 }
0x3bc3   :  { %3885 = vrot.lane.b32.xlu0 %v3883_v13, %s6028_s6 }
0x3c35   :  { %v3886_v14 = vpop.permute.xlu0 %3885 }
0x3c36   :  { %5548 = vmatmul.mubr.msk.f32.vlgmr.msra.gmra.mxu1 %vm132_vm2, %v3886_v14 }
0x3c37   :  { %5556 = vmatpush3.msra.mxu1 %v6684_v22  ;;  %5557 = vmatprep.mubr.msk.f32.mxu1 %vm6026_vm0, %v6025_v1 }
0x3c38   :  { %5571 = vmatprep.subr.mxu1 %v6025_v1 }
0x3cf6   :  { %v3955_v30 = vpop.f32.mrf.mxu1 }
0x3cf7   :  { %v3956_v0 = vadd.f32 %v6693_v41, %v3955_v30 }
0x3cf8   :  { %v5549_v15 = vpop.f32.mrf.mxu1 }
0x3cf9   :  { %v3966_v19 = vrot.slane %v3956_v0, %v6261_v40 }
0x3cfb   :  { %v3967_v61 = vcombine.high %v3966_v19, %v3966_v19  ;;  %v3974_v20 = vrot.slane %v3966_v19, %v6261_v40 }
0x3cfd   :  { %v3981_v42 = vrot.slane %v3967_v61, %v6261_v40  ;;  %v3985_v21 = vrot.slane %v3974_v20, %v6272_v48  ;;  %v4242_v61 = vld [vmem:[#allocation9 + $0xd8] sm:$0xff]  ;;  %v4241_v20 = vld [vmem:[#allocation9 + $0xd0] sm:$0xff] }
0x3cff   :  { %v3989_v7 = vrot.slane %v3981_v42, %v6272_v48  ;;  %v3992_v24 = vadd.f32 %v3985_v21, %v6401_v17  ;;  %v4240_v42 = vld [vmem:[#allocation9 + $0xc8] sm:$0xff]  ;;  %v4239_v21 = vld [vmem:[#allocation9 + $0xc0] sm:$0xff] }
0x3d01   :  { %v3993_v32 = vadd.f32 %v3989_v7, %v6405_v54  ;;  %5805 = vtanh.f32 %v3992_v24 }
0x3d03   :  { %5807 = vtanh.f32 %v3993_v32 }
0x3d0e   :  { %v5806_v26 = vpop.eup %5805 }
0x3d0f   :  { %v3996_v27 = vmul.f32 %v6706_v55, %v5806_v26 }
0x3d10   :  { %v5808_v28 = vpop.eup %5807 }
0x3d11   :  { %v3998_v23 = vsel %vm132_vm2, %v3996_v27, 0.0  ;;  %v3997_v29 = vmul.f32 %v6706_v55, %v5808_v28 }
0x3d12   :  { %3999 = vadd.xlane.f32.xlu1 %v3998_v23  ;;  %v5105_v23 = vld [vmem:[#allocation10 + $0x6] ss:$0 sm:$0xff] }
0x3d13   :  { %v4001_v31 = vsel %vm132_vm2, %v3997_v29, 0.0 }
0x3d14   :  { %4002 = vadd.xlane.f32.xlu0 %v4001_v31 }
0x3d9b   :  { %v4000_v34 = vpop.xlane.xlu1 %3999 }
0x3d9c   :  { %v4004_v36 = vadd.f32 %v4000_v34, %v6423_v35 }
0x3d9d   :  { %v4003_v3 = vpop.xlane.xlu0 %4002 }
0x3d9e   :  { %v4005_v44 = vadd.f32 %v4003_v3, %v6423_v35  ;;  %v4011_v49 = vrot.slane %v4004_v36, %v6421_v33 }
0x3da0   :  { %v4015_v50 = vrot.slane %v4005_v44, %v6421_v33 }
0x3da2   :  { %v4016_v51 = vsel %vm129_vm1, %v4015_v50, %v4011_v49 }
0x3da3   :  { %v4018_v16 = vsel %vm1680_vm4, %v4016_v51, -inf }
0x3da4   :  { %4019 = vmax.xlane.f32.xlu1 %v4018_v16 }
0x3e2d   :  { %v4020_v52 = vpop.xlane.xlu1 %4019 }
0x3e2e   :  { %v4025_v8 = vrot.slane %v4020_v52, %v6272_v48  ;;  %v4029_v53 = vrot.slane %v4020_v52, %v6432_v46 }
0x3e30   :  { %v4032_v56 = vsub.f32 %v4004_v36, %v4025_v8  ;;  %v4033_v5 = vsub.f32 %v4005_v44, %v4029_v53 }
0x3e32   :  { %v4034_v39 = vmul.f32 1.442695, %v4032_v56  ;;  %v4036_v57 = vmul.f32 1.442695, %v4033_v5 }
0x3e34   :  { %5809 = vpow2.f32 %v4034_v39 }
0x3e35   :  { %5811 = vpow2.f32 %v4036_v57 }
0x3e41   :  { %v5810_v58 = vpop.eup %5809 }
0x3e42   :  { %4041 = vperm.xlu1 %5632, %v5810_v58   ;;  %v5812_v43 = vpop.eup %5811 }
0x3e46   :  { %4044 = vperm.xlu1 %5632, %v5812_v43  }
0x3ebd   :  { %v4042_v60 = vpop.permute.xlu1 %4041 }
0x3ebe   :  { %v4049_v4 = vrot.slane %v4042_v60, %v6421_v33 }
0x3ec1   :  { %v4045_v2 = vpop.permute.xlu1 %4044 }
0x3ec2   :  { %v4053_v6 = vrot.slane %v4045_v2, %v6421_v33 }
0x3ec4   :  { %v4054_v9 = vsel %vm129_vm1, %v4053_v6, %v4049_v4 }
0x3ec5   :  { %v4056_v10 = vsel %vm1680_vm4, %v4054_v9, 0.0 }
0x3ec6   :  { %4057 = vadd.xlane.f32.xlu1 %v4056_v10 }
0x3f4f   :  { %v4058_v25 = vpop.xlane.xlu1 %4057 }
0x3f50   :  { %v4067_v59 = vrot.slane %v4058_v25, %v6432_v46  ;;  %v4063_v62 = vrot.slane %v4058_v25, %v6272_v48 }
0x3f52   :  { %5813 = vrcp.f32 %v4067_v59 }
0x3f53   :  { %5815 = vrcp.f32 %v4063_v62 }
0x3f5f   :  { %v5814_v12 = vpop.eup %5813 }
0x3f60   :  { %v4073_v63 = vmul.f32 %v5814_v12, %v5812_v43  ;;  %v5816_v13 = vpop.eup %5815 }
0x3f61   :  { %v4071_v14 = vmul.f32 %v5816_v13, %v5810_v58 }
0x3f62   :  { %4080 = vperm.xlu0 %5631, %v4073_v63  }
0x3f66   :  { %4077 = vperm.xlu0 %5631, %v4071_v14  }
0x3fdd   :  { %v4081_v30 = vpop.permute.xlu0 %4080 }
0x3fde   :  { %v4089_v0 = vrot.slane %v4081_v30, %v6421_v33 }
0x3fe0   :  { %4093 = vst.msk [vmem:[#allocation15 + $0xd] sm:$0x1] %vm1755_vm5, %v4089_v0  ;;  %5558 = vmatmul.mubr.msk.f32.vlgmr.msra.gmra.mxu1 %vm1758_vm6, %v4089_v0 }
0x3fe1   :  { %v4078_v15 = vpop.permute.xlu0 %4077  ;;  %5572 = vmatpush3.msra.mxu1 %v6729_v38  ;;  %5579 = vmatprep.mubr.msk.f32.mxu1 %vm6026_vm0, %v6025_v1 }
0x3fe2   :  { %v4085_v19 = vrot.slane %v4078_v15, %v6421_v33  ;;  %5573 = vmatprep.subr.mxu1 %v6025_v1 }
0x3fe3   :  { %5574 = vmatpush3.msra.mxu1 %v6736_v45 }
0x3fe4   :  { %4092 = vst.msk [vmem:[#allocation15 + $0x5] sm:$0x1] %vm1755_vm5, %v4085_v19  ;;  %5553 = vmatmul.mubr.msk.f32.vlgmr.msra.gmra.mxu0 %vm1758_vm6, %v4085_v19  ;;  %5575 = vmatprep.subr.mxu1 %v6025_v1 }
0x3fe5   :  { %5561 = vmatpush3.msra.mxu0 %v4242_v61  ;;  %5568 = vmatprep.mubr.msk.f32.mxu0 %vm6026_vm0, %v6025_v1 }
0x3fe6   :  { %5562 = vmatprep.subr.mxu0 %v6025_v1  ;;  %5576 = vmatpush3.msra.mxu1 %v6745_v37 }
0x3fe7   :  { %5577 = vmatprep.subr.mxu1 %v6025_v1  ;;  %5563 = vmatpush3.msra.mxu0 %v4241_v20 }
0x3fe8   :  { %5578 = vmatpush3.msra.mxu1 %v6749_v47  ;;  %5564 = vmatprep.subr.mxu0 %v6025_v1 }
0x3fe9   :  { %5587 = vmatprep.subr.mxu1 %v6025_v1  ;;  %5565 = vmatpush3.msra.mxu0 %v4240_v42 }
0x3fea   :  { %5566 = vmatprep.subr.mxu0 %v6025_v1 }
0x3feb   :  { %5567 = vmatpush3.msra.mxu0 %v4239_v21 }
0x3fec   :  { %5582 = vmatprep.subr.mxu0 %v6025_v1 }
0x40a0   :  { %v4234_v7 = vpop.f32.mrf.mxu1 }
0x40a1   :  { %v4253_v32 = vrot.slane %v4234_v7, 7 }
0x40a2   :  { %v5559_v24 = vpop.f32.mrf.mxu1 }
0x40a4   :  { %v4162_v26 = vpop.f32.mrf.mxu0 }
0x40a5   :  { %v4254_v27 = vsel %vm129_vm1, %v4253_v32, %v4162_v26 }
0x40a6   :  { %v5554_v28 = vpop.f32.mrf.mxu0  ;;  %5569 = vmatmul.mubr.msk.f32.vlgmr.msra.gmra.mxu0 %vm132_vm2, %v4254_v27 }
0x40a7   :  { %5583 = vmatpush3.msra.mxu0 %v6669_v18  ;;  %5584 = vmatprep.mubr.msk.f32.mxu0 %vm6026_vm0, %v6025_v1 }
0x40a8   :  { %5592 = vmatprep.subr.mxu0 %v6025_v1 }
0x4166   :  { %v4323_v29 = vpop.f32.mrf.mxu0 }
0x4167   :  { %v4324_v31 = vadd.f32 %v5105_v23, %v4323_v29 }
0x4168   :  { %v5570_v34 = vpop.f32.mrf.mxu0 }
0x4169   :  { %5817 = vtanh.f32 %v4324_v31  ;;  %v5107_v3 = vmul.f32 -1.442695, %v4324_v31 }
0x416b   :  { %5819 = vpow2.f32 %v5107_v3 }
0x4176   :  { %v5818_v36 = vpop.eup %5817 }
0x4177   :  { %4336 = vrot.lane.b32.xlu0 %v5818_v36, %s6027_s4 }
0x4178   :  { %v5820_v44 = vpop.eup %5819 }
0x4179   :  { %v4330_v49 = vadd.f32 1.0, %v5820_v44 }
0x417b   :  { %5821 = vrcp.f32 %v4330_v49 }
0x4188   :  { %v5822_v50 = vpop.eup %5821 }
0x4189   :  { %v4334_v16 = vmul.f32 %v5822_v50, %v6765_v11 }
0x41e9   :  { %v4337_v18 = vpop.permute.xlu0 %4336 }
0x41ea   :  { %v4339_v51 = vmul.f32 %v5822_v50, %v4337_v18 }
0x41ec   :  { %4341 = vrot.lane.b32.xlu0 %v4339_v51, %s6027_s4 }
0x425e   :  { %v4342_v52 = vpop.permute.xlu0 %4341 }
0x425f   :  { %v6832_v8 = vadd.f32 %v4342_v52, %v4334_v16 }
0x4261   :  { %5823 = vtanh.f32 %v6832_v8 }
0x426e   :  { %v5824_v53 = vpop.eup %5823 }
0x426f   :  { %4347 = vrot.lane.b32.xlu1 %v5824_v53, %s6027_s4 }
0x42e1   :  { %v4348_v56 = vpop.permute.xlu1 %4347 }
0x42e2   :  { %v4350_v5 = vmul.f32 %v5822_v50, %v4348_v56 }
0x42e4   :  { %4352 = vrot.lane.b32.xlu0 %v4350_v5, %s6028_s6 }
0x4356   :  { %v4353_v39 = vpop.permute.xlu0 %4352 }
0x4357   :  { %5580 = vmatmul.mubr.msk.f32.vlgmr.msra.gmra.mxu1 %vm132_vm2, %v4353_v39 }
0x4358   :  { %5588 = vmatpush3.msra.mxu1 %v6684_v22  ;;  %5589 = vmatprep.mubr.msk.f32.mxu1 %vm6026_vm0, %v6025_v1 }
0x4359   :  { %5603 = vmatprep.subr.mxu1 %v6025_v1 }
0x4417   :  { %v4422_v11 = vpop.f32.mrf.mxu1 }
0x4418   :  { %v4423_v57 = vadd.f32 %v6693_v41, %v4422_v11 }
0x4419   :  { %v5581_v58 = vpop.f32.mrf.mxu1 }
0x441a   :  { %v4433_v43 = vrot.slane %v4423_v57, %v6261_v40  ;;  %v4709_v58 = vld [vmem:[#allocation9 + $0xf8] sm:$0xff] }
0x441c   :  { %v4434_v60 = vcombine.high %v4433_v43, %v4433_v43  ;;  %v4441_v2 = vrot.slane %v4433_v43, %v6261_v40  ;;  %v4706_v43 = vld [vmem:[#allocation9 + $0xe0] sm:$0xff] }
0x441e   :  { %v4448_v4 = vrot.slane %v4434_v60, %v6261_v40  ;;  %v4452_v6 = vrot.slane %v4441_v2, %v6272_v48 }
0x4420   :  { %v4456_v22 = vrot.slane %v4448_v4, %v6272_v48  ;;  %v4459_v9 = vadd.f32 %v4452_v6, %v6401_v17 }
0x4422   :  { %v4460_v10 = vadd.f32 %v4456_v22, %v6405_v54  ;;  %5825 = vtanh.f32 %v4459_v9 }
0x4424   :  { %5827 = vtanh.f32 %v4460_v10 }
0x442f   :  { %v5826_v25 = vpop.eup %5825 }
0x4430   :  { %v4463_v59 = vmul.f32 %v6706_v55, %v5826_v25 }
0x4431   :  { %v5828_v62 = vpop.eup %5827 }
0x4432   :  { %v4465_v12 = vsel %vm132_vm2, %v4463_v59, 0.0  ;;  %v4464_v63 = vmul.f32 %v6706_v55, %v5828_v62 }
0x4433   :  { %4466 = vadd.xlane.f32.xlu0 %v4465_v12 }
0x4434   :  { %v4468_v13 = vsel %vm132_vm2, %v4464_v63, 0.0 }
0x4435   :  { %4469 = vadd.xlane.f32.xlu1 %v4468_v13 }
0x44bc   :  { %v4467_v14 = vpop.xlane.xlu0 %4466 }
0x44bd   :  { %v4471_v30 = vadd.f32 %v4467_v14, %v6423_v35 }
0x44be   :  { %v4470_v0 = vpop.xlane.xlu1 %4469 }
0x44bf   :  { %v4472_v15 = vadd.f32 %v4470_v0, %v6423_v35  ;;  %v4478_v19 = vrot.slane %v4471_v30, %v6421_v33 }
0x44c1   :  { %v4482_v61 = vrot.slane %v4472_v15, %v6421_v33 }
0x44c3   :  { %v4483_v20 = vsel %vm129_vm1, %v4482_v61, %v4478_v19 }
0x44c4   :  { %v4485_v42 = vsel %vm1680_vm4, %v4483_v20, -inf }
0x44c5   :  { %4486 = vmax.xlane.f32.xlu0 %v4485_v42 }
0x454e   :  { %v4487_v21 = vpop.xlane.xlu0 %4486 }
0x454f   :  { %v4492_v7 = vrot.slane %v4487_v21, %v6272_v48  ;;  %v4496_v24 = vrot.slane %v4487_v21, %v6432_v46 }
0x4551   :  { %v4499_v32 = vsub.f32 %v4471_v30, %v4492_v7  ;;  %v4500_v26 = vsub.f32 %v4472_v15, %v4496_v24 }
0x4553   :  { %v4501_v27 = vmul.f32 1.442695, %v4499_v32  ;;  %v4503_v28 = vmul.f32 1.442695, %v4500_v26 }
0x4555   :  { %5829 = vpow2.f32 %v4501_v27 }
0x4556   :  { %5831 = vpow2.f32 %v4503_v28 }
0x4562   :  { %v5830_v23 = vpop.eup %5829 }
0x4563   :  { %v5832_v29 = vpop.eup %5831  ;;  %4508 = vperm.xlu0 %5631, %v5830_v23  }
0x4564   :  { %4511 = vperm.xlu1 %5632, %v5832_v29  }
0x45de   :  { %v4509_v31 = vpop.permute.xlu0 %4508 }
0x45df   :  { %v4512_v34 = vpop.permute.xlu1 %4511  ;;  %v4516_v36 = vrot.slane %v4509_v31, %v6421_v33 }
0x45e0   :  { %v4520_v3 = vrot.slane %v4512_v34, %v6421_v33 }
0x45e2   :  { %v4521_v44 = vsel %vm129_vm1, %v4520_v3, %v4516_v36 }
0x45e3   :  { %v4523_v49 = vsel %vm1680_vm4, %v4521_v44, 0.0 }
0x45e4   :  { %4524 = vadd.xlane.f32.xlu0 %v4523_v49 }
0x466d   :  { %v4525_v50 = vpop.xlane.xlu0 %4524 }
0x466e   :  { %v4534_v18 = vrot.slane %v4525_v50, %v6432_v46  ;;  %v4530_v51 = vrot.slane %v4525_v50, %v6272_v48 }
0x4670   :  { %5833 = vrcp.f32 %v4534_v18 }
0x4671   :  { %5835 = vrcp.f32 %v4530_v51 }
0x467d   :  { %v5834_v16 = vpop.eup %5833 }
0x467e   :  { %v4540_v52 = vmul.f32 %v5834_v16, %v5832_v29  ;;  %v5836_v53 = vpop.eup %5835 }
0x467f   :  { %v4538_v56 = vmul.f32 %v5836_v53, %v5830_v23 }
0x4680   :  { %4547 = vperm.xlu1 %5632, %v4540_v52  }
0x4684   :  { %4544 = vperm.xlu1 %5632, %v4538_v56  }
0x46fb   :  { %v4548_v5 = vpop.permute.xlu1 %4547 }
0x46fc   :  { %v4556_v39 = vrot.slane %v4548_v5, %v6421_v33 }
0x46fe   :  { %4560 = vst.msk [vmem:[#allocation15 + $0xe] sm:$0x1] %vm1755_vm5, %v4556_v39  ;;  %5590 = vmatmul.mubr.msk.f32.vlgmr.msra.gmra.mxu1 %vm1758_vm6, %v4556_v39 }
0x46ff   :  { %v4545_v11 = vpop.permute.xlu1 %4544  ;;  %5604 = vmatpush3.msra.mxu1 %v6729_v38  ;;  %5611 = vmatprep.mubr.msk.f32.mxu1 %vm6026_vm0, %v6025_v1  ;;  %v4708_v38 = vld [vmem:[#allocation9 + $0xf0] sm:$0xff] }
0x4700   :  { %v4552_v57 = vrot.slane %v4545_v11, %v6421_v33  ;;  %5605 = vmatprep.subr.mxu1 %v6025_v1 }
0x4701   :  { %5606 = vmatpush3.msra.mxu1 %v6736_v45  ;;  %v4707_v45 = vld [vmem:[#allocation9 + $0xe8] sm:$0xff] }
0x4702   :  { %4559 = vst.msk [vmem:[#allocation15 + $0x6] sm:$0x1] %vm1755_vm5, %v4552_v57  ;;  %5585 = vmatmul.mubr.msk.f32.vlgmr.msra.gmra.mxu0 %vm1758_vm6, %v4552_v57  ;;  %5607 = vmatprep.subr.mxu1 %v6025_v1 }
0x4703   :  { %5593 = vmatpush3.msra.mxu0 %v4709_v58  ;;  %5600 = vmatprep.mubr.msk.f32.mxu0 %vm6026_vm0, %v6025_v1 }
0x4704   :  { %5594 = vmatprep.subr.mxu0 %v6025_v1  ;;  %5608 = vmatpush3.msra.mxu1 %v6745_v37 }
0x4705   :  { %5609 = vmatprep.subr.mxu1 %v6025_v1  ;;  %5595 = vmatpush3.msra.mxu0 %v4708_v38 }
0x4706   :  { %5610 = vmatpush3.msra.mxu1 %v6749_v47  ;;  %5596 = vmatprep.subr.mxu0 %v6025_v1  ;;  %v5111_v47 = vld [vmem:[#allocation10 + $0x7] ss:$0 sm:$0xff] }
0x4707   :  { %5597 = vmatpush3.msra.mxu0 %v4707_v45 }
0x4708   :  { %5598 = vmatprep.subr.mxu0 %v6025_v1 }
0x4709   :  { %5599 = vmatpush3.msra.mxu0 %v4706_v43 }
0x47be   :  { %v4701_v60 = vpop.f32.mrf.mxu1 }
0x47bf   :  { %v4720_v4 = vrot.slane %v4701_v60, 7 }
0x47c0   :  { %v5591_v2 = vpop.f32.mrf.mxu1 }
0x47c2   :  { %v4629_v6 = vpop.f32.mrf.mxu0 }
0x47c3   :  { %v4721_v37 = vsel %vm129_vm1, %v4720_v4, %v4629_v6 }
0x47c4   :  { %v5586_v22 = vpop.f32.mrf.mxu0  ;;  %5601 = vmatmul.mubr.msk.f32.vlgmr.msra.gmra.mxu0 %vm132_vm2, %v4721_v37 }
0x4884   :  { %v4790_v9 = vpop.f32.mrf.mxu0 }
0x4885   :  { %v4791_v10 = vadd.f32 %v5111_v47, %v4790_v9 }
0x4886   :  { %v5602_v25 = vpop.f32.mrf.mxu0 }
0x4887   :  { %5837 = vtanh.f32 %v4791_v10  ;;  %v5113_v1 = vmul.f32 -1.442695, %v4791_v10 }
0x4889   :  { %5839 = vpow2.f32 %v5113_v1 }
0x4894   :  { %v5838_v59 = vpop.eup %5837 }
0x4895   :  { %4803 = vrot.lane.b32.xlu1 %v5838_v59, %s6027_s4 }
0x4896   :  { %v5840_v62 = vpop.eup %5839 }
0x4897   :  { %v4797_v12 = vadd.f32 1.0, %v5840_v62 }
0x4899   :  { %5841 = vrcp.f32 %v4797_v12 }
0x48a6   :  { %v5842_v63 = vpop.eup %5841 }
0x48a7   :  { %v4801_v30 = vmul.f32 %v5842_v63, %v6832_v8 }
0x4907   :  { %v4804_v13 = vpop.permute.xlu1 %4803 }
0x4908   :  { %v4806_v14 = vmul.f32 %v5842_v63, %v4804_v13 }
0x490a   :  { %4808 = vrot.lane.b32.xlu1 %v4806_v14, %s6027_s4 }
0x497c   :  { %v4809_v0 = vpop.permute.xlu1 %4808 }
0x497d   :  { %v4811_v15 = vadd.f32 %v4809_v0, %v4801_v30 }
0x497f   :  { %5843 = vtanh.f32 %v4811_v15 }
0x498c   :  { %v5844_v19 = vpop.eup %5843 }
0x498d   :  { %4814 = vrot.lane.b32.xlu1 %v5844_v19, %s6027_s4 }
0x49ff   :  { %v4815_v61 = vpop.permute.xlu1 %4814 }
0x4a00   :  { %v4817_v20 = vmul.f32 %v5842_v63, %v4815_v61 }
0x4a02   :  { %4819 = vrot.lane.b32.xlu1 %v4817_v20, %s6028_s6 }
0x4a74   :  { %v4820_v42 = vpop.permute.xlu1 %4819 }
0x4a75   :  { %5612 = vmatmul.mubr.msk.f32.vlgmr.msra.gmra.mxu1 %vm132_vm2, %v4820_v42 }
0x4b35   :  { %v4889_v21 = vpop.f32.mrf.mxu1 }
0x4b36   :  { %v4890_v7 = vadd.f32 %v6693_v41, %v4889_v21 }
0x4b37   :  { %v5613_v24 = vpop.f32.mrf.mxu1 }
0x4b38   :  { %v4900_v32 = vrot.slane %v4890_v7, %v6261_v40 }
0x4b3a   :  { %v4901_v8 = vcombine.high %v4900_v32, %v4900_v32  ;;  %v4908_v26 = vrot.slane %v4900_v32, %v6261_v40 }
0x4b3c   :  { %v4915_v27 = vrot.slane %v4901_v8, %v6261_v40  ;;  %v4919_v28 = vrot.slane %v4908_v26, %v6272_v48 }
0x4b3e   :  { %v4923_v23 = vrot.slane %v4915_v27, %v6272_v48  ;;  %v4926_v29 = vadd.f32 %v4919_v28, %v6401_v17 }
0x4b40   :  { %v4927_v31 = vadd.f32 %v4923_v23, %v6405_v54  ;;  %5845 = vtanh.f32 %v4926_v29 }
0x4b42   :  { %5847 = vtanh.f32 %v4927_v31 }
0x4b4d   :  { %v5846_v34 = vpop.eup %5845 }
0x4b4e   :  { %v4930_v41 = vmul.f32 %v6706_v55, %v5846_v34 }
0x4b4f   :  { %v5848_v36 = vpop.eup %5847 }
0x4b50   :  { %v4932_v3 = vsel %vm132_vm2, %v4930_v41, 0.0  ;;  %v4931_v44 = vmul.f32 %v6706_v55, %v5848_v36 }
0x4b51   :  { %4933 = vadd.xlane.f32.xlu0 %v4932_v3 }
0x4b52   :  { %v4935_v40 = vsel %vm132_vm2, %v4931_v44, 0.0 }
0x4b53   :  { %4936 = vadd.xlane.f32.xlu1 %v4935_v40 }
0x4bda   :  { %v4934_v49 = vpop.xlane.xlu0 %4933 }
0x4bdb   :  { %v4938_v50 = vadd.f32 %v4934_v49, %v6423_v35 }
0x4bdc   :  { %v4937_v17 = vpop.xlane.xlu1 %4936 }
0x4bdd   :  { %v4939_v54 = vadd.f32 %v4937_v17, %v6423_v35  ;;  %v4945_v18 = vrot.slane %v4938_v50, %v6421_v33 }
0x4bdf   :  { %v4949_v51 = vrot.slane %v4939_v54, %v6421_v33 }
0x4be1   :  { %v4950_v16 = vsel %vm129_vm1, %v4949_v51, %v4945_v18 }
0x4be2   :  { %v4952_v52 = vsel %vm1680_vm4, %v4950_v16, -inf }
0x4be3   :  { %4953 = vmax.xlane.f32.xlu0 %v4952_v52 }
0x4c6c   :  { %v4954_v55 = vpop.xlane.xlu0 %4953 }
0x4c6d   :  { %v4959_v53 = vrot.slane %v4954_v55, %v6272_v48  ;;  %v4963_v56 = vrot.slane %v4954_v55, %v6432_v46 }
0x4c6f   :  { %v4966_v5 = vsub.f32 %v4938_v50, %v4959_v53  ;;  %v4967_v39 = vsub.f32 %v4939_v54, %v4963_v56 }
0x4c71   :  { %v4968_v11 = vmul.f32 1.442695, %v4966_v5  ;;  %v4970_v57 = vmul.f32 1.442695, %v4967_v39 }
0x4c73   :  { %5849 = vpow2.f32 %v4968_v11 }
0x4c74   :  { %5851 = vpow2.f32 %v4970_v57 }
0x4c80   :  { %v5850_v35 = vpop.eup %5849 }
0x4c81   :  { %4975 = vperm.xlu0 %5631, %v5850_v35   ;;  %v5852_v58 = vpop.eup %5851 }
0x4c85   :  { %4978 = vperm.xlu0 %5631, %v5852_v58  }
0x4cfc   :  { %v4976_v38 = vpop.permute.xlu0 %4975 }
0x4cfd   :  { %v4983_v43 = vrot.slane %v4976_v38, %v6421_v33 }
0x4d00   :  { %v4979_v45 = vpop.permute.xlu0 %4978 }
0x4d01   :  { %v4987_v60 = vrot.slane %v4979_v45, %v6421_v33 }
0x4d03   :  { %v4988_v2 = vsel %vm129_vm1, %v4987_v60, %v4983_v43 }
0x4d04   :  { %v4990_v4 = vsel %vm1680_vm4, %v4988_v2, 0.0 }
0x4d05   :  { %4991 = vadd.xlane.f32.xlu0 %v4990_v4 }
0x4d8e   :  { %v4992_v6 = vpop.xlane.xlu0 %4991 }
0x4d8f   :  { %v4997_v37 = vrot.slane %v4992_v6, %v6272_v48  ;;  %v5001_v22 = vrot.slane %v4992_v6, %v6432_v46 }
0x4d91   :  { %5853 = vrcp.f32 %v4997_v37 }
0x4d92   :  { %5855 = vrcp.f32 %v5001_v22 }
0x4d9e   :  { %v5854_v47 = vpop.eup %5853 }
0x4d9f   :  { %v5005_v9 = vmul.f32 %v5854_v47, %v5850_v35  ;;  %v5856_v10 = vpop.eup %5855 }
0x4da0   :  { %v5007_v25 = vmul.f32 %v5856_v10, %v5852_v58 }
0x4da1   :  { %5011 = vperm.xlu1 %5632, %v5005_v9  }
0x4da5   :  { %5014 = vperm.xlu1 %5632, %v5007_v25  }
0x4e1c   :  { %v5012_v59 = vpop.permute.xlu1 %5011 }
0x4e1d   :  { %v5019_v1 = vrot.slane %v5012_v59, %v6421_v33 }
0x4e1f   :  { %5026 = vst.msk [vmem:[#allocation15 + $0x7] sm:$0x1] %vm1755_vm5, %v5019_v1 }
0x4e20   :  { %v5015_v62 = vpop.permute.xlu1 %5014 }
0x4e21   :  { %v5023_v48 = vrot.slane %v5015_v62, %v6421_v33 }
0x4e23   :  { %5027 = vst.msk [vmem:[#allocation15 + $0xf] sm:$0x1] %vm1755_vm5, %v5023_v48 }
0x4e24   :  { %5996 = shalt.err (!%p5993_p6)
}
0x4e25   :  { %5039 = dma.vmem_to_hbm [thread:$0]  %s5034_s12, 256, %s6942_s10, [#allocation6], %s6017_s9, %s6017_s9, %s6018_s20  }
0x4e26   :  { %6013 = dma.done.wait [#allocation6], 256  }
0x4e27   :  { %6014 = vsyncadd [#allocation6], 4294967040 }
0x4e28   :  { %5043 = vsyncpa [#allocation5], 1 }
0x4e29   :  { %5044 = vsyncpa [#allocation8], 1 }
0x4e2a   :  { %5045 = vsyncpa [#allocation11], 1 }
0x4e2b   :  { %5046 = vsyncpa [#allocation14], 1 }
0x4e2c   :  { %5047 = vsyncpa [#allocation6], 1 }

</bundles_post_ra>
